<compile_context>
chip_gen: v7x
topology: tpu7x:2x2x1
jax: 0.10.0
libtpu: 0.0.40
codegen_flags: <defaults>
</compile_context>

<pallas_src>
import functools

import jax
import jax.numpy as jnp
from jax.experimental import pallas as pl
from jax.experimental.pallas import tpu as pltpu

# ----------------------------- model hyper-params (scaled-down HuBERT) -------
CONV_DIMS = (16, 16, 16)
CONV_KERNELS = (10, 3, 2)
CONV_STRIDES = (5, 2, 2)
HIDDEN = 32
NUM_HEADS = 4
INTERMEDIATE = 64
NUM_LAYERS = 2
POS_KERNEL = 4
POS_GROUPS = 2
POS_PAD = POS_KERNEL // 2
LN_EPS = 1e-5
PROC_EPS = 1e-7


def _gelu(x):
    # TODO(synk): erf-based GELU would match HF bit-exactly; tanh approx used on TPU.
    return jax.nn.gelu(x, approximate=True)


def _layernorm(x, g, b, eps):
    """LayerNorm over the last axis; g/b are (1, C) and broadcast in-kernel."""
    mu = jnp.mean(x, axis=-1, keepdims=True)
    var = jnp.mean(jnp.square(x - mu), axis=-1, keepdims=True)
    return (x - mu) * jax.lax.rsqrt(var + eps) * g + b


# ----------------------------- Pallas kernels --------------------------------
def _conv0_kernel(x_ref, w_ref, g_ref, b_ref, o_ref, *,
                  t_out, n_shifts, n_valid, proc_eps, gn_eps):
    """Processor zero-mean/unit-var norm + conv0 + GroupNorm(time) + GELU (per batch)."""
    x = x_ref[0]                                            # [P, stride*Cin] strided audio
    # Processor norm over the whole utterance (pad zeros contribute 0 -> stats exact).
    s1 = jnp.sum(x, keepdims=True)
    s2 = jnp.sum(x * x, keepdims=True)
    mean = s1 * (1.0 / n_valid)
    var = s2 * (1.0 / n_valid) - mean * mean
    xn = (x - mean) * jax.lax.rsqrt(var + proc_eps)
    # Conv as n_shifts shifted contiguous matmuls (accumulated in registers/VMEM).
    acc = jnp.dot(xn[0:t_out], w_ref[0], preferred_element_type=jnp.float32)
    for m in range(1, n_shifts):
        acc = acc + jnp.dot(xn[m:m + t_out], w_ref[m],
                            preferred_element_type=jnp.float32)
    # GroupNorm(num_groups == channels): per-channel norm over time (natural layout).
    mu = jnp.mean(acc, axis=0, keepdims=True)
    va = jnp.mean(jnp.square(acc - mu), axis=0, keepdims=True)
    y = (acc - mu) * jax.lax.rsqrt(va + gn_eps) * g_ref[...] + b_ref[...]
    o_ref[0] = _gelu(y)


def _conv_gelu_kernel(x_ref, w_ref, o_ref, *, t_out, n_shifts):
    """conv (shifted matmuls) + GELU (per batch)."""
    x = x_ref[0]
    acc = jnp.dot(x[0:t_out], w_ref[0], preferred_element_type=jnp.float32)
    for m in range(1, n_shifts):
        acc = acc + jnp.dot(x[m:m + t_out], w_ref[m],
                            preferred_element_type=jnp.float32)
    o_ref[0] = _gelu(acc)


def _conv_fp_kernel(x_ref, w_ref, lng_ref, lnb_ref, pw_ref, pb_ref, o_ref, *,
                    t_out, n_shifts, eps):
    """conv + GELU + feature-projection LayerNorm + Linear (per batch)."""
    x = x_ref[0]
    acc = jnp.dot(x[0:t_out], w_ref[0], preferred_element_type=jnp.float32)
    for m in range(1, n_shifts):
        acc = acc + jnp.dot(x[m:m + t_out], w_ref[m],
                            preferred_element_type=jnp.float32)
    y = _gelu(acc)
    y = _layernorm(y, lng_ref[...], lnb_ref[...], eps)
    o_ref[0] = jnp.dot(y, pw_ref[...], preferred_element_type=jnp.float32) + pb_ref[...]


def _posconv_kernel(xpad_ref, w_ref, b_ref, g_ref, be_ref, o_ref, *,
                    t_out, kernel, pad, eps):
    """Grouped positional conv (block-diag weight) + GELU + residual + encoder LN."""
    xpad = xpad_ref[0]                                      # [T + 2*pad, H]
    acc = jnp.dot(xpad[0:t_out], w_ref[0], preferred_element_type=jnp.float32)
    for j in range(1, kernel):
        acc = acc + jnp.dot(xpad[j:j + t_out], w_ref[j],
                            preferred_element_type=jnp.float32)
    pos = _gelu(acc + b_ref[...])                           # even kernel -> only T outputs kept
    y = xpad[pad:pad + t_out] + pos                         # residual (unpadded features)
    o_ref[0] = _layernorm(y, g_ref[...], be_ref[...], eps)


def _encoder_layer_kernel(x_ref, wqkv_ref, bqkv_ref, wo_ref, bo_ref,
                          ln1_g_ref, ln1_b_ref, w1_ref, b1_ref,
                          w2_ref, b2_ref, ln2_g_ref, ln2_b_ref, o_ref, *,
                          num_heads, eps):
    """One fused post-norm transformer layer (per batch): QKV, MHA, O-proj, LN, FFN, LN."""
    x = x_ref[0]                                            # [T, H]
    t, hdim = x.shape
    hd = hdim // num_heads
    scale = float(hd) ** -0.5

    # Fused QKV projection: [T, H] @ [H, 3H].
    qkv = jnp.dot(x, wqkv_ref[...], preferred_element_type=jnp.float32) + bqkv_ref[...]

    # Per-head attention; output projection folded into the head loop (no concat).
    ctx = None
    for h in range(num_heads):
        qh = qkv[:, h * hd:(h + 1) * hd] * scale
        kh = qkv[:, hdim + h * hd:hdim + (h + 1) * hd]
        vh = qkv[:, 2 * hdim + h * hd:2 * hdim + (h + 1) * hd]
        s = jax.lax.dot_general(qh, kh, (((1,), (1,)), ((), ())),
                                preferred_element_type=jnp.float32)    # [T, T], no k.T
        m = jnp.max(s, axis=-1, keepdims=True)
        p = jnp.exp(s - m)
        p = p * pl.reciprocal(jnp.sum(p, axis=-1, keepdims=True), approx=True)
        oh = jnp.dot(p, vh, preferred_element_type=jnp.float32)        # [T, hd]
        proj = jnp.dot(oh, wo_ref[h * hd:(h + 1) * hd, :],
                       preferred_element_type=jnp.float32)             # [T, H]
        ctx = proj if ctx is None else ctx + proj
    attn = ctx + bo_ref[...]

    x = _layernorm(x + attn, ln1_g_ref[...], ln1_b_ref[...], eps)
    h1 = _gelu(jnp.dot(x, w1_ref[...], preferred_element_type=jnp.float32) + b1_ref[...])
    h2 = jnp.dot(h1, w2_ref[...], preferred_element_type=jnp.float32) + b2_ref[...]
    o_ref[0] = _layernorm(x + h2, ln2_g_ref[...], ln2_b_ref[...], eps)


# ----------------------------- pallas_call plumbing --------------------------
def _zero_index(i, *, nd):
    return (0,) * nd


def _batched_call(kernel, x, weights, out_tc):
    """Run `kernel` with grid=(B,) over the batch axis of x [B, Tx, Cx]; all weight
    arrays are fully VMEM-resident (full-array blocks with constant index maps)."""
    b = x.shape[0]
    x_spec = pl.BlockSpec((1,) + x.shape[1:], lambda i: (i, 0, 0))
    w_specs = [pl.BlockSpec(w.shape, functools.partial(_zero_index, nd=w.ndim))
               for w in weights]
    out_spec = pl.BlockSpec((1,) + out_tc, lambda i: (i, 0, 0))
    return pl.pallas_call(
        kernel,
        out_shape=jax.ShapeDtypeStruct((b,) + out_tc, jnp.float32),
        grid=(b,),
        in_specs=[x_spec] + w_specs,
        out_specs=out_spec,
        compiler_params=pltpu.CompilerParams(dimension_semantics=("parallel",)),
    )(x, *weights)


def _strided_view(x, kernel, stride):
    """x: [B, L, Cin] -> (x_strided [B, P, stride*Cin], t_out, n_shifts).
    Stride-phase reshape: conv(x) == sum_m x_strided[t+m] @ W_block[m]."""
    b, length, cin = x.shape
    t_out = (length - kernel) // stride + 1
    n_shifts = -(-kernel // stride)
    p = t_out + n_shifts - 1
    lp = p * stride
    if lp > length:
        x = jnp.pad(x, ((0, 0), (0, lp - length), (0, 0)))
    elif lp < length:
        x = x[:, :lp, :]
    return x.reshape(b, p, stride * cin), t_out, n_shifts


def _conv_weight_blocks(w, stride):
    """w: [k, Cin, Cout] -> [n_shifts, stride*Cin, Cout] (zero-padded tap blocks)."""
    k, cin, cout = w.shape
    n_shifts = -(-k // stride)
    wp = jnp.zeros((n_shifts * stride, cin, cout), w.dtype).at[:k].set(w)
    return wp.reshape(n_shifts, stride * cin, cout)


def _posconv_weight(pos_w):
    """pos_w: [G, k, gs, gs] -> [k, H, H] block-diagonal per-tap weights."""
    groups, k, gs, _ = pos_w.shape
    h = groups * gs
    w = jnp.zeros((k, h, h), pos_w.dtype)
    for g in range(groups):
        w = w.at[:, g * gs:(g + 1) * gs, g * gs:(g + 1) * gs].set(pos_w[g])
    return w


# ----------------------------- HuBERT forward --------------------------------
def hubert_forward(audios, params):
    """audios: [B, L] float32 -> (last_hidden_state [B, T, HIDDEN], mask [B, T])."""
    b, length = audios.shape
    x = audios[:, :, None]                                  # [B, L, 1] channels-last

    # conv0: processor norm + conv + GroupNorm + GELU, fused.
    xs, t0, m0 = _strided_view(x, CONV_KERNELS[0], CONV_STRIDES[0])
    x = _batched_call(
        functools.partial(_conv0_kernel, t_out=t0, n_shifts=m0, n_valid=float(length),
                          proc_eps=PROC_EPS, gn_eps=LN_EPS),
        xs, [params["conv_w_blocks"][0], params["gn_g"], params["gn_b"]],
        (t0, CONV_DIMS[0]))

    # conv1: conv + GELU.
    xs, t1, m1 = _strided_view(x, CONV_KERNELS[1], CONV_STRIDES[1])
    x = _batched_call(
        functools.partial(_conv_gelu_kernel, t_out=t1, n_shifts=m1),
        xs, [params["conv_w_blocks"][1]], (t1, CONV_DIMS[1]))

    # conv2: conv + GELU + feature-projection LN + Linear, fused.
    xs, t2, m2 = _strided_view(x, CONV_KERNELS[2], CONV_STRIDES[2])
    x = _batched_call(
        functools.partial(_conv_fp_kernel, t_out=t2, n_shifts=m2, eps=LN_EPS),
        xs, [params["conv_w_blocks"][2], params["fp_ln_g"], params["fp_ln_b"],
             params["fp_w"], params["fp_b"]],
        (t2, HIDDEN))

    # positional grouped conv + GELU + residual + encoder LayerNorm, fused.
    xpad = jnp.pad(x, ((0, 0), (POS_PAD, POS_PAD), (0, 0)))
    x = _batched_call(
        functools.partial(_posconv_kernel, t_out=t2, kernel=POS_KERNEL,
                          pad=POS_PAD, eps=LN_EPS),
        xpad, [params["pos_w_blocks"], params["pos_b"],
               params["enc_ln_g"], params["enc_ln_b"]],
        (t2, HIDDEN))

    # Transformer encoder layers (post-norm), one fused kernel per layer.
    for lp in params["layers"]:
        x = _batched_call(
            functools.partial(_encoder_layer_kernel, num_heads=NUM_HEADS, eps=LN_EPS),
            x, [lp["wqkv"], lp["bqkv"], lp["wo"], lp["bo"],
                lp["ln1_g"], lp["ln1_b"], lp["w1"], lp["b1"],
                lp["w2"], lp["b2"], lp["ln2_g"], lp["ln2_b"]],
            (t2, HIDDEN))

    mask = jnp.ones((b, t2), dtype=jnp.bool_)
    return x, mask


# ----------------------------- deterministic parameter init ------------------
def init_params(key):
    keys = iter(jax.random.split(key, 64))

    def nrm(shape, scale=0.02):
        return scale * jax.random.normal(next(keys), shape, dtype=jnp.float32)

    params = {}

    # Conv feature extractor: store stride-phase weight blocks directly.
    conv_blocks = []
    cin = 1
    for cout, ksz, st in zip(CONV_DIMS, CONV_KERNELS, CONV_STRIDES):
        w = nrm((ksz, cin, cout), scale=1.0 / (ksz * cin) ** 0.5)
        conv_blocks.append(_conv_weight_blocks(w, st))
        cin = cout
    params["conv_w_blocks"] = conv_blocks
    params["gn_g"] = jnp.ones((1, CONV_DIMS[0]), jnp.float32)
    params["gn_b"] = jnp.zeros((1, CONV_DIMS[0]), jnp.float32)

    # Feature projection.
    params["fp_ln_g"] = jnp.ones((1, CONV_DIMS[-1]), jnp.float32)
    params["fp_ln_b"] = jnp.zeros((1, CONV_DIMS[-1]), jnp.float32)
    params["fp_w"] = nrm((CONV_DIMS[-1], HIDDEN))
    params["fp_b"] = jnp.zeros((1, HIDDEN), jnp.float32)

    # Positional grouped conv -> block-diagonal per-tap weight.
    gs = HIDDEN // POS_GROUPS
    pos_w = nrm((POS_GROUPS, POS_KERNEL, gs, gs), scale=1.0 / (POS_KERNEL * gs) ** 0.5)
    params["pos_w_blocks"] = _posconv_weight(pos_w)
    params["pos_b"] = jnp.zeros((1, HIDDEN), jnp.float32)

    params["enc_ln_g"] = jnp.ones((1, HIDDEN), jnp.float32)
    params["enc_ln_b"] = jnp.zeros((1, HIDDEN), jnp.float32)

    layers = []
    for _ in range(NUM_LAYERS):
        wq, wk, wv = (nrm((HIDDEN, HIDDEN)) for _ in range(3))
        lp = {
            "wqkv": jnp.concatenate([wq, wk, wv], axis=1),          # fused [H, 3H]
            "bqkv": jnp.zeros((1, 3 * HIDDEN), jnp.float32),
            "wo": nrm((HIDDEN, HIDDEN)),
            "bo": jnp.zeros((1, HIDDEN), jnp.float32),
            "ln1_g": jnp.ones((1, HIDDEN), jnp.float32),
            "ln1_b": jnp.zeros((1, HIDDEN), jnp.float32),
            "w1": nrm((HIDDEN, INTERMEDIATE)),
            "b1": jnp.zeros((1, INTERMEDIATE), jnp.float32),
            "w2": nrm((INTERMEDIATE, HIDDEN)),
            "b2": jnp.zeros((1, HIDDEN), jnp.float32),
            "ln2_g": jnp.ones((1, HIDDEN), jnp.float32),
            "ln2_b": jnp.zeros((1, HIDDEN), jnp.float32),
        }
        layers.append(lp)
    params["layers"] = layers
    return params


# ----------------------------- main -------------------------------------------
if __name__ == "__main__":
    key = jax.random.PRNGKey(0)
    k_audio, k_params = jax.random.split(key)

    B, L = 2, 400                       # small synthetic "raw audio"
    audios = jax.random.normal(k_audio, (B, L), dtype=jnp.float32)
    params = init_params(k_params)

    fwd = jax.jit(hubert_forward)
    embeds, mask = fwd(audios, params)
    jax.block_until_ready((embeds, mask))

    # Expected: T = 19 frames from strides (5,2,2) on L=400.
    assert embeds.shape == (B, 19, HIDDEN), embeds.shape
    assert mask.shape == (B, 19) and bool(jnp.all(mask)), mask.shape
    print("KERNEL_OK")
</pallas_src>

<mosaic_0001>
module attributes {stable_mosaic.version = 11 : i64} {
  func.func @_conv0_kernel(%arg0: i32, %arg1: memref<1x80x5xf32, #tpu.memory_space<vmem>>, %arg2: memref<2x5x16xf32, #tpu.memory_space<vmem>>, %arg3: memref<1x16xf32, #tpu.memory_space<vmem>>, %arg4: memref<1x16xf32, #tpu.memory_space<vmem>>, %arg5: memref<1x79x16xf32, #tpu.memory_space<vmem>>) attributes {dimension_semantics = [#tpu.dimension_semantics<parallel>], iteration_bounds = array<i64: 2>, scalar_prefetch = 0 : i64, scratch_operands = 0 : i64, tpu.core_type = #tpu.core_type<tc>, window_params = [{transform_indices = @transform_0, window_bounds = array<i64: 1, 80, 5>}, {pipeline_mode = #tpu.pipeline_mode<synchronous>, transform_indices = @transform_1, window_bounds = array<i64: 2, 5, 16>}, {pipeline_mode = #tpu.pipeline_mode<synchronous>, transform_indices = @transform_2, window_bounds = array<i64: 1, 16>}, {pipeline_mode = #tpu.pipeline_mode<synchronous>, transform_indices = @transform_3, window_bounds = array<i64: 1, 16>}, {transform_indices = @transform_4, window_bounds = array<i64: 1, 79, 16>}]} {
    %c0 = arith.constant 0 : index
    %c0_0 = arith.constant 0 : index
    %c0_1 = arith.constant 0 : index
    %0 = vector.load %arg1[%c0, %c0_0, %c0_1] : memref<1x80x5xf32, #tpu.memory_space<vmem>>, vector<1x80x5xf32>
    %1 = vector.shape_cast %0 : vector<1x80x5xf32> to vector<80x5xf32>
    %2 = vector.shape_cast %1 : vector<80x5xf32> to vector<1x80x5xf32>
    %cst = arith.constant dense<0.000000e+00> : vector<1xf32>
    %3 = vector.multi_reduction <add>, %2, %cst [1, 2] : vector<1x80x5xf32> to vector<1xf32>
    %4 = vector.shape_cast %3 : vector<1xf32> to vector<1x1x1xf32>
    %5 = vector.extract %4[0, 0, 0] : f32 from vector<1x1x1xf32>
    %6 = vector.broadcast %5 : f32 to vector<1x1xf32>
    %7 = arith.mulf %1, %1 : vector<80x5xf32>
    %8 = vector.shape_cast %7 : vector<80x5xf32> to vector<1x80x5xf32>
    %cst_2 = arith.constant dense<0.000000e+00> : vector<1xf32>
    %9 = vector.multi_reduction <add>, %8, %cst_2 [1, 2] : vector<1x80x5xf32> to vector<1xf32>
    %10 = vector.shape_cast %9 : vector<1xf32> to vector<1x1x1xf32>
    %11 = vector.extract %10[0, 0, 0] : f32 from vector<1x1x1xf32>
    %12 = vector.broadcast %11 : f32 to vector<1x1xf32>
    %cst_3 = arith.constant 2.500000e-03 : f32
    %13 = vector.broadcast %cst_3 : f32 to vector<1x1xf32>
    %14 = arith.mulf %6, %13 : vector<1x1xf32>
    %cst_4 = arith.constant 2.500000e-03 : f32
    %15 = vector.broadcast %cst_4 : f32 to vector<1x1xf32>
    %16 = arith.mulf %12, %15 : vector<1x1xf32>
    %17 = arith.mulf %14, %14 : vector<1x1xf32>
    %18 = arith.subf %16, %17 : vector<1x1xf32>
    %19 = vector.broadcast %14 : vector<1x1xf32> to vector<80x5xf32>
    %20 = arith.subf %1, %19 : vector<80x5xf32>
    %cst_5 = arith.constant 1.000000e-07 : f32
    %21 = vector.broadcast %cst_5 : f32 to vector<1x1xf32>
    %22 = arith.addf %18, %21 : vector<1x1xf32>
    %23 = math.rsqrt %22 : vector<1x1xf32>
    %24 = vector.broadcast %23 : vector<1x1xf32> to vector<80x5xf32>
    %25 = arith.mulf %20, %24 : vector<80x5xf32>
    %26 = vector.extract_strided_slice %25 {offsets = [0, 0], sizes = [79, 5], strides = [1, 1]} : vector<80x5xf32> to vector<79x5xf32>
    %c0_6 = arith.constant 0 : index
    %c0_7 = arith.constant 0 : index
    %c0_8 = arith.constant 0 : index
    %27 = vector.load %arg2[%c0_6, %c0_7, %c0_8] : memref<2x5x16xf32, #tpu.memory_space<vmem>>, vector<1x5x16xf32>
    %28 = vector.shape_cast %27 : vector<1x5x16xf32> to vector<5x16xf32>
    %cst_9 = arith.constant dense<0.000000e+00> : vector<79x16xf32>
    %29 = tpu.matmul %26, %28, %cst_9 {dimension_numbers = #tpu.dot_dimension_numbers<[1], [0], [0], [1], [0, 0, 1, 1], [], []>} : vector<79x5xf32>, vector<5x16xf32>, vector<79x16xf32> -> vector<79x16xf32>
    %30 = vector.extract_strided_slice %25 {offsets = [1, 0], sizes = [79, 5], strides = [1, 1]} : vector<80x5xf32> to vector<79x5xf32>
    %c1 = arith.constant 1 : index
    %c0_10 = arith.constant 0 : index
    %c0_11 = arith.constant 0 : index
    %31 = vector.load %arg2[%c1, %c0_10, %c0_11] : memref<2x5x16xf32, #tpu.memory_space<vmem>>, vector<1x5x16xf32>
    %32 = vector.shape_cast %31 : vector<1x5x16xf32> to vector<5x16xf32>
    %cst_12 = arith.constant dense<0.000000e+00> : vector<79x16xf32>
    %33 = tpu.matmul %30, %32, %cst_12 {dimension_numbers = #tpu.dot_dimension_numbers<[1], [0], [0], [1], [0, 0, 1, 1], [], []>} : vector<79x5xf32>, vector<5x16xf32>, vector<79x16xf32> -> vector<79x16xf32>
    %34 = arith.addf %29, %33 : vector<79x16xf32>
    %cst_13 = arith.constant dense<0.000000e+00> : vector<16xf32>
    %35 = vector.multi_reduction <add>, %34, %cst_13 [0] : vector<79x16xf32> to vector<16xf32>
    %36 = vector.shape_cast %35 : vector<16xf32> to vector<1x16xf32>
    %cst_14 = arith.constant 7.900000e+01 : f32
    %37 = vector.broadcast %cst_14 : f32 to vector<1x16xf32>
    %38 = arith.divf %36, %37 : vector<1x16xf32>
    %39 = vector.broadcast %38 : vector<1x16xf32> to vector<79x16xf32>
    %40 = arith.subf %34, %39 : vector<79x16xf32>
    %41 = arith.mulf %40, %40 : vector<79x16xf32>
    %cst_15 = arith.constant dense<0.000000e+00> : vector<16xf32>
    %42 = vector.multi_reduction <add>, %41, %cst_15 [0] : vector<79x16xf32> to vector<16xf32>
    %43 = vector.shape_cast %42 : vector<16xf32> to vector<1x16xf32>
    %cst_16 = arith.constant 7.900000e+01 : f32
    %44 = vector.broadcast %cst_16 : f32 to vector<1x16xf32>
    %45 = arith.divf %43, %44 : vector<1x16xf32>
    %46 = vector.broadcast %38 : vector<1x16xf32> to vector<79x16xf32>
    %47 = arith.subf %34, %46 : vector<79x16xf32>
    %cst_17 = arith.constant 9.99999974E-6 : f32
    %48 = vector.broadcast %cst_17 : f32 to vector<1x16xf32>
    %49 = arith.addf %45, %48 : vector<1x16xf32>
    %50 = math.rsqrt %49 : vector<1x16xf32>
    %51 = vector.broadcast %50 : vector<1x16xf32> to vector<79x16xf32>
    %52 = arith.mulf %47, %51 : vector<79x16xf32>
    %c0_18 = arith.constant 0 : index
    %c0_19 = arith.constant 0 : index
    %53 = vector.load %arg3[%c0_18, %c0_19] : memref<1x16xf32, #tpu.memory_space<vmem>>, vector<1x16xf32>
    %54 = vector.broadcast %53 : vector<1x16xf32> to vector<79x16xf32>
    %55 = arith.mulf %52, %54 : vector<79x16xf32>
    %c0_20 = arith.constant 0 : index
    %c0_21 = arith.constant 0 : index
    %56 = vector.load %arg4[%c0_20, %c0_21] : memref<1x16xf32, #tpu.memory_space<vmem>>, vector<1x16xf32>
    %57 = vector.broadcast %56 : vector<1x16xf32> to vector<79x16xf32>
    %58 = arith.addf %55, %57 : vector<79x16xf32>
    %59 = arith.mulf %58, %58 : vector<79x16xf32>
    %60 = arith.mulf %58, %59 : vector<79x16xf32>
    %cst_22 = arith.constant 4.471500e-02 : f32
    %61 = vector.broadcast %cst_22 : f32 to vector<79x16xf32>
    %62 = arith.mulf %61, %60 : vector<79x16xf32>
    %63 = arith.addf %58, %62 : vector<79x16xf32>
    %cst_23 = arith.constant 0.797884583 : f32
    %64 = vector.broadcast %cst_23 : f32 to vector<79x16xf32>
    %65 = arith.mulf %64, %63 : vector<79x16xf32>
    %66 = math.tanh %65 : vector<79x16xf32>
    %cst_24 = arith.constant 1.000000e+00 : f32
    %67 = vector.broadcast %cst_24 : f32 to vector<79x16xf32>
    %68 = arith.addf %67, %66 : vector<79x16xf32>
    %cst_25 = arith.constant 5.000000e-01 : f32
    %69 = vector.broadcast %cst_25 : f32 to vector<79x16xf32>
    %70 = arith.mulf %69, %68 : vector<79x16xf32>
    %71 = arith.mulf %58, %70 : vector<79x16xf32>
    %c0_26 = arith.constant 0 : index
    %c0_27 = arith.constant 0 : index
    %c0_28 = arith.constant 0 : index
    %72 = vector.load %arg5[%c0_26, %c0_27, %c0_28] : memref<1x79x16xf32, #tpu.memory_space<vmem>>, vector<1x79x16xf32>
    %73 = vector.shape_cast %72 : vector<1x79x16xf32> to vector<79x16xf32>
    %74 = vector.shape_cast %71 : vector<79x16xf32> to vector<1x79x16xf32>
    tpu.vector_store %arg5[%c0_26, %c0_27, %c0_28], %74 {strides = array<i32>} : memref<1x79x16xf32, #tpu.memory_space<vmem>>, vector<1x79x16xf32>,
    return
  }
  func.func @transform_0(%arg0: i32) -> (i32, i32, i32) {
    %c0_i32 = arith.constant 0 : i32
    %c0_i32_0 = arith.constant 0 : i32
    %c0_i32_1 = arith.constant 0 : i32
    return %arg0, %c0_i32, %c0_i32_0 : i32, i32, i32
  }
  func.func @transform_1(%arg0: i32) -> (i32, i32, i32) {
    %c0_i32 = arith.constant 0 : i32
    %c0_i32_0 = arith.constant 0 : i32
    %c0_i32_1 = arith.constant 0 : i32
    %c0_i32_2 = arith.constant 0 : i32
    return %c0_i32, %c0_i32_0, %c0_i32_1 : i32, i32, i32
  }
  func.func @transform_2(%arg0: i32) -> (i32, i32) {
    %c0_i32 = arith.constant 0 : i32
    %c0_i32_0 = arith.constant 0 : i32
    %c0_i32_1 = arith.constant 0 : i32
    return %c0_i32, %c0_i32_0 : i32, i32
  }
  func.func @transform_3(%arg0: i32) -> (i32, i32) {
    %c0_i32 = arith.constant 0 : i32
    %c0_i32_0 = arith.constant 0 : i32
    %c0_i32_1 = arith.constant 0 : i32
    return %c0_i32, %c0_i32_0 : i32, i32
  }
  func.func @transform_4(%arg0: i32) -> (i32, i32, i32) {
    %c0_i32 = arith.constant 0 : i32
    %c0_i32_0 = arith.constant 0 : i32
    %c0_i32_1 = arith.constant 0 : i32
    return %arg0, %c0_i32, %c0_i32_0 : i32, i32, i32
  }
}

module attributes {stable_mosaic.version = 11 : i64} {
  func.func @_conv_gelu_kernel(%arg0: i32, %arg1: memref<1x40x32xf32, #tpu.memory_space<vmem>>, %arg2: memref<2x32x16xf32, #tpu.memory_space<vmem>>, %arg3: memref<1x39x16xf32, #tpu.memory_space<vmem>>) attributes {dimension_semantics = [#tpu.dimension_semantics<parallel>], iteration_bounds = array<i64: 2>, scalar_prefetch = 0 : i64, scratch_operands = 0 : i64, tpu.core_type = #tpu.core_type<tc>, window_params = [{transform_indices = @transform_0, window_bounds = array<i64: 1, 40, 32>}, {pipeline_mode = #tpu.pipeline_mode<synchronous>, transform_indices = @transform_1, window_bounds = array<i64: 2, 32, 16>}, {transform_indices = @transform_2, window_bounds = array<i64: 1, 39, 16>}]} {
    %c0 = arith.constant 0 : index
    %c0_0 = arith.constant 0 : index
    %c0_1 = arith.constant 0 : index
    %0 = vector.load %arg1[%c0, %c0_0, %c0_1] : memref<1x40x32xf32, #tpu.memory_space<vmem>>, vector<1x40x32xf32>
    %1 = vector.shape_cast %0 : vector<1x40x32xf32> to vector<40x32xf32>
    %2 = vector.extract_strided_slice %1 {offsets = [0, 0], sizes = [39, 32], strides = [1, 1]} : vector<40x32xf32> to vector<39x32xf32>
    %c0_2 = arith.constant 0 : index
    %c0_3 = arith.constant 0 : index
    %c0_4 = arith.constant 0 : index
    %3 = vector.load %arg2[%c0_2, %c0_3, %c0_4] : memref<2x32x16xf32, #tpu.memory_space<vmem>>, vector<1x32x16xf32>
    %4 = vector.shape_cast %3 : vector<1x32x16xf32> to vector<32x16xf32>
    %cst = arith.constant dense<0.000000e+00> : vector<39x16xf32>
    %5 = tpu.matmul %2, %4, %cst {dimension_numbers = #tpu.dot_dimension_numbers<[1], [0], [0], [1], [0, 0, 1, 1], [], []>} : vector<39x32xf32>, vector<32x16xf32>, vector<39x16xf32> -> vector<39x16xf32>
    %6 = vector.extract_strided_slice %1 {offsets = [1, 0], sizes = [39, 32], strides = [1, 1]} : vector<40x32xf32> to vector<39x32xf32>
    %c1 = arith.constant 1 : index
    %c0_5 = arith.constant 0 : index
    %c0_6 = arith.constant 0 : index
    %7 = vector.load %arg2[%c1, %c0_5, %c0_6] : memref<2x32x16xf32, #tpu.memory_space<vmem>>, vector<1x32x16xf32>
    %8 = vector.shape_cast %7 : vector<1x32x16xf32> to vector<32x16xf32>
    %cst_7 = arith.constant dense<0.000000e+00> : vector<39x16xf32>
    %9 = tpu.matmul %6, %8, %cst_7 {dimension_numbers = #tpu.dot_dimension_numbers<[1], [0], [0], [1], [0, 0, 1, 1], [], []>} : vector<39x32xf32>, vector<32x16xf32>, vector<39x16xf32> -> vector<39x16xf32>
    %10 = arith.addf %5, %9 : vector<39x16xf32>
    %11 = arith.mulf %10, %10 : vector<39x16xf32>
    %12 = arith.mulf %10, %11 : vector<39x16xf32>
    %cst_8 = arith.constant 4.471500e-02 : f32
    %13 = vector.broadcast %cst_8 : f32 to vector<39x16xf32>
    %14 = arith.mulf %13, %12 : vector<39x16xf32>
    %15 = arith.addf %10, %14 : vector<39x16xf32>
    %cst_9 = arith.constant 0.797884583 : f32
    %16 = vector.broadcast %cst_9 : f32 to vector<39x16xf32>
    %17 = arith.mulf %16, %15 : vector<39x16xf32>
    %18 = math.tanh %17 : vector<39x16xf32>
    %cst_10 = arith.constant 1.000000e+00 : f32
    %19 = vector.broadcast %cst_10 : f32 to vector<39x16xf32>
    %20 = arith.addf %19, %18 : vector<39x16xf32>
    %cst_11 = arith.constant 5.000000e-01 : f32
    %21 = vector.broadcast %cst_11 : f32 to vector<39x16xf32>
    %22 = arith.mulf %21, %20 : vector<39x16xf32>
    %23 = arith.mulf %10, %22 : vector<39x16xf32>
    %c0_12 = arith.constant 0 : index
    %c0_13 = arith.constant 0 : index
    %c0_14 = arith.constant 0 : index
    %24 = vector.load %arg3[%c0_12, %c0_13, %c0_14] : memref<1x39x16xf32, #tpu.memory_space<vmem>>, vector<1x39x16xf32>
    %25 = vector.shape_cast %24 : vector<1x39x16xf32> to vector<39x16xf32>
    %26 = vector.shape_cast %23 : vector<39x16xf32> to vector<1x39x16xf32>
    tpu.vector_store %arg3[%c0_12, %c0_13, %c0_14], %26 {strides = array<i32>} : memref<1x39x16xf32, #tpu.memory_space<vmem>>, vector<1x39x16xf32>,
    return
  }
  func.func @transform_0(%arg0: i32) -> (i32, i32, i32) {
    %c0_i32 = arith.constant 0 : i32
    %c0_i32_0 = arith.constant 0 : i32
    %c0_i32_1 = arith.constant 0 : i32
    return %arg0, %c0_i32, %c0_i32_0 : i32, i32, i32
  }
  func.func @transform_1(%arg0: i32) -> (i32, i32, i32) {
    %c0_i32 = arith.constant 0 : i32
    %c0_i32_0 = arith.constant 0 : i32
    %c0_i32_1 = arith.constant 0 : i32
    %c0_i32_2 = arith.constant 0 : i32
    return %c0_i32, %c0_i32_0, %c0_i32_1 : i32, i32, i32
  }
  func.func @transform_2(%arg0: i32) -> (i32, i32, i32) {
    %c0_i32 = arith.constant 0 : i32
    %c0_i32_0 = arith.constant 0 : i32
    %c0_i32_1 = arith.constant 0 : i32
    return %arg0, %c0_i32, %c0_i32_0 : i32, i32, i32
  }
}

module attributes {stable_mosaic.version = 11 : i64} {
  func.func @_conv_fp_kernel(%arg0: i32, %arg1: memref<1x19x32xf32, #tpu.memory_space<vmem>>, %arg2: memref<1x32x16xf32, #tpu.memory_space<vmem>>, %arg3: memref<1x16xf32, #tpu.memory_space<vmem>>, %arg4: memref<1x16xf32, #tpu.memory_space<vmem>>, %arg5: memref<16x32xf32, #tpu.memory_space<vmem>>, %arg6: memref<1x32xf32, #tpu.memory_space<vmem>>, %arg7: memref<1x19x32xf32, #tpu.memory_space<vmem>>) attributes {dimension_semantics = [#tpu.dimension_semantics<parallel>], iteration_bounds = array<i64: 2>, scalar_prefetch = 0 : i64, scratch_operands = 0 : i64, tpu.core_type = #tpu.core_type<tc>, window_params = [{transform_indices = @transform_0, window_bounds = array<i64: 1, 19, 32>}, {pipeline_mode = #tpu.pipeline_mode<synchronous>, transform_indices = @transform_1, window_bounds = array<i64: 1, 32, 16>}, {pipeline_mode = #tpu.pipeline_mode<synchronous>, transform_indices = @transform_2, window_bounds = array<i64: 1, 16>}, {pipeline_mode = #tpu.pipeline_mode<synchronous>, transform_indices = @transform_3, window_bounds = array<i64: 1, 16>}, {pipeline_mode = #tpu.pipeline_mode<synchronous>, transform_indices = @transform_4, window_bounds = array<i64: 16, 32>}, {pipeline_mode = #tpu.pipeline_mode<synchronous>, transform_indices = @transform_5, window_bounds = array<i64: 1, 32>}, {transform_indices = @transform_6, window_bounds = array<i64: 1, 19, 32>}]} {
    %c0 = arith.constant 0 : index
    %c0_0 = arith.constant 0 : index
    %c0_1 = arith.constant 0 : index
    %0 = vector.load %arg1[%c0, %c0_0, %c0_1] : memref<1x19x32xf32, #tpu.memory_space<vmem>>, vector<1x19x32xf32>
    %1 = vector.shape_cast %0 : vector<1x19x32xf32> to vector<19x32xf32>
    %c0_2 = arith.constant 0 : index
    %c0_3 = arith.constant 0 : index
    %c0_4 = arith.constant 0 : index
    %2 = vector.load %arg2[%c0_2, %c0_3, %c0_4] : memref<1x32x16xf32, #tpu.memory_space<vmem>>, vector<1x32x16xf32>
    %3 = vector.shape_cast %2 : vector<1x32x16xf32> to vector<32x16xf32>
    %cst = arith.constant dense<0.000000e+00> : vector<19x16xf32>
    %4 = tpu.matmul %1, %3, %cst {dimension_numbers = #tpu.dot_dimension_numbers<[1], [0], [0], [1], [0, 0, 1, 1], [], []>} : vector<19x32xf32>, vector<32x16xf32>, vector<19x16xf32> -> vector<19x16xf32>
    %5 = arith.mulf %4, %4 : vector<19x16xf32>
    %6 = arith.mulf %4, %5 : vector<19x16xf32>
    %cst_5 = arith.constant 4.471500e-02 : f32
    %7 = vector.broadcast %cst_5 : f32 to vector<19x16xf32>
    %8 = arith.mulf %7, %6 : vector<19x16xf32>
    %9 = arith.addf %4, %8 : vector<19x16xf32>
    %cst_6 = arith.constant 0.797884583 : f32
    %10 = vector.broadcast %cst_6 : f32 to vector<19x16xf32>
    %11 = arith.mulf %10, %9 : vector<19x16xf32>
    %12 = math.tanh %11 : vector<19x16xf32>
    %cst_7 = arith.constant 1.000000e+00 : f32
    %13 = vector.broadcast %cst_7 : f32 to vector<19x16xf32>
    %14 = arith.addf %13, %12 : vector<19x16xf32>
    %cst_8 = arith.constant 5.000000e-01 : f32
    %15 = vector.broadcast %cst_8 : f32 to vector<19x16xf32>
    %16 = arith.mulf %15, %14 : vector<19x16xf32>
    %17 = arith.mulf %4, %16 : vector<19x16xf32>
    %c0_9 = arith.constant 0 : index
    %c0_10 = arith.constant 0 : index
    %18 = vector.load %arg3[%c0_9, %c0_10] : memref<1x16xf32, #tpu.memory_space<vmem>>, vector<1x16xf32>
    %c0_11 = arith.constant 0 : index
    %c0_12 = arith.constant 0 : index
    %19 = vector.load %arg4[%c0_11, %c0_12] : memref<1x16xf32, #tpu.memory_space<vmem>>, vector<1x16xf32>
    %cst_13 = arith.constant dense<0.000000e+00> : vector<19xf32>
    %20 = vector.multi_reduction <add>, %17, %cst_13 [1] : vector<19x16xf32> to vector<19xf32>
    %21 = vector.shape_cast %20 : vector<19xf32> to vector<19x1xf32>
    %cst_14 = arith.constant 1.600000e+01 : f32
    %22 = vector.broadcast %cst_14 : f32 to vector<19x1xf32>
    %23 = arith.divf %21, %22 : vector<19x1xf32>
    %24 = vector.broadcast %23 : vector<19x1xf32> to vector<19x16xf32>
    %25 = arith.subf %17, %24 : vector<19x16xf32>
    %26 = arith.mulf %25, %25 : vector<19x16xf32>
    %cst_15 = arith.constant dense<0.000000e+00> : vector<19xf32>
    %27 = vector.multi_reduction <add>, %26, %cst_15 [1] : vector<19x16xf32> to vector<19xf32>
    %28 = vector.shape_cast %27 : vector<19xf32> to vector<19x1xf32>
    %cst_16 = arith.constant 1.600000e+01 : f32
    %29 = vector.broadcast %cst_16 : f32 to vector<19x1xf32>
    %30 = arith.divf %28, %29 : vector<19x1xf32>
    %31 = vector.broadcast %23 : vector<19x1xf32> to vector<19x16xf32>
    %32 = arith.subf %17, %31 : vector<19x16xf32>
    %cst_17 = arith.constant 9.99999974E-6 : f32
    %33 = vector.broadcast %cst_17 : f32 to vector<19x1xf32>
    %34 = arith.addf %30, %33 : vector<19x1xf32>
    %35 = math.rsqrt %34 : vector<19x1xf32>
    %36 = vector.broadcast %35 : vector<19x1xf32> to vector<19x16xf32>
    %37 = arith.mulf %32, %36 : vector<19x16xf32>
    %38 = vector.broadcast %18 : vector<1x16xf32> to vector<19x16xf32>
    %39 = arith.mulf %37, %38 : vector<19x16xf32>
    %40 = vector.broadcast %19 : vector<1x16xf32> to vector<19x16xf32>
    %41 = arith.addf %39, %40 : vector<19x16xf32>
    %c0_18 = arith.constant 0 : index
    %c0_19 = arith.constant 0 : index
    %42 = vector.load %arg5[%c0_18, %c0_19] : memref<16x32xf32, #tpu.memory_space<vmem>>, vector<16x32xf32>
    %cst_20 = arith.constant dense<0.000000e+00> : vector<19x32xf32>
    %43 = tpu.matmul %41, %42, %cst_20 {dimension_numbers = #tpu.dot_dimension_numbers<[1], [0], [0], [1], [0, 0, 1, 1], [], []>} : vector<19x16xf32>, vector<16x32xf32>, vector<19x32xf32> -> vector<19x32xf32>
    %c0_21 = arith.constant 0 : index
    %c0_22 = arith.constant 0 : index
    %44 = vector.load %arg6[%c0_21, %c0_22] : memref<1x32xf32, #tpu.memory_space<vmem>>, vector<1x32xf32>
    %45 = vector.broadcast %44 : vector<1x32xf32> to vector<19x32xf32>
    %46 = arith.addf %43, %45 : vector<19x32xf32>
    %c0_23 = arith.constant 0 : index
    %c0_24 = arith.constant 0 : index
    %c0_25 = arith.constant 0 : index
    %47 = vector.load %arg7[%c0_23, %c0_24, %c0_25] : memref<1x19x32xf32, #tpu.memory_space<vmem>>, vector<1x19x32xf32>
    %48 = vector.shape_cast %47 : vector<1x19x32xf32> to vector<19x32xf32>
    %49 = vector.shape_cast %46 : vector<19x32xf32> to vector<1x19x32xf32>
    tpu.vector_store %arg7[%c0_23, %c0_24, %c0_25], %49 {strides = array<i32>} : memref<1x19x32xf32, #tpu.memory_space<vmem>>, vector<1x19x32xf32>,
    return
  }
  func.func @transform_0(%arg0: i32) -> (i32, i32, i32) {
    %c0_i32 = arith.constant 0 : i32
    %c0_i32_0 = arith.constant 0 : i32
    %c0_i32_1 = arith.constant 0 : i32
    return %arg0, %c0_i32, %c0_i32_0 : i32, i32, i32
  }
  func.func @transform_1(%arg0: i32) -> (i32, i32, i32) {
    %c0_i32 = arith.constant 0 : i32
    %c0_i32_0 = arith.constant 0 : i32
    %c0_i32_1 = arith.constant 0 : i32
    %c0_i32_2 = arith.constant 0 : i32
    return %c0_i32, %c0_i32_0, %c0_i32_1 : i32, i32, i32
  }
  func.func @transform_2(%arg0: i32) -> (i32, i32) {
    %c0_i32 = arith.constant 0 : i32
    %c0_i32_0 = arith.constant 0 : i32
    %c0_i32_1 = arith.constant 0 : i32
    return %c0_i32, %c0_i32_0 : i32, i32
  }
  func.func @transform_3(%arg0: i32) -> (i32, i32) {
    %c0_i32 = arith.constant 0 : i32
    %c0_i32_0 = arith.constant 0 : i32
    %c0_i32_1 = arith.constant 0 : i32
    return %c0_i32, %c0_i32_0 : i32, i32
  }
  func.func @transform_4(%arg0: i32) -> (i32, i32) {
    %c0_i32 = arith.constant 0 : i32
    %c0_i32_0 = arith.constant 0 : i32
    %c0_i32_1 = arith.constant 0 : i32
    return %c0_i32, %c0_i32_0 : i32, i32
  }
  func.func @transform_5(%arg0: i32) -> (i32, i32) {
    %c0_i32 = arith.constant 0 : i32
    %c0_i32_0 = arith.constant 0 : i32
    %c0_i32_1 = arith.constant 0 : i32
    return %c0_i32, %c0_i32_0 : i32, i32
  }
  func.func @transform_6(%arg0: i32) -> (i32, i32, i32) {
    %c0_i32 = arith.constant 0 : i32
    %c0_i32_0 = arith.constant 0 : i32
    %c0_i32_1 = arith.constant 0 : i32
    return %arg0, %c0_i32, %c0_i32_0 : i32, i32, i32
  }
}

module attributes {stable_mosaic.version = 11 : i64} {
  func.func @_posconv_kernel(%arg0: i32, %arg1: memref<1x23x32xf32, #tpu.memory_space<vmem>>, %arg2: memref<4x32x32xf32, #tpu.memory_space<vmem>>, %arg3: memref<1x32xf32, #tpu.memory_space<vmem>>, %arg4: memref<1x32xf32, #tpu.memory_space<vmem>>, %arg5: memref<1x32xf32, #tpu.memory_space<vmem>>, %arg6: memref<1x19x32xf32, #tpu.memory_space<vmem>>) attributes {dimension_semantics = [#tpu.dimension_semantics<parallel>], iteration_bounds = array<i64: 2>, scalar_prefetch = 0 : i64, scratch_operands = 0 : i64, tpu.core_type = #tpu.core_type<tc>, window_params = [{transform_indices = @transform_0, window_bounds = array<i64: 1, 23, 32>}, {pipeline_mode = #tpu.pipeline_mode<synchronous>, transform_indices = @transform_1, window_bounds = array<i64: 4, 32, 32>}, {pipeline_mode = #tpu.pipeline_mode<synchronous>, transform_indices = @transform_2, window_bounds = array<i64: 1, 32>}, {pipeline_mode = #tpu.pipeline_mode<synchronous>, transform_indices = @transform_3, window_bounds = array<i64: 1, 32>}, {pipeline_mode = #tpu.pipeline_mode<synchronous>, transform_indices = @transform_4, window_bounds = array<i64: 1, 32>}, {transform_indices = @transform_5, window_bounds = array<i64: 1, 19, 32>}]} {
    %c0 = arith.constant 0 : index
    %c0_0 = arith.constant 0 : index
    %c0_1 = arith.constant 0 : index
    %0 = vector.load %arg1[%c0, %c0_0, %c0_1] : memref<1x23x32xf32, #tpu.memory_space<vmem>>, vector<1x23x32xf32>
    %1 = vector.shape_cast %0 : vector<1x23x32xf32> to vector<23x32xf32>
    %2 = vector.extract_strided_slice %1 {offsets = [0, 0], sizes = [19, 32], strides = [1, 1]} : vector<23x32xf32> to vector<19x32xf32>
    %c0_2 = arith.constant 0 : index
    %c0_3 = arith.constant 0 : index
    %c0_4 = arith.constant 0 : index
    %3 = vector.load %arg2[%c0_2, %c0_3, %c0_4] : memref<4x32x32xf32, #tpu.memory_space<vmem>>, vector<1x32x32xf32>
    %4 = vector.shape_cast %3 : vector<1x32x32xf32> to vector<32x32xf32>
    %cst = arith.constant dense<0.000000e+00> : vector<19x32xf32>
    %5 = tpu.matmul %2, %4, %cst {dimension_numbers = #tpu.dot_dimension_numbers<[1], [0], [0], [1], [0, 0, 1, 1], [], []>} : vector<19x32xf32>, vector<32x32xf32>, vector<19x32xf32> -> vector<19x32xf32>
    %6 = vector.extract_strided_slice %1 {offsets = [1, 0], sizes = [19, 32], strides = [1, 1]} : vector<23x32xf32> to vector<19x32xf32>
    %c1 = arith.constant 1 : index
    %c0_5 = arith.constant 0 : index
    %c0_6 = arith.constant 0 : index
    %7 = vector.load %arg2[%c1, %c0_5, %c0_6] : memref<4x32x32xf32, #tpu.memory_space<vmem>>, vector<1x32x32xf32>
    %8 = vector.shape_cast %7 : vector<1x32x32xf32> to vector<32x32xf32>
    %cst_7 = arith.constant dense<0.000000e+00> : vector<19x32xf32>
    %9 = tpu.matmul %6, %8, %cst_7 {dimension_numbers = #tpu.dot_dimension_numbers<[1], [0], [0], [1], [0, 0, 1, 1], [], []>} : vector<19x32xf32>, vector<32x32xf32>, vector<19x32xf32> -> vector<19x32xf32>
    %10 = arith.addf %5, %9 : vector<19x32xf32>
    %11 = vector.extract_strided_slice %1 {offsets = [2, 0], sizes = [19, 32], strides = [1, 1]} : vector<23x32xf32> to vector<19x32xf32>
    %c2 = arith.constant 2 : index
    %c0_8 = arith.constant 0 : index
    %c0_9 = arith.constant 0 : index
    %12 = vector.load %arg2[%c2, %c0_8, %c0_9] : memref<4x32x32xf32, #tpu.memory_space<vmem>>, vector<1x32x32xf32>
    %13 = vector.shape_cast %12 : vector<1x32x32xf32> to vector<32x32xf32>
    %cst_10 = arith.constant dense<0.000000e+00> : vector<19x32xf32>
    %14 = tpu.matmul %11, %13, %cst_10 {dimension_numbers = #tpu.dot_dimension_numbers<[1], [0], [0], [1], [0, 0, 1, 1], [], []>} : vector<19x32xf32>, vector<32x32xf32>, vector<19x32xf32> -> vector<19x32xf32>
    %15 = arith.addf %10, %14 : vector<19x32xf32>
    %16 = vector.extract_strided_slice %1 {offsets = [3, 0], sizes = [19, 32], strides = [1, 1]} : vector<23x32xf32> to vector<19x32xf32>
    %c3 = arith.constant 3 : index
    %c0_11 = arith.constant 0 : index
    %c0_12 = arith.constant 0 : index
    %17 = vector.load %arg2[%c3, %c0_11, %c0_12] : memref<4x32x32xf32, #tpu.memory_space<vmem>>, vector<1x32x32xf32>
    %18 = vector.shape_cast %17 : vector<1x32x32xf32> to vector<32x32xf32>
    %cst_13 = arith.constant dense<0.000000e+00> : vector<19x32xf32>
    %19 = tpu.matmul %16, %18, %cst_13 {dimension_numbers = #tpu.dot_dimension_numbers<[1], [0], [0], [1], [0, 0, 1, 1], [], []>} : vector<19x32xf32>, vector<32x32xf32>, vector<19x32xf32> -> vector<19x32xf32>
    %20 = arith.addf %15, %19 : vector<19x32xf32>
    %c0_14 = arith.constant 0 : index
    %c0_15 = arith.constant 0 : index
    %21 = vector.load %arg3[%c0_14, %c0_15] : memref<1x32xf32, #tpu.memory_space<vmem>>, vector<1x32xf32>
    %22 = vector.broadcast %21 : vector<1x32xf32> to vector<19x32xf32>
    %23 = arith.addf %20, %22 : vector<19x32xf32>
    %24 = arith.mulf %23, %23 : vector<19x32xf32>
    %25 = arith.mulf %23, %24 : vector<19x32xf32>
    %cst_16 = arith.constant 4.471500e-02 : f32
    %26 = vector.broadcast %cst_16 : f32 to vector<19x32xf32>
    %27 = arith.mulf %26, %25 : vector<19x32xf32>
    %28 = arith.addf %23, %27 : vector<19x32xf32>
    %cst_17 = arith.constant 0.797884583 : f32
    %29 = vector.broadcast %cst_17 : f32 to vector<19x32xf32>
    %30 = arith.mulf %29, %28 : vector<19x32xf32>
    %31 = math.tanh %30 : vector<19x32xf32>
    %cst_18 = arith.constant 1.000000e+00 : f32
    %32 = vector.broadcast %cst_18 : f32 to vector<19x32xf32>
    %33 = arith.addf %32, %31 : vector<19x32xf32>
    %cst_19 = arith.constant 5.000000e-01 : f32
    %34 = vector.broadcast %cst_19 : f32 to vector<19x32xf32>
    %35 = arith.mulf %34, %33 : vector<19x32xf32>
    %36 = arith.mulf %23, %35 : vector<19x32xf32>
    %37 = vector.extract_strided_slice %1 {offsets = [2, 0], sizes = [19, 32], strides = [1, 1]} : vector<23x32xf32> to vector<19x32xf32>
    %38 = arith.addf %37, %36 : vector<19x32xf32>
    %c0_20 = arith.constant 0 : index
    %c0_21 = arith.constant 0 : index
    %39 = vector.load %arg4[%c0_20, %c0_21] : memref<1x32xf32, #tpu.memory_space<vmem>>, vector<1x32xf32>
    %c0_22 = arith.constant 0 : index
    %c0_23 = arith.constant 0 : index
    %40 = vector.load %arg5[%c0_22, %c0_23] : memref<1x32xf32, #tpu.memory_space<vmem>>, vector<1x32xf32>
    %cst_24 = arith.constant dense<0.000000e+00> : vector<19xf32>
    %41 = vector.multi_reduction <add>, %38, %cst_24 [1] : vector<19x32xf32> to vector<19xf32>
    %42 = vector.shape_cast %41 : vector<19xf32> to vector<19x1xf32>
    %cst_25 = arith.constant 3.200000e+01 : f32
    %43 = vector.broadcast %cst_25 : f32 to vector<19x1xf32>
    %44 = arith.divf %42, %43 : vector<19x1xf32>
    %45 = vector.broadcast %44 : vector<19x1xf32> to vector<19x32xf32>
    %46 = arith.subf %38, %45 : vector<19x32xf32>
    %47 = arith.mulf %46, %46 : vector<19x32xf32>
    %cst_26 = arith.constant dense<0.000000e+00> : vector<19xf32>
    %48 = vector.multi_reduction <add>, %47, %cst_26 [1] : vector<19x32xf32> to vector<19xf32>
    %49 = vector.shape_cast %48 : vector<19xf32> to vector<19x1xf32>
    %cst_27 = arith.constant 3.200000e+01 : f32
    %50 = vector.broadcast %cst_27 : f32 to vector<19x1xf32>
    %51 = arith.divf %49, %50 : vector<19x1xf32>
    %52 = vector.broadcast %44 : vector<19x1xf32> to vector<19x32xf32>
    %53 = arith.subf %38, %52 : vector<19x32xf32>
    %cst_28 = arith.constant 9.99999974E-6 : f32
    %54 = vector.broadcast %cst_28 : f32 to vector<19x1xf32>
    %55 = arith.addf %51, %54 : vector<19x1xf32>
    %56 = math.rsqrt %55 : vector<19x1xf32>
    %57 = vector.broadcast %56 : vector<19x1xf32> to vector<19x32xf32>
    %58 = arith.mulf %53, %57 : vector<19x32xf32>
    %59 = vector.broadcast %39 : vector<1x32xf32> to vector<19x32xf32>
    %60 = arith.mulf %58, %59 : vector<19x32xf32>
    %61 = vector.broadcast %40 : vector<1x32xf32> to vector<19x32xf32>
    %62 = arith.addf %60, %61 : vector<19x32xf32>
    %c0_29 = arith.constant 0 : index
    %c0_30 = arith.constant 0 : index
    %c0_31 = arith.constant 0 : index
    %63 = vector.load %arg6[%c0_29, %c0_30, %c0_31] : memref<1x19x32xf32, #tpu.memory_space<vmem>>, vector<1x19x32xf32>
    %64 = vector.shape_cast %63 : vector<1x19x32xf32> to vector<19x32xf32>
    %65 = vector.shape_cast %62 : vector<19x32xf32> to vector<1x19x32xf32>
    tpu.vector_store %arg6[%c0_29, %c0_30, %c0_31], %65 {strides = array<i32>} : memref<1x19x32xf32, #tpu.memory_space<vmem>>, vector<1x19x32xf32>,
    return
  }
  func.func @transform_0(%arg0: i32) -> (i32, i32, i32) {
    %c0_i32 = arith.constant 0 : i32
    %c0_i32_0 = arith.constant 0 : i32
    %c0_i32_1 = arith.constant 0 : i32
    return %arg0, %c0_i32, %c0_i32_0 : i32, i32, i32
  }
  func.func @transform_1(%arg0: i32) -> (i32, i32, i32) {
    %c0_i32 = arith.constant 0 : i32
    %c0_i32_0 = arith.constant 0 : i32
    %c0_i32_1 = arith.constant 0 : i32
    %c0_i32_2 = arith.constant 0 : i32
    return %c0_i32, %c0_i32_0, %c0_i32_1 : i32, i32, i32
  }
  func.func @transform_2(%arg0: i32) -> (i32, i32) {
    %c0_i32 = arith.constant 0 : i32
    %c0_i32_0 = arith.constant 0 : i32
    %c0_i32_1 = arith.constant 0 : i32
    return %c0_i32, %c0_i32_0 : i32, i32
  }
  func.func @transform_3(%arg0: i32) -> (i32, i32) {
    %c0_i32 = arith.constant 0 : i32
    %c0_i32_0 = arith.constant 0 : i32
    %c0_i32_1 = arith.constant 0 : i32
    return %c0_i32, %c0_i32_0 : i32, i32
  }
  func.func @transform_4(%arg0: i32) -> (i32, i32) {
    %c0_i32 = arith.constant 0 : i32
    %c0_i32_0 = arith.constant 0 : i32
    %c0_i32_1 = arith.constant 0 : i32
    return %c0_i32, %c0_i32_0 : i32, i32
  }
  func.func @transform_5(%arg0: i32) -> (i32, i32, i32) {
    %c0_i32 = arith.constant 0 : i32
    %c0_i32_0 = arith.constant 0 : i32
    %c0_i32_1 = arith.constant 0 : i32
    return %arg0, %c0_i32, %c0_i32_0 : i32, i32, i32
  }
}

module attributes {stable_mosaic.version = 11 : i64} {
  func.func @_encoder_layer_kernel(%arg0: i32, %arg1: memref<1x19x32xf32, #tpu.memory_space<vmem>>, %arg2: memref<32x96xf32, #tpu.memory_space<vmem>>, %arg3: memref<1x96xf32, #tpu.memory_space<vmem>>, %arg4: memref<32x32xf32, #tpu.memory_space<vmem>>, %arg5: memref<1x32xf32, #tpu.memory_space<vmem>>, %arg6: memref<1x32xf32, #tpu.memory_space<vmem>>, %arg7: memref<1x32xf32, #tpu.memory_space<vmem>>, %arg8: memref<32x64xf32, #tpu.memory_space<vmem>>, %arg9: memref<1x64xf32, #tpu.memory_space<vmem>>, %arg10: memref<64x32xf32, #tpu.memory_space<vmem>>, %arg11: memref<1x32xf32, #tpu.memory_space<vmem>>, %arg12: memref<1x32xf32, #tpu.memory_space<vmem>>, %arg13: memref<1x32xf32, #tpu.memory_space<vmem>>, %arg14: memref<1x19x32xf32, #tpu.memory_space<vmem>>) attributes {dimension_semantics = [#tpu.dimension_semantics<parallel>], iteration_bounds = array<i64: 2>, scalar_prefetch = 0 : i64, scratch_operands = 0 : i64, tpu.core_type = #tpu.core_type<tc>, window_params = [{transform_indices = @transform_0, window_bounds = array<i64: 1, 19, 32>}, {pipeline_mode = #tpu.pipeline_mode<synchronous>, transform_indices = @transform_1, window_bounds = array<i64: 32, 96>}, {pipeline_mode = #tpu.pipeline_mode<synchronous>, transform_indices = @transform_2, window_bounds = array<i64: 1, 96>}, {pipeline_mode = #tpu.pipeline_mode<synchronous>, transform_indices = @transform_3, window_bounds = array<i64: 32, 32>}, {pipeline_mode = #tpu.pipeline_mode<synchronous>, transform_indices = @transform_4, window_bounds = array<i64: 1, 32>}, {pipeline_mode = #tpu.pipeline_mode<synchronous>, transform_indices = @transform_5, window_bounds = array<i64: 1, 32>}, {pipeline_mode = #tpu.pipeline_mode<synchronous>, transform_indices = @transform_6, window_bounds = array<i64: 1, 32>}, {pipeline_mode = #tpu.pipeline_mode<synchronous>, transform_indices = @transform_7, window_bounds = array<i64: 32, 64>}, {pipeline_mode = #tpu.pipeline_mode<synchronous>, transform_indices = @transform_8, window_bounds = array<i64: 1, 64>}, {pipeline_mode = #tpu.pipeline_mode<synchronous>, transform_indices = @transform_9, window_bounds = array<i64: 64, 32>}, {pipeline_mode = #tpu.pipeline_mode<synchronous>, transform_indices = @transform_10, window_bounds = array<i64: 1, 32>}, {pipeline_mode = #tpu.pipeline_mode<synchronous>, transform_indices = @transform_11, window_bounds = array<i64: 1, 32>}, {pipeline_mode = #tpu.pipeline_mode<synchronous>, transform_indices = @transform_12, window_bounds = array<i64: 1, 32>}, {transform_indices = @transform_13, window_bounds = array<i64: 1, 19, 32>}]} {
    %c0 = arith.constant 0 : index
    %c0_0 = arith.constant 0 : index
    %c0_1 = arith.constant 0 : index
    %0 = vector.load %arg1[%c0, %c0_0, %c0_1] : memref<1x19x32xf32, #tpu.memory_space<vmem>>, vector<1x19x32xf32>
    %1 = vector.shape_cast %0 : vector<1x19x32xf32> to vector<19x32xf32>
    %c0_2 = arith.constant 0 : index
    %c0_3 = arith.constant 0 : index
    %2 = vector.load %arg2[%c0_2, %c0_3] : memref<32x96xf32, #tpu.memory_space<vmem>>, vector<32x96xf32>
    %cst = arith.constant dense<0.000000e+00> : vector<19x96xf32>
    %3 = tpu.matmul %1, %2, %cst {dimension_numbers = #tpu.dot_dimension_numbers<[1], [0], [0], [1], [0, 0, 1, 1], [], []>} : vector<19x32xf32>, vector<32x96xf32>, vector<19x96xf32> -> vector<19x96xf32>
    %c0_4 = arith.constant 0 : index
    %c0_5 = arith.constant 0 : index
    %4 = vector.load %arg3[%c0_4, %c0_5] : memref<1x96xf32, #tpu.memory_space<vmem>>, vector<1x96xf32>
    %5 = vector.broadcast %4 : vector<1x96xf32> to vector<19x96xf32>
    %6 = arith.addf %3, %5 : vector<19x96xf32>
    %7 = vector.extract_strided_slice %6 {offsets = [0, 0], sizes = [19, 8], strides = [1, 1]} : vector<19x96xf32> to vector<19x8xf32>
    %cst_6 = arith.constant 0.353553385 : f32
    %8 = vector.broadcast %cst_6 : f32 to vector<19x8xf32>
    %9 = arith.mulf %7, %8 : vector<19x8xf32>
    %10 = vector.extract_strided_slice %6 {offsets = [0, 32], sizes = [19, 8], strides = [1, 1]} : vector<19x96xf32> to vector<19x8xf32>
    %11 = vector.extract_strided_slice %6 {offsets = [0, 64], sizes = [19, 8], strides = [1, 1]} : vector<19x96xf32> to vector<19x8xf32>
    %cst_7 = arith.constant dense<0.000000e+00> : vector<19x19xf32>
    %12 = tpu.matmul %9, %10, %cst_7 {dimension_numbers = #tpu.dot_dimension_numbers<[1], [1], [0], [0], [0, 0, 1, 0], [], []>} : vector<19x8xf32>, vector<19x8xf32>, vector<19x19xf32> -> vector<19x19xf32>
    %cst_8 = arith.constant dense<0xFF800000> : vector<19xf32>
    %13 = vector.multi_reduction <maximumf>, %12, %cst_8 [1] : vector<19x19xf32> to vector<19xf32>
    %14 = vector.shape_cast %13 : vector<19xf32> to vector<19x1xf32>
    %15 = vector.broadcast %14 : vector<19x1xf32> to vector<19x19xf32>
    %16 = arith.subf %12, %15 : vector<19x19xf32>
    %17 = math.exp %16 : vector<19x19xf32>
    %cst_9 = arith.constant dense<0.000000e+00> : vector<19xf32>
    %18 = vector.multi_reduction <add>, %17, %cst_9 [1] : vector<19x19xf32> to vector<19xf32>
    %19 = vector.shape_cast %18 : vector<19xf32> to vector<19x1xf32>
    %20 = tpu.reciprocal %19 {approx = true} : vector<19x1xf32> -> vector<19x1xf32>
    %21 = vector.broadcast %20 : vector<19x1xf32> to vector<19x19xf32>
    %22 = arith.mulf %17, %21 : vector<19x19xf32>
    %cst_10 = arith.constant dense<0.000000e+00> : vector<19x8xf32>
    %23 = tpu.matmul %22, %11, %cst_10 {dimension_numbers = #tpu.dot_dimension_numbers<[1], [0], [0], [1], [0, 0, 1, 1], [], []>} : vector<19x19xf32>, vector<19x8xf32>, vector<19x8xf32> -> vector<19x8xf32>
    %c0_11 = arith.constant 0 : index
    %c0_12 = arith.constant 0 : index
    %24 = vector.load %arg4[%c0_11, %c0_12] : memref<32x32xf32, #tpu.memory_space<vmem>>, vector<8x32xf32>
    %cst_13 = arith.constant dense<0.000000e+00> : vector<19x32xf32>
    %25 = tpu.matmul %23, %24, %cst_13 {dimension_numbers = #tpu.dot_dimension_numbers<[1], [0], [0], [1], [0, 0, 1, 1], [], []>} : vector<19x8xf32>, vector<8x32xf32>, vector<19x32xf32> -> vector<19x32xf32>
    %26 = vector.extract_strided_slice %6 {offsets = [0, 8], sizes = [19, 8], strides = [1, 1]} : vector<19x96xf32> to vector<19x8xf32>
    %cst_14 = arith.constant 0.353553385 : f32
    %27 = vector.broadcast %cst_14 : f32 to vector<19x8xf32>
    %28 = arith.mulf %26, %27 : vector<19x8xf32>
    %29 = vector.extract_strided_slice %6 {offsets = [0, 40], sizes = [19, 8], strides = [1, 1]} : vector<19x96xf32> to vector<19x8xf32>
    %30 = vector.extract_strided_slice %6 {offsets = [0, 72], sizes = [19, 8], strides = [1, 1]} : vector<19x96xf32> to vector<19x8xf32>
    %cst_15 = arith.constant dense<0.000000e+00> : vector<19x19xf32>
    %31 = tpu.matmul %28, %29, %cst_15 {dimension_numbers = #tpu.dot_dimension_numbers<[1], [1], [0], [0], [0, 0, 1, 0], [], []>} : vector<19x8xf32>, vector<19x8xf32>, vector<19x19xf32> -> vector<19x19xf32>
    %cst_16 = arith.constant dense<0xFF800000> : vector<19xf32>
    %32 = vector.multi_reduction <maximumf>, %31, %cst_16 [1] : vector<19x19xf32> to vector<19xf32>
    %33 = vector.shape_cast %32 : vector<19xf32> to vector<19x1xf32>
    %34 = vector.broadcast %33 : vector<19x1xf32> to vector<19x19xf32>
    %35 = arith.subf %31, %34 : vector<19x19xf32>
    %36 = math.exp %35 : vector<19x19xf32>
    %cst_17 = arith.constant dense<0.000000e+00> : vector<19xf32>
    %37 = vector.multi_reduction <add>, %36, %cst_17 [1] : vector<19x19xf32> to vector<19xf32>
    %38 = vector.shape_cast %37 : vector<19xf32> to vector<19x1xf32>
    %39 = tpu.reciprocal %38 {approx = true} : vector<19x1xf32> -> vector<19x1xf32>
    %40 = vector.broadcast %39 : vector<19x1xf32> to vector<19x19xf32>
    %41 = arith.mulf %36, %40 : vector<19x19xf32>
    %cst_18 = arith.constant dense<0.000000e+00> : vector<19x8xf32>
    %42 = tpu.matmul %41, %30, %cst_18 {dimension_numbers = #tpu.dot_dimension_numbers<[1], [0], [0], [1], [0, 0, 1, 1], [], []>} : vector<19x19xf32>, vector<19x8xf32>, vector<19x8xf32> -> vector<19x8xf32>
    %c8 = arith.constant 8 : index
    %c0_19 = arith.constant 0 : index
    %43 = vector.load %arg4[%c8, %c0_19] : memref<32x32xf32, #tpu.memory_space<vmem>>, vector<8x32xf32>
    %cst_20 = arith.constant dense<0.000000e+00> : vector<19x32xf32>
    %44 = tpu.matmul %42, %43, %cst_20 {dimension_numbers = #tpu.dot_dimension_numbers<[1], [0], [0], [1], [0, 0, 1, 1], [], []>} : vector<19x8xf32>, vector<8x32xf32>, vector<19x32xf32> -> vector<19x32xf32>
    %45 = arith.addf %25, %44 : vector<19x32xf32>
    %46 = vector.extract_strided_slice %6 {offsets = [0, 16], sizes = [19, 8], strides = [1, 1]} : vector<19x96xf32> to vector<19x8xf32>
    %cst_21 = arith.constant 0.353553385 : f32
    %47 = vector.broadcast %cst_21 : f32 to vector<19x8xf32>
    %48 = arith.mulf %46, %47 : vector<19x8xf32>
    %49 = vector.extract_strided_slice %6 {offsets = [0, 48], sizes = [19, 8], strides = [1, 1]} : vector<19x96xf32> to vector<19x8xf32>
    %50 = vector.extract_strided_slice %6 {offsets = [0, 80], sizes = [19, 8], strides = [1, 1]} : vector<19x96xf32> to vector<19x8xf32>
    %cst_22 = arith.constant dense<0.000000e+00> : vector<19x19xf32>
    %51 = tpu.matmul %48, %49, %cst_22 {dimension_numbers = #tpu.dot_dimension_numbers<[1], [1], [0], [0], [0, 0, 1, 0], [], []>} : vector<19x8xf32>, vector<19x8xf32>, vector<19x19xf32> -> vector<19x19xf32>
    %cst_23 = arith.constant dense<0xFF800000> : vector<19xf32>
    %52 = vector.multi_reduction <maximumf>, %51, %cst_23 [1] : vector<19x19xf32> to vector<19xf32>
    %53 = vector.shape_cast %52 : vector<19xf32> to vector<19x1xf32>
    %54 = vector.broadcast %53 : vector<19x1xf32> to vector<19x19xf32>
    %55 = arith.subf %51, %54 : vector<19x19xf32>
    %56 = math.exp %55 : vector<19x19xf32>
    %cst_24 = arith.constant dense<0.000000e+00> : vector<19xf32>
    %57 = vector.multi_reduction <add>, %56, %cst_24 [1] : vector<19x19xf32> to vector<19xf32>
    %58 = vector.shape_cast %57 : vector<19xf32> to vector<19x1xf32>
    %59 = tpu.reciprocal %58 {approx = true} : vector<19x1xf32> -> vector<19x1xf32>
    %60 = vector.broadcast %59 : vector<19x1xf32> to vector<19x19xf32>
    %61 = arith.mulf %56, %60 : vector<19x19xf32>
    %cst_25 = arith.constant dense<0.000000e+00> : vector<19x8xf32>
    %62 = tpu.matmul %61, %50, %cst_25 {dimension_numbers = #tpu.dot_dimension_numbers<[1], [0], [0], [1], [0, 0, 1, 1], [], []>} : vector<19x19xf32>, vector<19x8xf32>, vector<19x8xf32> -> vector<19x8xf32>
    %c16 = arith.constant 16 : index
    %c0_26 = arith.constant 0 : index
    %63 = vector.load %arg4[%c16, %c0_26] : memref<32x32xf32, #tpu.memory_space<vmem>>, vector<8x32xf32>
    %cst_27 = arith.constant dense<0.000000e+00> : vector<19x32xf32>
    %64 = tpu.matmul %62, %63, %cst_27 {dimension_numbers = #tpu.dot_dimension_numbers<[1], [0], [0], [1], [0, 0, 1, 1], [], []>} : vector<19x8xf32>, vector<8x32xf32>, vector<19x32xf32> -> vector<19x32xf32>
    %65 = arith.addf %45, %64 : vector<19x32xf32>
    %66 = vector.extract_strided_slice %6 {offsets = [0, 24], sizes = [19, 8], strides = [1, 1]} : vector<19x96xf32> to vector<19x8xf32>
    %cst_28 = arith.constant 0.353553385 : f32
    %67 = vector.broadcast %cst_28 : f32 to vector<19x8xf32>
    %68 = arith.mulf %66, %67 : vector<19x8xf32>
    %69 = vector.extract_strided_slice %6 {offsets = [0, 56], sizes = [19, 8], strides = [1, 1]} : vector<19x96xf32> to vector<19x8xf32>
    %70 = vector.extract_strided_slice %6 {offsets = [0, 88], sizes = [19, 8], strides = [1, 1]} : vector<19x96xf32> to vector<19x8xf32>
    %cst_29 = arith.constant dense<0.000000e+00> : vector<19x19xf32>
    %71 = tpu.matmul %68, %69, %cst_29 {dimension_numbers = #tpu.dot_dimension_numbers<[1], [1], [0], [0], [0, 0, 1, 0], [], []>} : vector<19x8xf32>, vector<19x8xf32>, vector<19x19xf32> -> vector<19x19xf32>
    %cst_30 = arith.constant dense<0xFF800000> : vector<19xf32>
    %72 = vector.multi_reduction <maximumf>, %71, %cst_30 [1] : vector<19x19xf32> to vector<19xf32>
    %73 = vector.shape_cast %72 : vector<19xf32> to vector<19x1xf32>
    %74 = vector.broadcast %73 : vector<19x1xf32> to vector<19x19xf32>
    %75 = arith.subf %71, %74 : vector<19x19xf32>
    %76 = math.exp %75 : vector<19x19xf32>
    %cst_31 = arith.constant dense<0.000000e+00> : vector<19xf32>
    %77 = vector.multi_reduction <add>, %76, %cst_31 [1] : vector<19x19xf32> to vector<19xf32>
    %78 = vector.shape_cast %77 : vector<19xf32> to vector<19x1xf32>
    %79 = tpu.reciprocal %78 {approx = true} : vector<19x1xf32> -> vector<19x1xf32>
    %80 = vector.broadcast %79 : vector<19x1xf32> to vector<19x19xf32>
    %81 = arith.mulf %76, %80 : vector<19x19xf32>
    %cst_32 = arith.constant dense<0.000000e+00> : vector<19x8xf32>
    %82 = tpu.matmul %81, %70, %cst_32 {dimension_numbers = #tpu.dot_dimension_numbers<[1], [0], [0], [1], [0, 0, 1, 1], [], []>} : vector<19x19xf32>, vector<19x8xf32>, vector<19x8xf32> -> vector<19x8xf32>
    %c24 = arith.constant 24 : index
    %c0_33 = arith.constant 0 : index
    %83 = vector.load %arg4[%c24, %c0_33] : memref<32x32xf32, #tpu.memory_space<vmem>>, vector<8x32xf32>
    %cst_34 = arith.constant dense<0.000000e+00> : vector<19x32xf32>
    %84 = tpu.matmul %82, %83, %cst_34 {dimension_numbers = #tpu.dot_dimension_numbers<[1], [0], [0], [1], [0, 0, 1, 1], [], []>} : vector<19x8xf32>, vector<8x32xf32>, vector<19x32xf32> -> vector<19x32xf32>
    %85 = arith.addf %65, %84 : vector<19x32xf32>
    %c0_35 = arith.constant 0 : index
    %c0_36 = arith.constant 0 : index
    %86 = vector.load %arg5[%c0_35, %c0_36] : memref<1x32xf32, #tpu.memory_space<vmem>>, vector<1x32xf32>
    %87 = vector.broadcast %86 : vector<1x32xf32> to vector<19x32xf32>
    %88 = arith.addf %85, %87 : vector<19x32xf32>
    %89 = arith.addf %1, %88 : vector<19x32xf32>
    %c0_37 = arith.constant 0 : index
    %c0_38 = arith.constant 0 : index
    %90 = vector.load %arg6[%c0_37, %c0_38] : memref<1x32xf32, #tpu.memory_space<vmem>>, vector<1x32xf32>
    %c0_39 = arith.constant 0 : index
    %c0_40 = arith.constant 0 : index
    %91 = vector.load %arg7[%c0_39, %c0_40] : memref<1x32xf32, #tpu.memory_space<vmem>>, vector<1x32xf32>
    %cst_41 = arith.constant dense<0.000000e+00> : vector<19xf32>
    %92 = vector.multi_reduction <add>, %89, %cst_41 [1] : vector<19x32xf32> to vector<19xf32>
    %93 = vector.shape_cast %92 : vector<19xf32> to vector<19x1xf32>
    %cst_42 = arith.constant 3.200000e+01 : f32
    %94 = vector.broadcast %cst_42 : f32 to vector<19x1xf32>
    %95 = arith.divf %93, %94 : vector<19x1xf32>
    %96 = vector.broadcast %95 : vector<19x1xf32> to vector<19x32xf32>
    %97 = arith.subf %89, %96 : vector<19x32xf32>
    %98 = arith.mulf %97, %97 : vector<19x32xf32>
    %cst_43 = arith.constant dense<0.000000e+00> : vector<19xf32>
    %99 = vector.multi_reduction <add>, %98, %cst_43 [1] : vector<19x32xf32> to vector<19xf32>
    %100 = vector.shape_cast %99 : vector<19xf32> to vector<19x1xf32>
    %cst_44 = arith.constant 3.200000e+01 : f32
    %101 = vector.broadcast %cst_44 : f32 to vector<19x1xf32>
    %102 = arith.divf %100, %101 : vector<19x1xf32>
    %103 = vector.broadcast %95 : vector<19x1xf32> to vector<19x32xf32>
    %104 = arith.subf %89, %103 : vector<19x32xf32>
    %cst_45 = arith.constant 9.99999974E-6 : f32
    %105 = vector.broadcast %cst_45 : f32 to vector<19x1xf32>
    %106 = arith.addf %102, %105 : vector<19x1xf32>
    %107 = math.rsqrt %106 : vector<19x1xf32>
    %108 = vector.broadcast %107 : vector<19x1xf32> to vector<19x32xf32>
    %109 = arith.mulf %104, %108 : vector<19x32xf32>
    %110 = vector.broadcast %90 : vector<1x32xf32> to vector<19x32xf32>
    %111 = arith.mulf %109, %110 : vector<19x32xf32>
    %112 = vector.broadcast %91 : vector<1x32xf32> to vector<19x32xf32>
    %113 = arith.addf %111, %112 : vector<19x32xf32>
    %c0_46 = arith.constant 0 : index
    %c0_47 = arith.constant 0 : index
    %114 = vector.load %arg8[%c0_46, %c0_47] : memref<32x64xf32, #tpu.memory_space<vmem>>, vector<32x64xf32>
    %cst_48 = arith.constant dense<0.000000e+00> : vector<19x64xf32>
    %115 = tpu.matmul %113, %114, %cst_48 {dimension_numbers = #tpu.dot_dimension_numbers<[1], [0], [0], [1], [0, 0, 1, 1], [], []>} : vector<19x32xf32>, vector<32x64xf32>, vector<19x64xf32> -> vector<19x64xf32>
    %c0_49 = arith.constant 0 : index
    %c0_50 = arith.constant 0 : index
    %116 = vector.load %arg9[%c0_49, %c0_50] : memref<1x64xf32, #tpu.memory_space<vmem>>, vector<1x64xf32>
    %117 = vector.broadcast %116 : vector<1x64xf32> to vector<19x64xf32>
    %118 = arith.addf %115, %117 : vector<19x64xf32>
    %119 = arith.mulf %118, %118 : vector<19x64xf32>
    %120 = arith.mulf %118, %119 : vector<19x64xf32>
    %cst_51 = arith.constant 4.471500e-02 : f32
    %121 = vector.broadcast %cst_51 : f32 to vector<19x64xf32>
    %122 = arith.mulf %121, %120 : vector<19x64xf32>
    %123 = arith.addf %118, %122 : vector<19x64xf32>
    %cst_52 = arith.constant 0.797884583 : f32
    %124 = vector.broadcast %cst_52 : f32 to vector<19x64xf32>
    %125 = arith.mulf %124, %123 : vector<19x64xf32>
    %126 = math.tanh %125 : vector<19x64xf32>
    %cst_53 = arith.constant 1.000000e+00 : f32
    %127 = vector.broadcast %cst_53 : f32 to vector<19x64xf32>
    %128 = arith.addf %127, %126 : vector<19x64xf32>
    %cst_54 = arith.constant 5.000000e-01 : f32
    %129 = vector.broadcast %cst_54 : f32 to vector<19x64xf32>
    %130 = arith.mulf %129, %128 : vector<19x64xf32>
    %131 = arith.mulf %118, %130 : vector<19x64xf32>
    %c0_55 = arith.constant 0 : index
    %c0_56 = arith.constant 0 : index
    %132 = vector.load %arg10[%c0_55, %c0_56] : memref<64x32xf32, #tpu.memory_space<vmem>>, vector<64x32xf32>
    %cst_57 = arith.constant dense<0.000000e+00> : vector<19x32xf32>
    %133 = tpu.matmul %131, %132, %cst_57 {dimension_numbers = #tpu.dot_dimension_numbers<[1], [0], [0], [1], [0, 0, 1, 1], [], []>} : vector<19x64xf32>, vector<64x32xf32>, vector<19x32xf32> -> vector<19x32xf32>
    %c0_58 = arith.constant 0 : index
    %c0_59 = arith.constant 0 : index
    %134 = vector.load %arg11[%c0_58, %c0_59] : memref<1x32xf32, #tpu.memory_space<vmem>>, vector<1x32xf32>
    %135 = vector.broadcast %134 : vector<1x32xf32> to vector<19x32xf32>
    %136 = arith.addf %133, %135 : vector<19x32xf32>
    %137 = arith.addf %113, %136 : vector<19x32xf32>
    %c0_60 = arith.constant 0 : index
    %c0_61 = arith.constant 0 : index
    %138 = vector.load %arg12[%c0_60, %c0_61] : memref<1x32xf32, #tpu.memory_space<vmem>>, vector<1x32xf32>
    %c0_62 = arith.constant 0 : index
    %c0_63 = arith.constant 0 : index
    %139 = vector.load %arg13[%c0_62, %c0_63] : memref<1x32xf32, #tpu.memory_space<vmem>>, vector<1x32xf32>
    %cst_64 = arith.constant dense<0.000000e+00> : vector<19xf32>
    %140 = vector.multi_reduction <add>, %137, %cst_64 [1] : vector<19x32xf32> to vector<19xf32>
    %141 = vector.shape_cast %140 : vector<19xf32> to vector<19x1xf32>
    %cst_65 = arith.constant 3.200000e+01 : f32
    %142 = vector.broadcast %cst_65 : f32 to vector<19x1xf32>
    %143 = arith.divf %141, %142 : vector<19x1xf32>
    %144 = vector.broadcast %143 : vector<19x1xf32> to vector<19x32xf32>
    %145 = arith.subf %137, %144 : vector<19x32xf32>
    %146 = arith.mulf %145, %145 : vector<19x32xf32>
    %cst_66 = arith.constant dense<0.000000e+00> : vector<19xf32>
    %147 = vector.multi_reduction <add>, %146, %cst_66 [1] : vector<19x32xf32> to vector<19xf32>
    %148 = vector.shape_cast %147 : vector<19xf32> to vector<19x1xf32>
    %cst_67 = arith.constant 3.200000e+01 : f32
    %149 = vector.broadcast %cst_67 : f32 to vector<19x1xf32>
    %150 = arith.divf %148, %149 : vector<19x1xf32>
    %151 = vector.broadcast %143 : vector<19x1xf32> to vector<19x32xf32>
    %152 = arith.subf %137, %151 : vector<19x32xf32>
    %cst_68 = arith.constant 9.99999974E-6 : f32
    %153 = vector.broadcast %cst_68 : f32 to vector<19x1xf32>
    %154 = arith.addf %150, %153 : vector<19x1xf32>
    %155 = math.rsqrt %154 : vector<19x1xf32>
    %156 = vector.broadcast %155 : vector<19x1xf32> to vector<19x32xf32>
    %157 = arith.mulf %152, %156 : vector<19x32xf32>
    %158 = vector.broadcast %138 : vector<1x32xf32> to vector<19x32xf32>
    %159 = arith.mulf %157, %158 : vector<19x32xf32>
    %160 = vector.broadcast %139 : vector<1x32xf32> to vector<19x32xf32>
    %161 = arith.addf %159, %160 : vector<19x32xf32>
    %c0_69 = arith.constant 0 : index
    %c0_70 = arith.constant 0 : index
    %c0_71 = arith.constant 0 : index
    %162 = vector.load %arg14[%c0_69, %c0_70, %c0_71] : memref<1x19x32xf32, #tpu.memory_space<vmem>>, vector<1x19x32xf32>
    %163 = vector.shape_cast %162 : vector<1x19x32xf32> to vector<19x32xf32>
    %164 = vector.shape_cast %161 : vector<19x32xf32> to vector<1x19x32xf32>
    tpu.vector_store %arg14[%c0_69, %c0_70, %c0_71], %164 {strides = array<i32>} : memref<1x19x32xf32, #tpu.memory_space<vmem>>, vector<1x19x32xf32>,
    return
  }
  func.func @transform_0(%arg0: i32) -> (i32, i32, i32) {
    %c0_i32 = arith.constant 0 : i32
    %c0_i32_0 = arith.constant 0 : i32
    %c0_i32_1 = arith.constant 0 : i32
    return %arg0, %c0_i32, %c0_i32_0 : i32, i32, i32
  }
  func.func @transform_1(%arg0: i32) -> (i32, i32) {
    %c0_i32 = arith.constant 0 : i32
    %c0_i32_0 = arith.constant 0 : i32
    %c0_i32_1 = arith.constant 0 : i32
    return %c0_i32, %c0_i32_0 : i32, i32
  }
  func.func @transform_2(%arg0: i32) -> (i32, i32) {
    %c0_i32 = arith.constant 0 : i32
    %c0_i32_0 = arith.constant 0 : i32
    %c0_i32_1 = arith.constant 0 : i32
    return %c0_i32, %c0_i32_0 : i32, i32
  }
  func.func @transform_3(%arg0: i32) -> (i32, i32) {
    %c0_i32 = arith.constant 0 : i32
    %c0_i32_0 = arith.constant 0 : i32
    %c0_i32_1 = arith.constant 0 : i32
    return %c0_i32, %c0_i32_0 : i32, i32
  }
  func.func @transform_4(%arg0: i32) -> (i32, i32) {
    %c0_i32 = arith.constant 0 : i32
    %c0_i32_0 = arith.constant 0 : i32
    %c0_i32_1 = arith.constant 0 : i32
    return %c0_i32, %c0_i32_0 : i32, i32
  }
  func.func @transform_5(%arg0: i32) -> (i32, i32) {
    %c0_i32 = arith.constant 0 : i32
    %c0_i32_0 = arith.constant 0 : i32
    %c0_i32_1 = arith.constant 0 : i32
    return %c0_i32, %c0_i32_0 : i32, i32
  }
  func.func @transform_6(%arg0: i32) -> (i32, i32) {
    %c0_i32 = arith.constant 0 : i32
    %c0_i32_0 = arith.constant 0 : i32
    %c0_i32_1 = arith.constant 0 : i32
    return %c0_i32, %c0_i32_0 : i32, i32
  }
  func.func @transform_7(%arg0: i32) -> (i32, i32) {
    %c0_i32 = arith.constant 0 : i32
    %c0_i32_0 = arith.constant 0 : i32
    %c0_i32_1 = arith.constant 0 : i32
    return %c0_i32, %c0_i32_0 : i32, i32
  }
  func.func @transform_8(%arg0: i32) -> (i32, i32) {
    %c0_i32 = arith.constant 0 : i32
    %c0_i32_0 = arith.constant 0 : i32
    %c0_i32_1 = arith.constant 0 : i32
    return %c0_i32, %c0_i32_0 : i32, i32
  }
  func.func @transform_9(%arg0: i32) -> (i32, i32) {
    %c0_i32 = arith.constant 0 : i32
    %c0_i32_0 = arith.constant 0 : i32
    %c0_i32_1 = arith.constant 0 : i32
    return %c0_i32, %c0_i32_0 : i32, i32
  }
  func.func @transform_10(%arg0: i32) -> (i32, i32) {
    %c0_i32 = arith.constant 0 : i32
    %c0_i32_0 = arith.constant 0 : i32
    %c0_i32_1 = arith.constant 0 : i32
    return %c0_i32, %c0_i32_0 : i32, i32
  }
  func.func @transform_11(%arg0: i32) -> (i32, i32) {
    %c0_i32 = arith.constant 0 : i32
    %c0_i32_0 = arith.constant 0 : i32
    %c0_i32_1 = arith.constant 0 : i32
    return %c0_i32, %c0_i32_0 : i32, i32
  }
  func.func @transform_12(%arg0: i32) -> (i32, i32) {
    %c0_i32 = arith.constant 0 : i32
    %c0_i32_0 = arith.constant 0 : i32
    %c0_i32_1 = arith.constant 0 : i32
    return %c0_i32, %c0_i32_0 : i32, i32
  }
  func.func @transform_13(%arg0: i32) -> (i32, i32, i32) {
    %c0_i32 = arith.constant 0 : i32
    %c0_i32_0 = arith.constant 0 : i32
    %c0_i32_1 = arith.constant 0 : i32
    return %arg0, %c0_i32, %c0_i32_0 : i32, i32, i32
  }
}

</mosaic_0001>

<bundles_post_ra>
// kernel: hubert_forward.7
= control target key start
LH: loop header
LB: loop body
LE: loop exit
PB: predicated region body
PF: predicated region fallthrough
CT: control target
= control target key end

     0   :  { %s633_s9 = smov 0   ;;  %s709_s0 = inlined_call_operand.vmem [shape: f32[2,40,32], index: 0, kind: input, shape index: {}]   ;;  %s710_s1 = inlined_call_operand.vmem [shape: f32[2,32,16], index: 1, kind: input, shape index: {}]   ;;  %s711_s2 = inlined_call_operand.vmem [shape: f32[2,39,16], index: 2, kind: output, shape index: {}]  }
   0x1 LB: > { %s481_s10 = sadd.s32 4294967295, %s613_s9   ;;  %p485_p0 = scmp.ge.s32.totalorder %s613_s9, 1  ;;  %s613_s9 = sphi %s633_s9, %s12_s9  }
   0x2   : > { %p112_p1 = scmp.lt.s32.totalorder %s613_s9, 3 }
   0x4   : > { %p113_p2 = pnand %p485_p0, %p112_p1 }
   0x5   : > { %v149_v0 = vld [vmem:[%s710_s1] sm:$0xff] (!%p113_p2)  ;;  %v150_v1 = vld [vmem:[%s710_s1 + $0x8] sm:$0xff] (!%p113_p2)  ;;  %v615_v3 = vmov (!%p113_p2), 0.0|0.0   ;;  %v151_v6 = vld [vmem:[%s710_s1 + $0x10] sm:$0xff] (!%p113_p2)  ;;  %p134_p3 = scmp.lt.s32.totalorder (!%p113_p2), %s481_s10, 1  ;;  %vm616_vm0 = vmmov (!%p113_p2), 0  }
   0x6   : > { %116 = sbr.rel (%p113_p2) target bundleno = 279 (0x117), region = 28  ;;  %v488_v2 = vld [vmem:[%s710_s1 + $0x20] sm:$0xff] (!%p113_p2)  ;;  %574 = vmatprep.subr.bf16.mxu0 (!%p113_p2), %v615_v3  ;;  %568 = vmatprep.subr.bf16.mxu1 (!%p113_p2), %v615_v3  ;;  %v575_v4 = vpack.c.bf16 (!%p113_p2), %v150_v1, %v149_v0  ;;  %v489_v5 = vld [vmem:[%s710_s1 + $0x28] sm:$0xff] (!%p113_p2)  ;;  %v152_v7 = vld [vmem:[%s710_s1 + $0x18] sm:$0xff] (!%p113_p2)  ;;  %v617_v11 = vmov (!%p113_p2), 0.0   ;;  %vm173_vm1 = vcmask (!%p113_p2), 261120  }
   0x7   : > { %v569_v8 = vpack.c.bf16 (!%p113_p2), %v489_v5, %v488_v2  ;;  %v490_v9 = vld [vmem:[%s710_s1 + $0x30] sm:$0xff] (!%p113_p2)  ;;  %v491_v10 = vld [vmem:[%s710_s1 + $0x38] sm:$0xff] (!%p113_p2)  ;;  %553 = vmatprep.mubr.msk.f32.mxu0 (!%p113_p2), %vm616_vm0, %v617_v11  ;;  %530 = vmatprep.mubr.msk.f32.mxu1 (!%p113_p2), %vm616_vm0, %v617_v11  ;;  %v578_v12 = vpack.c.bf16 (!%p113_p2), %v152_v7, %v151_v6  ;;  %vm163_vm2 = vcmask (!%p113_p2), 1046528   ;;  %vm419_vm3 = vcmask (!%p113_p2), 130048  }
   0x8   : > { %576 = vmatpush3.bf16.msra.mxu0 (!%p113_p2), %v575_v4  ;;  %v572_v13 = vpack.c.bf16 (!%p113_p2), %v491_v10, %v490_v9  ;;  %vm424_vm4 = vcmask (!%p113_p2), 129024  }
   0x9   : > { %570 = vmatpush3.bf16.msra.mxu1 (!%p113_p2), %v569_v8  ;;  %577 = vmatprep.subr.bf16.mxu0 (!%p113_p2), %v615_v3 }
   0xa   : > { %571 = vmatprep.subr.bf16.mxu1 (!%p113_p2), %v615_v3 }
   0xc   : > { %579 = vmatpush3.bf16.msra.mxu0 (!%p113_p2), %v578_v12 }
   0xd   : > { %s713_s10 = smov (!%p134_p3, %s481_s10), 1  ;;  %573 = vmatpush3.bf16.msra.mxu1 %v572_v13 }
   0xe   : > { %s585_s27 = smul.u32 40, %s713_s10 }
  0x10   : > { %s138_s30 = scalar_lea.vmem %s709_s0, %s585_s27  ;;  %s143_s5 = scalar_lea.vmem %s711_s2, %s585_s27 }
  0x11   : > { %v144_v14 = vld [vmem:[%s138_s30] sm:$0xff]  ;;  %v145_v15 = vld [vmem:[%s138_s30 + $0x8] sm:$0xff]  ;;  %v146_v16 = vld [vmem:[%s138_s30 + $0x10] sm:$0xff] }
  0x12   : > { %v164_v17 = vrot.slane %v144_v14, 1  ;;  %v165_v18 = vrot.slane %v145_v15, 1  ;;  %v167_v19 = vrot.slane %v146_v16, 1  ;;  %554 = vmatmul.mubr.msk.f32.vlgmr.msra.gmra.mrb[0].mxu0 %vm173_vm1, %v144_v14  ;;  %v147_v20 = vld [vmem:[%s138_s30 + $0x18] sm:$0xff]  ;;  %v148_v24 = vld [vmem:[%s138_s30 + $0x20] sm:$0xff] }
  0x13   : > { %556 = vmatprep.mubr.msk.f32.mxu0 %vm616_vm0, %v617_v11  ;;  %v169_v23 = vrot.slane %v147_v20, 1  ;;  %v171_v26 = vrot.slane %v148_v24, 1 }
  0x14   : > { %v166_v21 = vsel %vm163_vm2, %v164_v17, %v165_v18  ;;  %v168_v22 = vsel %vm163_vm2, %v165_v18, %v167_v19 }
  0x15   : > { %531 = vmatmul.mubr.msk.f32.vlgmr.msra.gmra.mrb[0].mxu1 %vm173_vm1, %v166_v21  ;;  %v170_v25 = vsel %vm163_vm2, %v167_v19, %v169_v23  ;;  %v172_v27 = vsel %vm163_vm2, %v169_v23, %v171_v26 }
  0x16   : > { %533 = vmatprep.mubr.msk.f32.mxu1 %vm616_vm0, %v617_v11  ;;  %557 = vmatmul.mubr.msk.f32.gmra.mrb[2].mxu0 %vm173_vm1, %v145_v15 }
  0x17   : > { %559 = vmatprep.mubr.msk.f32.mxu0 %vm616_vm0, %v617_v11 }
  0x19   : > { %534 = vmatmul.mubr.msk.f32.gmra.mrb[2].mxu1 %vm173_vm1, %v168_v22 }
  0x1a   : > { %536 = vmatprep.mubr.msk.f32.mxu1 %vm616_vm0, %v617_v11  ;;  %560 = vmatmul.mubr.msk.f32.gmra.mrb[4].mxu0 %vm173_vm1, %v146_v16 }
  0x1b   : > { %562 = vmatprep.mubr.msk.f32.mxu0 %vm616_vm0, %v617_v11 }
  0x1d   : > { %537 = vmatmul.mubr.msk.f32.gmra.mrb[4].mxu1 %vm173_vm1, %v170_v25 }
  0x1e   : > { %539 = vmatprep.mubr.msk.f32.mxu1 %vm616_vm0, %v617_v11  ;;  %563 = vmatmul.mubr.msk.f32.gmra.mrb[6].mxu0 %vm173_vm1, %v147_v20 }
  0x1f   : > { %565 = vmatprep.mubr.msk.f32.mxu0 %vm616_vm0, %v617_v11 }
  0x21   : > { %540 = vmatmul.mubr.msk.f32.gmra.mrb[6].mxu1 %vm173_vm1, %v172_v27 }
  0x22   : > { %542 = vmatprep.mubr.msk.f32.mxu1 %vm616_vm0, %v617_v11  ;;  %566 = vmatmul.mubr.msk.f32.gmra.mrb[8].mxu0 %vm173_vm1, %v148_v24 }
  0x25   : > { %543 = vmatmul.mubr.msk.f32.gmra.mrb[8].mxu1 %vm173_vm1, %v171_v26 }
  0xe5   : > { %v350_v28 = vpop.f32.mrb[0].mxu0 }
  0xe6   : > { %v555_v29 = vpop.f32.mrb[1].mxu0 }
  0xe8   : > { %v250_v30 = vpop.f32.mrb[0].mxu1 }
  0xe9   : > { %v351_v31 = vadd.f32 %v350_v28, %v250_v30  ;;  %v532_v32 = vpop.f32.mrb[1].mxu1  ;;  %v355_v33 = vpop.f32.mrb[2].mxu0 }
  0xea   : > { %v558_v35 = vpop.f32.mrb[3].mxu0 }
  0xeb   : > { %v374_v34 = vmul.f32 %v351_v31, %v351_v31 }
  0xec   : > { %v255_v36 = vpop.f32.mrb[2].mxu1 }
  0xed   : > { %v379_v37 = vmul.f32 %v374_v34, %v351_v31  ;;  %v356_v38 = vadd.f32 %v355_v33, %v255_v36  ;;  %v535_v39 = vpop.f32.mrb[3].mxu1  ;;  %v360_v40 = vpop.f32.mrb[4].mxu0 }
  0xee   : > { %v561_v43 = vpop.f32.mrb[5].mxu0 }
  0xef   : > { %v384_v41 = vmul.f32 0.044715, %v379_v37  ;;  %v375_v42 = vmul.f32 %v356_v38, %v356_v38 }
  0xf0   : > { %v260_v44 = vpop.f32.mrb[4].mxu1 }
  0xf1   : > { %v389_v45 = vadd.f32 %v384_v41, %v351_v31  ;;  %v380_v46 = vmul.f32 %v375_v42, %v356_v38  ;;  %v361_v47 = vadd.f32 %v360_v40, %v260_v44  ;;  %v538_v48 = vpop.f32.mrb[5].mxu1  ;;  %v365_v49 = vpop.f32.mrb[6].mxu0 }
  0xf2   : > { %v564_v53 = vpop.f32.mrb[7].mxu0 }
  0xf3   : > { %v394_v50 = vmul.f32 0.7978846, %v389_v45  ;;  %v385_v51 = vmul.f32 0.044715, %v380_v46  ;;  %v376_v52 = vmul.f32 %v361_v47, %v361_v47 }
  0xf4   : > { %v265_v54 = vpop.f32.mrb[6].mxu1 }
  0xf5   : > { %597 = vtanh.f32 %v394_v50  ;;  %v390_v55 = vadd.f32 %v385_v51, %v356_v38  ;;  %v381_v56 = vmul.f32 %v376_v52, %v361_v47  ;;  %v366_v57 = vadd.f32 %v365_v49, %v265_v54  ;;  %v541_v58 = vpop.f32.mrb[7].mxu1  ;;  %v370_v59 = vpop.f32.mrb[8].mxu0 }
  0xf6   : > { %v567_v63 = vpop.f32.mrb[9].mxu0 }
  0xf7   : > { %v395_v60 = vmul.f32 0.7978846, %v390_v55  ;;  %v386_v61 = vmul.f32 0.044715, %v381_v56  ;;  %v377_v62 = vmul.f32 %v366_v57, %v366_v57 }
  0xf8   : > { %v270_v0 = vpop.f32.mrb[8].mxu1 }
  0xf9   : > { %599 = vtanh.f32 %v395_v60  ;;  %v391_v1 = vadd.f32 %v386_v61, %v361_v47  ;;  %v382_v2 = vmul.f32 %v377_v62, %v366_v57  ;;  %v371_v3 = vadd.f32 %v370_v59, %v270_v0  ;;  %v544_v4 = vpop.f32.mrb[9].mxu1 }
  0xfb   : > { %v396_v5 = vmul.f32 0.7978846, %v391_v1  ;;  %v387_v6 = vmul.f32 0.044715, %v382_v2  ;;  %v378_v7 = vmul.f32 %v371_v3, %v371_v3 }
  0xfd   : > { %601 = vtanh.f32 %v396_v5  ;;  %v392_v8 = vadd.f32 %v387_v6, %v366_v57  ;;  %v383_v9 = vmul.f32 %v378_v7, %v371_v3 }
  0xff   : > { %v598_v10 = vpop.eup %597  ;;  %v397_v11 = vmul.f32 0.7978846, %v392_v8  ;;  %v388_v12 = vmul.f32 0.044715, %v383_v9 }
 0x100   : > { %v404_v13 = vadd.f32 1.0, %v598_v10 }
 0x101   : > { %603 = vtanh.f32 %v397_v11  ;;  %v393_v14 = vadd.f32 %v388_v12, %v371_v3 }
 0x102   : > { %v409_v15 = vmul.f32 0.5, %v404_v13 }
 0x103   : > { %v600_v16 = vpop.eup %599  ;;  %v398_v17 = vmul.f32 0.7978846, %v393_v14 }
 0x104   : > { %v414_v18 = vmul.f32 %v409_v15, %v351_v31  ;;  %v405_v19 = vadd.f32 1.0, %v600_v16 }
 0x105   : > { %605 = vtanh.f32 %v398_v17 }
 0x106   : > { %420 = vst.msk [vmem:[%s143_s5] sm:$0xff] %vm419_vm3, %v414_v18  ;;  %v410_v20 = vmul.f32 0.5, %v405_v19 }
 0x107   : > { %v602_v21 = vpop.eup %601 }
 0x108   : > { %v415_v22 = vmul.f32 %v410_v20, %v356_v38  ;;  %v406_v23 = vadd.f32 1.0, %v602_v21 }
 0x10a   : > { %421 = vst.msk [vmem:[%s143_s5 + $0x8] sm:$0xff] %vm419_vm3, %v415_v22  ;;  %v411_v24 = vmul.f32 0.5, %v406_v23 }
 0x10b   : > { %v604_v25 = vpop.eup %603 }
 0x10c   : > { %v416_v26 = vmul.f32 %v411_v24, %v361_v47  ;;  %v407_v27 = vadd.f32 1.0, %v604_v25 }
 0x10e   : > { %422 = vst.msk [vmem:[%s143_s5 + $0x10] sm:$0xff] %vm419_vm3, %v416_v26  ;;  %v412_v28 = vmul.f32 0.5, %v407_v27 }
 0x10f   : > { %v606_v29 = vpop.eup %605 }
 0x110   : > { %v417_v30 = vmul.f32 %v412_v28, %v366_v57  ;;  %v408_v31 = vadd.f32 1.0, %v606_v29 }
 0x112   : > { %423 = vst.msk [vmem:[%s143_s5 + $0x18] sm:$0xff] %vm419_vm3, %v417_v30  ;;  %v413_v32 = vmul.f32 0.5, %v408_v31 }
 0x114   : > { %v418_v33 = vmul.f32 %v413_v32, %v371_v3 }
 0x116   : > { %425 = vst.msk [vmem:[%s143_s5 + $0x20] sm:$0x7f] %vm424_vm4, %v418_v33 }
 0x117 PF: > { %s12_s9 = sadd.s32 1, %s613_s9  }
 0x118   : > { %p9_p4 = scmp.ge.s32.totalorder %s12_s9, 4  }
 0x11a   :  { %11 = sbr.rel (!%p9_p4) target bundleno = 1 (0x1), region = 59 }

// kernel: hubert_forward.6
= control target key start
LH: loop header
LB: loop body
LE: loop exit
PB: predicated region body
PF: predicated region fallthrough
CT: control target
= control target key end

     0   :  { %s1059_s15 = smov 0   ;;  %s1328_s0 = inlined_call_operand.vmem [shape: f32[2,80,5], index: 0, kind: input, shape index: {}]   ;;  %s1329_s1 = inlined_call_operand.vmem [shape: f32[2,5,16], index: 1, kind: input, shape index: {}]   ;;  %s1330_s2 = inlined_call_operand.vmem [shape: f32[1,16], index: 2, kind: input, shape index: {}]   ;;  %s1331_s3 = inlined_call_operand.vmem [shape: f32[1,16], index: 3, kind: input, shape index: {}]   ;;  %s1332_s4 = inlined_call_operand.vmem [shape: f32[2,79,16], index: 4, kind: output, shape index: {}]  }
   0x1 LB: > { %s889_s16 = sadd.s32 4294967295, %s1032_s15   ;;  %p893_p0 = scmp.ge.s32.totalorder %s1032_s15, 1  ;;  %s1032_s15 = sphi %s1059_s15, %s14_s15  }
   0x2   : > { %p162_p1 = scmp.lt.s32.totalorder %s1032_s15, 3 }
   0x4   : > { %p163_p2 = pnand %p893_p0, %p162_p1 }
   0x5   : > { %p188_p3 = scmp.lt.s32.totalorder (!%p163_p2), %s889_s16, 1  ;;  %vm208_vm0 = vcmask (!%p163_p2), 39936   ;;  %v303_v58 = vld [vmem:[%s1329_s1] sm:$0x1f] (!%p163_p2)  ;;  %vm356_vm1 = vcmask (!%p163_p2), 1044480   ;;  %vm316_vm2 = vcmask (!%p163_p2), 1046528  }
   0x6   : > { %166 = sbr.rel (%p163_p2) target bundleno = 615 (0x267), region = 36  ;;  %962 = vmatprep.subr.msk.mxu0 (!%p163_p2), %vm356_vm1, %v303_v58  ;;  %v896_v59 = vld [vmem:[%s1329_s1 + $0x8] sm:$0x1f] (!%p163_p2)  ;;  %vm613_vm3 = vcmask (!%p163_p2), 130048   ;;  %vm631_vm4 = vcmask (!%p163_p2), 129024  }
   0x7   : > { %963 = vmatpush3.msk.msra.mxu0 (!%p163_p2), %vm356_vm1, %v303_v58  ;;  %945 = vmatprep.subr.msk.mxu1 (!%p163_p2), %vm356_vm1, %v896_v59 }
   0x8   : > { %946 = vmatpush3.msk.msra.mxu1 (!%p163_p2), %vm356_vm1, %v896_v59 }
   0xd   : > { %s1334_s16 = smov (!%p188_p3, %s889_s16), 1 }
   0xe   : > { %s989_s17 = smul.u32 80, %s1334_s16 }
  0x10   : > { %s1075_s20 = scalar_lea.vmem %s1328_s0, %s989_s17  ;;  %s1293_s7 = scalar_lea.vmem %s1332_s4, %s989_s17 }
  0x11   : > { %v1078_v0 = vld [vmem:[%s1075_s20] sm:$0xff]  ;;  %v1081_v1 = vld [vmem:[%s1075_s20 + $0x8] sm:$0xff]  ;;  %v1084_v2 = vld [vmem:[%s1075_s20 + $0x10] sm:$0xff] }
  0x12   : > { %v1087_v3 = vld [vmem:[%s1075_s20 + $0x18] sm:$0xff]  ;;  %v209_v4 = vsel %vm208_vm0, %v1078_v0, 0.0  ;;  %v210_v5 = vsel %vm208_vm0, %v1081_v1, 0.0  ;;  %v212_v6 = vsel %vm208_vm0, %v1084_v2, 0.0  ;;  %v1096_v7 = vld [vmem:[%s1075_s20 + $0x20] sm:$0xff]  ;;  %v238_v9 = vmul.f32 %v1078_v0, %v1078_v0  ;;  %v1105_v12 = vld [vmem:[%s1075_s20 + $0x28] sm:$0xff] }
  0x13   : > { %v211_v8 = vadd.f32 %v210_v5, %v209_v4  ;;  %v214_v10 = vsel %vm208_vm0, %v1087_v3, 0.0  ;;  %v239_v11 = vmul.f32 %v1081_v1, %v1081_v1  ;;  %v240_v14 = vmul.f32 %v1084_v2, %v1084_v2  ;;  %v1114_v17 = vld [vmem:[%s1075_s20 + $0x30] sm:$0xff]  ;;  %v1124_v24 = vld [vmem:[%s1075_s20 + $0x38] sm:$0xff]  ;;  %v1132_v30 = vld [vmem:[%s1075_s20 + $0x40] sm:$0xff] }
  0x14   : > { %v216_v15 = vsel %vm208_vm0, %v1096_v7, 0.0  ;;  %v241_v16 = vmul.f32 %v1087_v3, %v1087_v3  ;;  %v248_v19 = vsel %vm208_vm0, %v238_v9, 0.0  ;;  %v218_v20 = vsel %vm208_vm0, %v1105_v12, 0.0  ;;  %v1140_v36 = vld [vmem:[%s1075_s20 + $0x48] sm:$0xff] }
  0x15   : > { %v213_v13 = vadd.f32 %v212_v6, %v211_v8  ;;  %v242_v21 = vmul.f32 %v1096_v7, %v1096_v7  ;;  %v249_v22 = vsel %vm208_vm0, %v239_v11, 0.0  ;;  %v251_v23 = vsel %vm208_vm0, %v240_v14, 0.0 }
  0x16   : > { %v250_v26 = vadd.f32 %v249_v22, %v248_v19  ;;  %v220_v27 = vsel %vm208_vm0, %v1114_v17, 0.0  ;;  %v243_v28 = vmul.f32 %v1105_v12, %v1105_v12  ;;  %v253_v29 = vsel %vm208_vm0, %v241_v16, 0.0 }
  0x17   : > { %v215_v18 = vadd.f32 %v214_v10, %v213_v13  ;;  %v222_v33 = vsel %vm208_vm0, %v1124_v24, 0.0  ;;  %v244_v34 = vmul.f32 %v1114_v17, %v1114_v17  ;;  %v255_v35 = vsel %vm208_vm0, %v242_v21, 0.0 }
  0x18   : > { %v252_v32 = vadd.f32 %v251_v23, %v250_v26  ;;  %v224_v39 = vsel %vm208_vm0, %v1132_v30, 0.0  ;;  %v245_v40 = vmul.f32 %v1124_v24, %v1124_v24  ;;  %v257_v41 = vsel %vm208_vm0, %v243_v28, 0.0 }
  0x19   : > { %v217_v25 = vadd.f32 %v216_v15, %v215_v18  ;;  %v226_v44 = vsel %vm208_vm0, %v1140_v36, 0.0  ;;  %v246_v45 = vmul.f32 %v1132_v30, %v1132_v30  ;;  %v259_v46 = vsel %vm208_vm0, %v244_v34, 0.0 }
  0x1a   : > { %v254_v38 = vadd.f32 %v253_v29, %v252_v32  ;;  %v247_v49 = vmul.f32 %v1140_v36, %v1140_v36  ;;  %v261_v50 = vsel %vm208_vm0, %v245_v40, 0.0 }
  0x1b   : > { %v219_v31 = vadd.f32 %v218_v20, %v217_v25  ;;  %v263_v53 = vsel %vm208_vm0, %v246_v45, 0.0 }
  0x1c   : > { %v256_v43 = vadd.f32 %v255_v35, %v254_v38  ;;  %v265_v55 = vsel %vm208_vm0, %v247_v49, 0.0 }
  0x1d   : > { %v221_v37 = vadd.f32 %v220_v27, %v219_v31 }
  0x1e   : > { %v258_v48 = vadd.f32 %v257_v41, %v256_v43 }
  0x1f   : > { %v223_v42 = vadd.f32 %v222_v33, %v221_v37 }
  0x20   : > { %v260_v52 = vadd.f32 %v259_v46, %v258_v48 }
  0x21   : > { %v225_v47 = vadd.f32 %v224_v39, %v223_v42 }
  0x22   : > { %v262_v54 = vadd.f32 %v261_v50, %v260_v52 }
  0x23   : > { %v227_v51 = vadd.f32 %v226_v44, %v225_v47 }
  0x24   : > { %v264_v56 = vadd.f32 %v263_v53, %v262_v54 }
  0x25   : > { %228 = vadd.xlane.f32.xlu0 %v227_v51 }
  0x26   : > { %v266_v57 = vadd.f32 %v265_v55, %v264_v56 }
  0x29   : > { %267 = vadd.xlane.f32.xlu0 %v266_v57 }
  0xb2   : > { %v229_v60 = vpop.xlane.xlu0 %228 }
  0xb3   : > { %v230_v61 = vrot.slane %v229_v60, 4 }
  0xb5   : > { %v231_v62 = vadd.f32 %v230_v61, %v229_v60 }
  0xb6   : > { %v268_v4 = vpop.xlane.xlu0 %267 }
  0xb7   : > { %v232_v63 = vrot.slane %v231_v62, 2  ;;  %v269_v5 = vrot.slane %v268_v4, 4 }
  0xb9   : > { %v233_v6 = vadd.f32 %v232_v63, %v231_v62  ;;  %v270_v8 = vadd.f32 %v269_v5, %v268_v4 }
  0xbb   : > { %v234_v9 = vrot.slane %v233_v6, 1  ;;  %v271_v10 = vrot.slane %v270_v8, 2 }
  0xbd   : > { %v235_v11 = vadd.f32 %v234_v9, %v233_v6  ;;  %v272_v13 = vadd.f32 %v271_v10, %v270_v8 }
  0xbf   : > { %990 = vpush %v235_v11  ;;  %v273_v14 = vrot.slane %v272_v13, 1 }
  0xc1   : > { %v274_v15 = vadd.f32 %v273_v14, %v272_v13 }
  0xc3   : > { %992 = vpush %v274_v15 }
  0xf0   : > { %s991_s25 = spop %990 }
  0xf1   : > { %v237_v16 = vstv %s991_s25 }
  0xf2   : > { %v277_v18 = vmul.f32 0.0025, %v237_v16 }
  0xf4   : > { %s993_s26 = spop %992  ;;  %v279_v21 = vmul.f32 %v277_v18, %v277_v18  ;;  %v281_v25 = vsub.f32 %v1078_v0, %v277_v18  ;;  %v282_v26 = vsub.f32 %v1081_v1, %v277_v18  ;;  %v283_v27 = vsub.f32 %v1084_v2, %v277_v18 }
  0xf5   : > { %v276_v19 = vstv %s993_s26  ;;  %v284_v28 = vsub.f32 %v1087_v3, %v277_v18  ;;  %v285_v31 = vsub.f32 %v1096_v7, %v277_v18  ;;  %v286_v32 = vsub.f32 %v1105_v12, %v277_v18 }
  0xf6   : > { %v278_v20 = vmul.f32 0.0025, %v276_v19  ;;  %v287_v3 = vsub.f32 %v1114_v17, %v277_v18  ;;  %v288_v41 = vsub.f32 %v1124_v24, %v277_v18  ;;  %v289_v17 = vsub.f32 %v1132_v30, %v277_v18 }
  0xf7   : > { %v290_v24 = vsub.f32 %v1140_v36, %v277_v18 }
  0xf8   : > { %v280_v22 = vsub.f32 %v278_v20, %v279_v21 }
  0xfa   : > { %v291_v23 = vadd.f32 1e-07, %v280_v22 }
  0xfc   : > { %1002 = vrsqrt.f32 %v291_v23 }
 0x106   : > { %v1003_v29 = vpop.eup %1002 }
 0x107   : > { %v293_v33 = vmul.f32 %v1003_v29, %v281_v25  ;;  %v294_v34 = vmul.f32 %v1003_v29, %v282_v26  ;;  %v295_v35 = vmul.f32 %v1003_v29, %v283_v27  ;;  %v296_v37 = vmul.f32 %v1003_v29, %v284_v28 }
 0x108   : > { %v297_v38 = vmul.f32 %v1003_v29, %v285_v31  ;;  %v298_v39 = vmul.f32 %v1003_v29, %v286_v32  ;;  %v299_v43 = vmul.f32 %v1003_v29, %v287_v3  ;;  %v300_v46 = vmul.f32 %v1003_v29, %v288_v41 }
 0x109   : > { %v317_v40 = vrot.slane %v293_v33, 1  ;;  %964 = vmatprep.mubr.msk.f32.mxu0 %vm208_vm0, %v293_v33  ;;  %v318_v0 = vrot.slane %v294_v34, 1  ;;  %v320_v1 = vrot.slane %v295_v35, 1  ;;  %v322_v2 = vrot.slane %v296_v37, 1 }
 0x10a   : > { %965 = vmatmul.mubr.msk.f32.vlgmr.msra.gmra.mrb[0].mxu0 %vm208_vm0, %v294_v34  ;;  %v324_v42 = vrot.slane %v297_v38, 1  ;;  %v326_v45 = vrot.slane %v298_v39, 1  ;;  %v328_v48 = vrot.slane %v299_v43, 1  ;;  %v301_v49 = vmul.f32 %v1003_v29, %v289_v17 }
 0x10b   : > { %967 = vmatprep.mubr.msk.f32.mxu0 %vm208_vm0, %v295_v35  ;;  %v319_v7 = vsel %vm316_vm2, %v317_v40, %v318_v0  ;;  %v321_v12 = vsel %vm316_vm2, %v318_v0, %v320_v1  ;;  %v323_v44 = vsel %vm316_vm2, %v320_v1, %v322_v2  ;;  %v330_v51 = vrot.slane %v300_v46, 1 }
 0x10c   : > { %947 = vmatprep.mubr.msk.f32.mxu1 %vm208_vm0, %v319_v7  ;;  %v325_v47 = vsel %vm316_vm2, %v322_v2, %v324_v42  ;;  %v327_v50 = vsel %vm316_vm2, %v324_v42, %v326_v45  ;;  %v302_v52 = vmul.f32 %v1003_v29, %v290_v24  ;;  %v329_v30 = vsel %vm316_vm2, %v326_v45, %v328_v48 }
 0x10d   : > { %948 = vmatmul.mubr.msk.f32.vlgmr.msra.gmra.mrb[0].mxu1 %vm208_vm0, %v321_v12  ;;  %v332_v53 = vrot.slane %v301_v49, 1  ;;  %v331_v36 = vsel %vm316_vm2, %v328_v48, %v330_v51 }
 0x10e   : > { %950 = vmatprep.mubr.msk.f32.mxu1 %vm208_vm0, %v323_v44  ;;  %968 = vmatmul.mubr.msk.f32.gmra.mrb[2].mxu0 %vm208_vm0, %v296_v37  ;;  %v334_v54 = vrot.slane %v302_v52, 1 }
 0x10f   : > { %970 = vmatprep.mubr.msk.f32.mxu0 %vm208_vm0, %v297_v38  ;;  %v333_v55 = vsel %vm316_vm2, %v330_v51, %v332_v53 }
 0x110   : > { %v335_v56 = vsel %vm316_vm2, %v332_v53, %v334_v54 }
 0x111   : > { %951 = vmatmul.mubr.msk.f32.gmra.mrb[2].mxu1 %vm208_vm0, %v325_v47 }
 0x112   : > { %953 = vmatprep.mubr.msk.f32.mxu1 %vm208_vm0, %v327_v50  ;;  %971 = vmatmul.mubr.msk.f32.gmra.mrb[4].mxu0 %vm208_vm0, %v298_v39 }
 0x113   : > { %973 = vmatprep.mubr.msk.f32.mxu0 %vm208_vm0, %v299_v43 }
 0x115   : > { %954 = vmatmul.mubr.msk.f32.gmra.mrb[4].mxu1 %vm208_vm0, %v329_v30 }
 0x116   : > { %956 = vmatprep.mubr.msk.f32.mxu1 %vm208_vm0, %v331_v36  ;;  %974 = vmatmul.mubr.msk.f32.gmra.mrb[6].mxu0 %vm208_vm0, %v300_v46 }
 0x117   : > { %976 = vmatprep.mubr.msk.f32.mxu0 %vm208_vm0, %v301_v49 }
 0x119   : > { %957 = vmatmul.mubr.msk.f32.gmra.mrb[6].mxu1 %vm208_vm0, %v333_v55 }
 0x11a   : > { %959 = vmatprep.mubr.msk.f32.mxu1 %vm208_vm0, %v335_v56  ;;  %977 = vmatmul.mubr.msk.f32.gmra.mrb[8].mxu0 %vm208_vm0, %v302_v52 }
 0x11d   : > { %960 = vmatmul.mubr.msk.f32.gmra.mrb[8].mxu1 %vm208_vm0, %v334_v54 }
 0x1dd   : > { %v966_v57 = vpop.f32.mrb[0].mxu0 }
 0x1de   : > { %v564_v58 = vpop.f32.mrb[1].mxu0 }
 0x1e0   : > { %v949_v59 = vpop.f32.mrb[0].mxu1 }
 0x1e1   : > { %v570_v60 = vadd.f32 %v966_v57, %v949_v59  ;;  %v426_v61 = vpop.f32.mrb[1].mxu1  ;;  %v969_v62 = vpop.f32.mrb[2].mxu0 }
 0x1e2   : > { %v565_v63 = vadd.f32 %v564_v58, %v426_v61  ;;  %v574_v4 = vpop.f32.mrb[3].mxu0 }
 0x1e3   : > { %v615_v5 = vsel %vm613_vm3, %v570_v60, 0.0 }
 0x1e4   : > { %v614_v6 = vsel %vm613_vm3, %v565_v63, 0.0  ;;  %v952_v8 = vpop.f32.mrb[2].mxu1 }
 0x1e5   : > { %v616_v9 = vadd.f32 %v615_v5, %v614_v6  ;;  %v580_v10 = vadd.f32 %v969_v62, %v952_v8  ;;  %v436_v11 = vpop.f32.mrb[3].mxu1  ;;  %v972_v13 = vpop.f32.mrb[4].mxu0 }
 0x1e6   : > { %v575_v14 = vadd.f32 %v574_v4, %v436_v11  ;;  %v584_v15 = vpop.f32.mrb[5].mxu0 }
 0x1e7   : > { %v619_v23 = vsel %vm613_vm3, %v580_v10, 0.0 }
 0x1e8   : > { %v617_v16 = vsel %vm613_vm3, %v575_v14, 0.0  ;;  %v955_v18 = vpop.f32.mrb[4].mxu1 }
 0x1e9   : > { %v618_v19 = vadd.f32 %v617_v16, %v616_v9  ;;  %v590_v20 = vadd.f32 %v972_v13, %v955_v18  ;;  %v446_v21 = vpop.f32.mrb[5].mxu1  ;;  %v975_v22 = vpop.f32.mrb[6].mxu0 }
 0x1ea   : > { %v585_v25 = vadd.f32 %v584_v15, %v446_v21  ;;  %v594_v26 = vpop.f32.mrb[7].mxu0 }
 0x1eb   : > { %v620_v27 = vadd.f32 %v619_v23, %v618_v19  ;;  %v623_v35 = vsel %vm613_vm3, %v590_v20, 0.0 }
 0x1ec   : > { %v621_v28 = vsel %vm613_vm3, %v585_v25, 0.0  ;;  %v958_v29 = vpop.f32.mrb[6].mxu1 }
 0x1ed   : > { %v622_v31 = vadd.f32 %v621_v28, %v620_v27  ;;  %v600_v32 = vadd.f32 %v975_v22, %v958_v29  ;;  %v456_v33 = vpop.f32.mrb[7].mxu1  ;;  %v978_v34 = vpop.f32.mrb[8].mxu0 }
 0x1ee   : > { %v595_v37 = vadd.f32 %v594_v26, %v456_v33  ;;  %v604_v38 = vpop.f32.mrb[9].mxu0 }
 0x1ef   : > { %v624_v39 = vadd.f32 %v623_v35, %v622_v31  ;;  %v627_v7 = vsel %vm613_vm3, %v600_v32, 0.0 }
 0x1f0   : > { %v625_v40 = vsel %vm613_vm3, %v595_v37, 0.0  ;;  %v961_v0 = vpop.f32.mrb[8].mxu1 }
 0x1f1   : > { %v626_v1 = vadd.f32 %v625_v40, %v624_v39  ;;  %v610_v2 = vadd.f32 %v978_v34, %v961_v0  ;;  %v466_v3 = vpop.f32.mrb[9].mxu1 }
 0x1f2   : > { %v605_v12 = vadd.f32 %v604_v38, %v466_v3 }
 0x1f3   : > { %v628_v41 = vadd.f32 %v627_v7, %v626_v1  ;;  %v632_v44 = vsel %vm631_vm4, %v610_v2, 0.0 }
 0x1f4   : > { %v629_v42 = vsel %vm613_vm3, %v605_v12, 0.0 }
 0x1f5   : > { %v630_v43 = vadd.f32 %v629_v42, %v628_v41 }
 0x1f7   : > { %v633_v45 = vadd.f32 %v632_v44, %v630_v43 }
 0x1f9   : > { %v634_v46 = vrot.slane %v633_v45, 4 }
 0x1fb   : > { %v635_v17 = vadd.f32 %v634_v46, %v633_v45 }
 0x1fd   : > { %v636_v24 = vrot.slane %v635_v17, 2 }
 0x1ff   : > { %v637_v47 = vadd.f32 %v636_v24, %v635_v17 }
 0x201   : > { %v638_v48 = vrot.slane %v637_v47, 1 }
 0x203   : > { %v639_v49 = vadd.f32 %v638_v48, %v637_v47  ;;  %v920_v48 = vld [vmem:[%s1331_s3] ss:$0 sm:$0xff] }
 0x205   : > { %v641_v50 = vmul.f32 0.012658228, %v639_v49 }
 0x207   : > { %v642_v51 = vsub.f32 %v565_v63, %v641_v50  ;;  %v643_v52 = vsub.f32 %v570_v60, %v641_v50  ;;  %v644_v30 = vsub.f32 %v575_v14, %v641_v50  ;;  %v645_v53 = vsub.f32 %v580_v10, %v641_v50 }
 0x208   : > { %v646_v36 = vsub.f32 %v585_v25, %v641_v50  ;;  %v647_v54 = vsub.f32 %v590_v20, %v641_v50  ;;  %v648_v55 = vsub.f32 %v595_v37, %v641_v50  ;;  %v649_v56 = vsub.f32 %v600_v32, %v641_v50 }
 0x209   : > { %v650_v57 = vsub.f32 %v605_v12, %v641_v50  ;;  %v651_v58 = vsub.f32 %v610_v2, %v641_v50  ;;  %v652_v59 = vmul.f32 %v642_v51, %v642_v51  ;;  %v653_v61 = vmul.f32 %v643_v52, %v643_v52  ;;  %v919_v2 = vld [vmem:[%s1330_s2] ss:$0 sm:$0xff] }
 0x20a   : > { %v654_v62 = vmul.f32 %v644_v30, %v644_v30  ;;  %v655_v4 = vmul.f32 %v645_v53, %v645_v53  ;;  %v656_v9 = vmul.f32 %v646_v36, %v646_v36  ;;  %v657_v10 = vmul.f32 %v647_v54, %v647_v54 }
 0x20b   : > { %v662_v5 = vsel %vm613_vm3, %v652_v59, 0.0  ;;  %v663_v6 = vsel %vm613_vm3, %v653_v61, 0.0  ;;  %v658_v14 = vmul.f32 %v648_v55, %v648_v55  ;;  %v659_v18 = vmul.f32 %v649_v56, %v649_v56 }
 0x20c   : > { %v664_v8 = vadd.f32 %v663_v6, %v662_v5  ;;  %v665_v60 = vsel %vm613_vm3, %v654_v62, 0.0  ;;  %v667_v11 = vsel %vm613_vm3, %v655_v4, 0.0  ;;  %v669_v15 = vsel %vm613_vm3, %v656_v9, 0.0 }
 0x20d   : > { %v671_v19 = vsel %vm613_vm3, %v657_v10, 0.0  ;;  %v660_v21 = vmul.f32 %v650_v57, %v650_v57  ;;  %v673_v22 = vsel %vm613_vm3, %v658_v14, 0.0  ;;  %v661_v25 = vmul.f32 %v651_v58, %v651_v58 }
 0x20e   : > { %v666_v63 = vadd.f32 %v665_v60, %v664_v8  ;;  %v675_v26 = vsel %vm613_vm3, %v659_v18, 0.0 }
 0x20f   : > { %v677_v28 = vsel %vm613_vm3, %v660_v21, 0.0  ;;  %v679_v31 = vsel %vm631_vm4, %v661_v25, 0.0 }
 0x210   : > { %v668_v13 = vadd.f32 %v667_v11, %v666_v63 }
 0x212   : > { %v670_v16 = vadd.f32 %v669_v15, %v668_v13 }
 0x214   : > { %v672_v20 = vadd.f32 %v671_v19, %v670_v16 }
 0x216   : > { %v674_v23 = vadd.f32 %v673_v22, %v672_v20 }
 0x218   : > { %v676_v27 = vadd.f32 %v675_v26, %v674_v23 }
 0x21a   : > { %v678_v29 = vadd.f32 %v677_v28, %v676_v27 }
 0x21c   : > { %v680_v32 = vadd.f32 %v679_v31, %v678_v29 }
 0x21e   : > { %v681_v33 = vrot.slane %v680_v32, 4 }
 0x220   : > { %v682_v34 = vadd.f32 %v681_v33, %v680_v32 }
 0x222   : > { %v683_v35 = vrot.slane %v682_v34, 2 }
 0x224   : > { %v684_v37 = vadd.f32 %v683_v35, %v682_v34 }
 0x226   : > { %v685_v38 = vrot.slane %v684_v37, 1 }
 0x228   : > { %v686_v39 = vadd.f32 %v685_v38, %v684_v37 }
 0x22a   : > { %v687_v40 = vmul.f32 0.012658228, %v686_v39 }
 0x22c   : > { %v688_v0 = vadd.f32 1e-05, %v687_v40 }
 0x22e   : > { %1004 = vrsqrt.f32 %v688_v0 }
 0x238   : > { %v1005_v1 = vpop.eup %1004 }
 0x239   : > { %v690_v3 = vmul.f32 %v1005_v1, %v642_v51  ;;  %v691_v7 = vmul.f32 %v1005_v1, %v643_v52  ;;  %v692_v12 = vmul.f32 %v1005_v1, %v644_v30  ;;  %v693_v41 = vmul.f32 %v1005_v1, %v645_v53 }
 0x23a   : > { %v694_v42 = vmul.f32 %v1005_v1, %v646_v36  ;;  %v695_v43 = vmul.f32 %v1005_v1, %v647_v54  ;;  %v696_v44 = vmul.f32 %v1005_v1, %v648_v55  ;;  %v697_v45 = vmul.f32 %v1005_v1, %v649_v56 }
 0x23b   : > { %v698_v46 = vmul.f32 %v1005_v1, %v650_v57  ;;  %v699_v17 = vmul.f32 %v1005_v1, %v651_v58  ;;  %v707_v24 = vmul.f32 %v919_v2, %v690_v3  ;;  %v708_v47 = vmul.f32 %v919_v2, %v691_v7 }
 0x23c   : > { %v709_v49 = vmul.f32 %v919_v2, %v692_v12  ;;  %v710_v50 = vmul.f32 %v919_v2, %v693_v41  ;;  %v711_v59 = vmul.f32 %v919_v2, %v694_v42  ;;  %v712_v61 = vmul.f32 %v919_v2, %v695_v43 }
 0x23d   : > { %v713_v51 = vmul.f32 %v919_v2, %v696_v44  ;;  %v714_v52 = vmul.f32 %v919_v2, %v697_v45  ;;  %v715_v30 = vmul.f32 %v919_v2, %v698_v46  ;;  %v716_v53 = vmul.f32 %v919_v2, %v699_v17 }
 0x23e   : > { %v1228_v36 = vadd.f32 %v920_v48, %v707_v24  ;;  %v1230_v54 = vadd.f32 %v920_v48, %v708_v47  ;;  %v1232_v55 = vadd.f32 %v920_v48, %v709_v49  ;;  %v1234_v56 = vadd.f32 %v920_v48, %v710_v50 }
 0x23f   : > { %v1236_v57 = vadd.f32 %v920_v48, %v711_v59  ;;  %v1238_v58 = vadd.f32 %v920_v48, %v712_v61  ;;  %v1240_v62 = vadd.f32 %v920_v48, %v713_v51  ;;  %v1242_v4 = vadd.f32 %v920_v48, %v714_v52 }
 0x240   : > { %v1244_v5 = vadd.f32 %v920_v48, %v715_v30  ;;  %v1246_v6 = vadd.f32 %v920_v48, %v716_v53  ;;  %v734_v8 = vmul.f32 %v1228_v36, %v1228_v36  ;;  %v735_v9 = vmul.f32 %v1230_v54, %v1230_v54 }
 0x241   : > { %v736_v60 = vmul.f32 %v1232_v55, %v1232_v55  ;;  %v737_v63 = vmul.f32 %v1234_v56, %v1234_v56  ;;  %v738_v10 = vmul.f32 %v1236_v57, %v1236_v57  ;;  %v739_v11 = vmul.f32 %v1238_v58, %v1238_v58 }
 0x242   : > { %v740_v13 = vmul.f32 %v1240_v62, %v1240_v62  ;;  %v741_v14 = vmul.f32 %v1242_v4, %v1242_v4  ;;  %v742_v15 = vmul.f32 %v1244_v5, %v1244_v5  ;;  %v743_v16 = vmul.f32 %v1246_v6, %v1246_v6 }
 0x243   : > { %v744_v18 = vmul.f32 %v734_v8, %v1228_v36  ;;  %v745_v19 = vmul.f32 %v735_v9, %v1230_v54  ;;  %v746_v20 = vmul.f32 %v736_v60, %v1232_v55  ;;  %v747_v21 = vmul.f32 %v737_v63, %v1234_v56 }
 0x244   : > { %v748_v22 = vmul.f32 %v738_v10, %v1236_v57  ;;  %v749_v23 = vmul.f32 %v739_v11, %v1238_v58  ;;  %v750_v25 = vmul.f32 %v740_v13, %v1240_v62  ;;  %v751_v26 = vmul.f32 %v741_v14, %v1242_v4 }
 0x245   : > { %v752_v27 = vmul.f32 %v742_v15, %v1244_v5  ;;  %v753_v28 = vmul.f32 %v743_v16, %v1246_v6  ;;  %v754_v29 = vmul.f32 0.044715, %v744_v18  ;;  %v755_v31 = vmul.f32 0.044715, %v745_v19 }
 0x246   : > { %v756_v32 = vmul.f32 0.044715, %v746_v20  ;;  %v757_v33 = vmul.f32 0.044715, %v747_v21  ;;  %v758_v34 = vmul.f32 0.044715, %v748_v22 }
 0x247   : > { %v759_v35 = vmul.f32 0.044715, %v749_v23  ;;  %v760_v37 = vmul.f32 0.044715, %v750_v25  ;;  %v761_v38 = vmul.f32 0.044715, %v751_v26  ;;  %v764_v39 = vadd.f32 %v754_v29, %v1228_v36 }
 0x248   : > { %v762_v40 = vmul.f32 0.044715, %v752_v27  ;;  %v765_v0 = vadd.f32 %v755_v31, %v1230_v54  ;;  %v766_v1 = vadd.f32 %v756_v32, %v1232_v55  ;;  %v763_v2 = vmul.f32 0.044715, %v753_v28 }
 0x249   : > { %v767_v3 = vadd.f32 %v757_v33, %v1234_v56  ;;  %v768_v7 = vadd.f32 %v758_v34, %v1236_v57  ;;  %v769_v12 = vadd.f32 %v759_v35, %v1238_v58  ;;  %v770_v41 = vadd.f32 %v760_v37, %v1240_v62 }
 0x24a   : > { %v774_v42 = vmul.f32 0.7978846, %v764_v39  ;;  %v771_v43 = vadd.f32 %v761_v38, %v1242_v4  ;;  %v775_v44 = vmul.f32 0.7978846, %v765_v0  ;;  %v776_v45 = vmul.f32 0.7978846, %v766_v1 }
 0x24b   : > { %v777_v46 = vmul.f32 0.7978846, %v767_v3  ;;  %v772_v17 = vadd.f32 %v762_v40, %v1244_v5  ;;  %v778_v24 = vmul.f32 0.7978846, %v768_v7  ;;  %v773_v47 = vadd.f32 %v763_v2, %v1246_v6 }
 0x24c   : > { %1006 = vtanh.f32 %v774_v42  ;;  %v779_v48 = vmul.f32 0.7978846, %v769_v12  ;;  %v780_v49 = vmul.f32 0.7978846, %v770_v41  ;;  %v781_v50 = vmul.f32 0.7978846, %v771_v43 }
 0x24d   : > { %1008 = vtanh.f32 %v775_v44  ;;  %v782_v59 = vmul.f32 0.7978846, %v772_v17  ;;  %v783_v61 = vmul.f32 0.7978846, %v773_v47 }
 0x24e   : > { %1010 = vtanh.f32 %v776_v45 }
 0x24f   : > { %1012 = vtanh.f32 %v777_v46 }
 0x250   : > { %1014 = vtanh.f32 %v778_v24 }
 0x251   : > { %1016 = vtanh.f32 %v779_v48 }
 0x252   : > { %1018 = vtanh.f32 %v780_v49 }
 0x253   : > { %1020 = vtanh.f32 %v781_v50 }
 0x254   : > { %1022 = vtanh.f32 %v782_v59 }
 0x255   : > { %1024 = vtanh.f32 %v783_v61 }
 0x256   : > { %v1007_v51 = vpop.eup %1006 }
 0x257   : > { %v1009_v52 = vpop.eup %1008  ;;  %v794_v30 = vadd.f32 1.0, %v1007_v51 }
 0x258   : > { %v1011_v53 = vpop.eup %1010  ;;  %v795_v8 = vadd.f32 1.0, %v1009_v52 }
 0x259   : > { %v1013_v9 = vpop.eup %1012  ;;  %v796_v60 = vadd.f32 1.0, %v1011_v53  ;;  %v804_v63 = vmul.f32 0.5, %v794_v30 }
 0x25a   : > { %v1015_v10 = vpop.eup %1014  ;;  %v797_v11 = vadd.f32 1.0, %v1013_v9  ;;  %v805_v13 = vmul.f32 0.5, %v795_v8 }
 0x25b   : > { %v1017_v14 = vpop.eup %1016  ;;  %v798_v15 = vadd.f32 1.0, %v1015_v10  ;;  %v806_v16 = vmul.f32 0.5, %v796_v60  ;;  %v814_v18 = vmul.f32 %v804_v63, %v1228_v36 }
 0x25c   : > { %v1019_v19 = vpop.eup %1018  ;;  %v799_v20 = vadd.f32 1.0, %v1017_v14  ;;  %v807_v21 = vmul.f32 0.5, %v797_v11  ;;  %v815_v22 = vmul.f32 %v805_v13, %v1230_v54 }
 0x25d   : > { %v1021_v23 = vpop.eup %1020  ;;  %v800_v25 = vadd.f32 1.0, %v1019_v19  ;;  %v808_v26 = vmul.f32 0.5, %v798_v15  ;;  %v816_v27 = vmul.f32 %v806_v16, %v1232_v55  ;;  %824 = vst.msk [vmem:[%s1293_s7] sm:$0xff] %vm613_vm3, %v814_v18 }
 0x25e   : > { %v1023_v28 = vpop.eup %1022  ;;  %v801_v29 = vadd.f32 1.0, %v1021_v23  ;;  %v809_v31 = vmul.f32 0.5, %v799_v20  ;;  %v817_v36 = vmul.f32 %v807_v21, %v1234_v56  ;;  %825 = vst.msk [vmem:[%s1293_s7 + $0x8] sm:$0xff] %vm613_vm3, %v815_v22 }
 0x25f   : > { %v1025_v32 = vpop.eup %1024  ;;  %v802_v54 = vadd.f32 1.0, %v1023_v28  ;;  %v810_v33 = vmul.f32 0.5, %v800_v25  ;;  %v818_v34 = vmul.f32 %v808_v26, %v1236_v57  ;;  %826 = vst.msk [vmem:[%s1293_s7 + $0x10] sm:$0xff] %vm613_vm3, %v816_v27 }
 0x260   : > { %v803_v55 = vadd.f32 1.0, %v1025_v32  ;;  %v811_v35 = vmul.f32 0.5, %v801_v29  ;;  %v819_v37 = vmul.f32 %v809_v31, %v1238_v58  ;;  %827 = vst.msk [vmem:[%s1293_s7 + $0x18] sm:$0xff] %vm613_vm3, %v817_v36 }
 0x261   : > { %v812_v56 = vmul.f32 0.5, %v802_v54  ;;  %v820_v38 = vmul.f32 %v810_v33, %v1240_v62  ;;  %828 = vst.msk [vmem:[%s1293_s7 + $0x20] sm:$0xff] %vm613_vm3, %v818_v34 }
 0x262   : > { %v813_v39 = vmul.f32 0.5, %v803_v55  ;;  %v821_v40 = vmul.f32 %v811_v35, %v1242_v4  ;;  %829 = vst.msk [vmem:[%s1293_s7 + $0x28] sm:$0xff] %vm613_vm3, %v819_v37 }
 0x263   : > { %v822_v57 = vmul.f32 %v812_v56, %v1244_v5  ;;  %830 = vst.msk [vmem:[%s1293_s7 + $0x30] sm:$0xff] %vm613_vm3, %v820_v38 }
 0x264   : > { %v823_v0 = vmul.f32 %v813_v39, %v1246_v6  ;;  %831 = vst.msk [vmem:[%s1293_s7 + $0x38] sm:$0xff] %vm613_vm3, %v821_v40 }
 0x265   : > { %832 = vst.msk [vmem:[%s1293_s7 + $0x40] sm:$0xff] %vm613_vm3, %v822_v57 }
 0x266   : > { %833 = vst.msk [vmem:[%s1293_s7 + $0x48] sm:$0x7f] %vm631_vm4, %v823_v0 }
 0x267 PF: > { %s14_s15 = sadd.s32 1, %s1032_s15  }
 0x268   : > { %p11_p4 = scmp.ge.s32.totalorder %s14_s15, 4  }
 0x26a   :  { %13 = sbr.rel (!%p11_p4) target bundleno = 1 (0x1), region = 67 }

// kernel: hubert_forward.9
= control target key start
LH: loop header
LB: loop body
LE: loop exit
PB: predicated region body
PF: predicated region fallthrough
CT: control target
= control target key end

     0   :  { %s1012_s18 = smov 0   ;;  %s1161_s0 = inlined_call_operand.vmem [shape: f32[2,23,32], index: 0, kind: input, shape index: {}]   ;;  %s1162_s1 = inlined_call_operand.vmem [shape: f32[4,32,32], index: 1, kind: input, shape index: {}]   ;;  %s1163_s2 = inlined_call_operand.vmem [shape: f32[1,32], index: 2, kind: input, shape index: {}]   ;;  %s1164_s3 = inlined_call_operand.vmem [shape: f32[1,32], index: 3, kind: input, shape index: {}]   ;;  %s1165_s4 = inlined_call_operand.vmem [shape: f32[1,32], index: 4, kind: input, shape index: {}]   ;;  %s1166_s5 = inlined_call_operand.vmem [shape: f32[2,19,32], index: 5, kind: output, shape index: {}]  }
   0x1 LB: > { %s791_s19 = sadd.s32 4294967295, %s977_s18   ;;  %p795_p0 = scmp.ge.s32.totalorder %s977_s18, 1  ;;  %s977_s18 = sphi %s1012_s18, %s15_s18  }
   0x2   : > { %p187_p1 = scmp.lt.s32.totalorder %s977_s18, 3 }
   0x4   : > { %p188_p2 = pnand %p795_p0, %p187_p1 }
   0x5   : > { %v798_v0 = vld [vmem:[%s1162_s1 + $0x20] sm:$0xff] (!%p188_p2)  ;;  %v799_v1 = vld [vmem:[%s1162_s1 + $0x28] sm:$0xff] (!%p188_p2)  ;;  %v979_v3 = vmov (!%p188_p2), 0.0|0.0   ;;  %v800_v6 = vld [vmem:[%s1162_s1 + $0x30] sm:$0xff] (!%p188_p2)  ;;  %p215_p3 = scmp.lt.s32.totalorder (!%p188_p2), %s791_s19, 1  ;;  %vm980_vm0 = vmmov (!%p188_p2), 0  }
   0x6   : > { %191 = sbr.rel (%p188_p2) target bundleno = 605 (0x25d), region = 40  ;;  %v228_v2 = vld [vmem:[%s1162_s1] sm:$0xff] (!%p188_p2)  ;;  %923 = vmatprep.subr.bf16.mxu0 (!%p188_p2), %v979_v3  ;;  %v924_v4 = vpack.c.bf16 (!%p188_p2), %v799_v1, %v798_v0  ;;  %929 = vmatprep.subr.bf16.mxu1 (!%p188_p2), %v979_v3  ;;  %v229_v5 = vld [vmem:[%s1162_s1 + $0x8] sm:$0xff] (!%p188_p2)  ;;  %v801_v7 = vld [vmem:[%s1162_s1 + $0x38] sm:$0xff] (!%p188_p2)  ;;  %v981_v11 = vmov (!%p188_p2), 0.0   ;;  %vm240_vm1 = vcmask (!%p188_p2), 1046528  }
   0x7   : > { %v930_v8 = vpack.c.bf16 (!%p188_p2), %v229_v5, %v228_v2  ;;  %v230_v9 = vld [vmem:[%s1162_s1 + $0x10] sm:$0xff] (!%p188_p2)  ;;  %v231_v10 = vld [vmem:[%s1162_s1 + $0x18] sm:$0xff] (!%p188_p2)  ;;  %863 = vmatprep.mubr.msk.f32.mxu0 (!%p188_p2), %vm980_vm0, %v981_v11  ;;  %880 = vmatprep.mubr.msk.f32.mxu1 (!%p188_p2), %vm980_vm0, %v981_v11  ;;  %v927_v12 = vpack.c.bf16 (!%p188_p2), %v801_v7, %v800_v6  ;;  %v815_v14 = vld [vmem:[%s1162_s1 + $0x60] sm:$0xff] (!%p188_p2)  ;;  %vm246_vm2 = vcmask (!%p188_p2), 261120   ;;  %vm524_vm3 = vcmask (!%p188_p2), 1044480  }
   0x8   : > { %925 = vmatpush3.bf16.msra.mxu0 (!%p188_p2), %v924_v4  ;;  %v933_v13 = vpack.c.bf16 (!%p188_p2), %v231_v10, %v230_v9  ;;  %v816_v15 = vld [vmem:[%s1162_s1 + $0x68] sm:$0xff] (!%p188_p2)  ;;  %v808_v16 = vld [vmem:[%s1162_s1 + $0x40] sm:$0xff] (!%p188_p2)  ;;  %v810_v26 = vld [vmem:[%s1162_s1 + $0x50] sm:$0xff] (!%p188_p2)  ;;  %vm424_vm4 = vcmask (!%p188_p2), 1045504   ;;  %vm673_vm5 = vcmask (!%p188_p2), 261122   ;;  %vm659_vm6 = vcmask (!%p188_p2), 1041408  }
   0x9   : > { %931 = vmatpush3.bf16.msra.mxu1 (!%p188_p2), %v930_v8  ;;  %926 = vmatprep.subr.bf16.mxu0 (!%p188_p2), %v979_v3  ;;  %v809_v17 = vld [vmem:[%s1162_s1 + $0x48] sm:$0xff] (!%p188_p2)  ;;  %v942_v20 = vpack.c.bf16 (!%p188_p2), %v816_v15, %v815_v14  ;;  %v811_v27 = vld [vmem:[%s1162_s1 + $0x58] sm:$0xff] (!%p188_p2)  ;;  %v817_v29 = vld [vmem:[%s1162_s1 + $0x70] sm:$0xff] (!%p188_p2)  ;;  %vm680_vm7 = vcmask (!%p188_p2), 258048  }
   0xa   : > { %932 = vmatprep.subr.bf16.mxu1 (!%p188_p2), %v979_v3  ;;  %v936_v24 = vpack.c.bf16 (!%p188_p2), %v809_v17, %v808_v16  ;;  %v818_v30 = vld [vmem:[%s1162_s1 + $0x78] sm:$0xff] (!%p188_p2)  ;;  %v939_v32 = vpack.c.bf16 (!%p188_p2), %v811_v27, %v810_v26  ;;  %v822_v0 = vld [vmem:[%s1163_s2] ss:$0 sm:$0xff] (!%p188_p2) }
   0xb   : > { %v945_v33 = vpack.c.bf16 (!%p188_p2), %v818_v30, %v817_v29 }
   0xc   : > { %928 = vmatpush3.bf16.msra.mxu0 (!%p188_p2), %v927_v12 }
   0xd   : > { %s1168_s19 = smov (!%p215_p3, %s791_s19), 1  ;;  %934 = vmatpush3.bf16.msra.mxu1 %v933_v13  ;;  %935 = vmatprep.subr.bf16.mxu0 %v979_v3 }
   0xe   : > { %s947_s11 = smul.u32 24, %s1168_s19  ;;  %941 = vmatprep.subr.bf16.mxu1 %v979_v3 }
  0x10   : > { %s219_s24 = scalar_lea.vmem %s1161_s0, %s947_s11  ;;  %s224_s17 = scalar_lea.vmem %s1166_s5, %s947_s11 }
  0x11   : > { %v1068_v18 = vld [vmem:[%s219_s24] sm:$0xff]  ;;  %v1070_v19 = vld [vmem:[%s219_s24 + $0x8] sm:$0xff]  ;;  %v1072_v21 = vld [vmem:[%s219_s24 + $0x10] sm:$0x7f] }
  0x12   : > { %v241_v22 = vrot.slane %v1068_v18, 1  ;;  %v242_v23 = vrot.slane %v1070_v19, 1  ;;  %v244_v25 = vrot.slane %v1072_v21, 1  ;;  %881 = vmatmul.mubr.msk.f32.vlgmr.msra.gmra.mrb[0].mxu1 %vm246_vm2, %v1068_v18  ;;  %v525_v34 = vrot.slane %v1068_v18, 3 }
  0x13   : > { %943 = vmatpush3.bf16.msra.mxu1 %v942_v20  ;;  %883 = vmatprep.mubr.msk.f32.mxu1 %vm980_vm0, %v981_v11  ;;  %v526_v35 = vrot.slane %v1070_v19, 3  ;;  %v425_v36 = vrot.slane %v1068_v18, 2  ;;  %v426_v37 = vrot.slane %v1070_v19, 2  ;;  %v528_v39 = vrot.slane %v1072_v21, 3 }
  0x14   : > { %v243_v28 = vsel %vm240_vm1, %v241_v22, %v242_v23  ;;  %v245_v31 = vsel %vm240_vm1, %v242_v23, %v244_v25  ;;  %944 = vmatprep.subr.bf16.mxu1 %v979_v3  ;;  %v428_v41 = vrot.slane %v1072_v21, 2 }
  0x15   : > { %864 = vmatmul.mubr.msk.f32.vlgmr.msra.gmra.mrb[0].mxu0 %vm246_vm2, %v243_v28  ;;  %v527_v38 = vsel %vm524_vm3, %v525_v34, %v526_v35  ;;  %v427_v40 = vsel %vm424_vm4, %v425_v36, %v426_v37  ;;  %v529_v42 = vsel %vm524_vm3, %v526_v35, %v528_v39 }
  0x16   : > { %937 = vmatpush3.bf16.msra.mxu0 %v936_v24  ;;  %866 = vmatprep.mubr.msk.f32.mxu0 %vm980_vm0, %v981_v11  ;;  %v429_v43 = vsel %vm424_vm4, %v426_v37, %v428_v41 }
  0x17   : > { %938 = vmatprep.subr.bf16.mxu0 %v979_v3  ;;  %884 = vmatmul.mubr.msk.f32.gmra.mrb[2].mxu1 %vm246_vm2, %v1070_v19 }
  0x18   : > { %886 = vmatprep.mubr.msk.f32.mxu1 %vm980_vm0, %v981_v11  ;;  %946 = vmatpush3.bf16.msra.mxu1 %v945_v33 }
  0x19   : > { %867 = vmatmul.mubr.msk.f32.gmra.mrb[2].mxu0 %vm246_vm2, %v245_v31 }
  0x1a   : > { %940 = vmatpush3.bf16.msra.mxu0 %v939_v32  ;;  %869 = vmatprep.mubr.msk.f32.mxu0 %vm980_vm0, %v981_v11 }
  0x1b   : > { %887 = vmatmul.mubr.msk.f32.gmra.mrb[4].mxu1 %vm246_vm2, %v1072_v21 }
  0x1c   : > { %914 = vmatprep.mubr.msk.f32.mxu1 %vm980_vm0, %v981_v11 }
  0x1d   : > { %870 = vmatmul.mubr.msk.f32.gmra.mrb[4].mxu0 %vm246_vm2, %v244_v25 }
  0x1e   : > { %897 = vmatprep.mubr.msk.f32.mxu0 %vm980_vm0, %v981_v11 }
  0x1f   : > { %915 = vmatmul.mubr.msk.f32.vlgmr.msra.gmra.mrb[6].mxu1 %vm246_vm2, %v527_v38 }
  0x20   : > { %917 = vmatprep.mubr.msk.f32.mxu1 %vm980_vm0, %v981_v11 }
  0x21   : > { %898 = vmatmul.mubr.msk.f32.vlgmr.msra.gmra.mrb[6].mxu0 %vm246_vm2, %v427_v40 }
  0x22   : > { %900 = vmatprep.mubr.msk.f32.mxu0 %vm980_vm0, %v981_v11 }
  0x23   : > { %918 = vmatmul.mubr.msk.f32.gmra.mrb[8].mxu1 %vm246_vm2, %v529_v42 }
  0x24   : > { %920 = vmatprep.mubr.msk.f32.mxu1 %vm980_vm0, %v981_v11 }
  0x25   : > { %901 = vmatmul.mubr.msk.f32.gmra.mrb[8].mxu0 %vm246_vm2, %v429_v43 }
  0x26   : > { %903 = vmatprep.mubr.msk.f32.mxu0 %vm980_vm0, %v981_v11 }
  0x27   : > { %921 = vmatmul.mubr.msk.f32.gmra.mrb[10].mxu1 %vm246_vm2, %v528_v39 }
  0x29   : > { %904 = vmatmul.mubr.msk.f32.gmra.mrb[10].mxu0 %vm246_vm2, %v428_v41 }
  0xe5   : > { %v405_v44 = vpop.f32.mrb[0].mxu1 }
  0xe6   : > { %v882_v46 = vpop.f32.mrb[1].mxu1 }
  0xe8   : > { %v319_v45 = vpop.f32.mrb[0].mxu0 }
  0xe9   : > { %v406_v47 = vadd.f32 %v405_v44, %v319_v45  ;;  %v865_v48 = vpop.f32.mrb[1].mxu0 }
  0xea   : > { %v410_v49 = vpop.f32.mrb[2].mxu1 }
  0xeb   : > { %v885_v51 = vpop.f32.mrb[3].mxu1 }
  0xec   : > { %v324_v50 = vpop.f32.mrb[2].mxu0 }
  0xed   : > { %v411_v52 = vadd.f32 %v410_v49, %v324_v50  ;;  %v868_v53 = vpop.f32.mrb[3].mxu0 }
  0xee   : > { %v415_v54 = vpop.f32.mrb[4].mxu1 }
  0xef   : > { %v888_v56 = vpop.f32.mrb[5].mxu1 }
  0xf0   : > { %v329_v55 = vpop.f32.mrb[4].mxu0 }
  0xf1   : > { %v416_v57 = vadd.f32 %v415_v54, %v329_v55  ;;  %v871_v58 = vpop.f32.mrb[5].mxu0 }
  0xf2   : > { %v602_v59 = vpop.f32.mrb[6].mxu1 }
  0xf3   : > { %v916_v61 = vpop.f32.mrb[7].mxu1 }
  0xf4   : > { %v502_v60 = vpop.f32.mrb[6].mxu0 }
  0xf5   : > { %v516_v62 = vadd.f32 %v502_v60, %v406_v47  ;;  %v899_v63 = vpop.f32.mrb[7].mxu0 }
  0xf6   : > { %v607_v2 = vpop.f32.mrb[8].mxu1 }
  0xf7   : > { %v616_v1 = vadd.f32 %v602_v59, %v516_v62  ;;  %v919_v4 = vpop.f32.mrb[9].mxu1 }
  0xf8   : > { %v507_v3 = vpop.f32.mrb[8].mxu0 }
  0xf9   : > { %v626_v5 = vadd.f32 %v822_v0, %v616_v1  ;;  %v517_v6 = vadd.f32 %v507_v3, %v411_v52  ;;  %v902_v7 = vpop.f32.mrb[9].mxu0 }
  0xfa   : > { %v612_v10 = vpop.f32.mrb[10].mxu1 }
  0xfb   : > { %v629_v8 = vmul.f32 %v626_v5, %v626_v5  ;;  %v617_v9 = vadd.f32 %v607_v2, %v517_v6  ;;  %v922_v12 = vpop.f32.mrb[11].mxu1 }
  0xfc   : > { %v512_v11 = vpop.f32.mrb[10].mxu0 }
  0xfd   : > { %v632_v13 = vmul.f32 %v629_v8, %v626_v5  ;;  %v627_v14 = vadd.f32 %v822_v0, %v617_v9  ;;  %v518_v15 = vadd.f32 %v512_v11, %v416_v57  ;;  %v905_v16 = vpop.f32.mrb[11].mxu0 }
  0xfe   : > { %v823_v16 = vld [vmem:[%s1164_s3] ss:$0 sm:$0xff] }
  0xff   : > { %v635_v17 = vmul.f32 0.044715, %v632_v13  ;;  %v630_v20 = vmul.f32 %v627_v14, %v627_v14  ;;  %v618_v22 = vadd.f32 %v612_v10, %v518_v15 }
 0x101   : > { %v633_v23 = vmul.f32 %v630_v20, %v627_v14  ;;  %v628_v24 = vadd.f32 %v822_v0, %v618_v22  ;;  %v638_v25 = vadd.f32 %v635_v17, %v626_v5  ;;  %v824_v20 = vld [vmem:[%s1165_s4] ss:$0 sm:$0xff] }
 0x103   : > { %v636_v26 = vmul.f32 0.044715, %v633_v23  ;;  %v631_v27 = vmul.f32 %v628_v24, %v628_v24  ;;  %v641_v28 = vmul.f32 0.7978846, %v638_v25 }
 0x105   : > { %v639_v29 = vadd.f32 %v636_v26, %v627_v14  ;;  %v634_v30 = vmul.f32 %v631_v27, %v628_v24  ;;  %959 = vtanh.f32 %v641_v28 }
 0x107   : > { %v642_v31 = vmul.f32 0.7978846, %v639_v29  ;;  %v637_v32 = vmul.f32 0.044715, %v634_v30 }
 0x109   : > { %961 = vtanh.f32 %v642_v31  ;;  %v640_v33 = vadd.f32 %v637_v32, %v628_v24 }
 0x10b   : > { %v643_v34 = vmul.f32 0.7978846, %v640_v33 }
 0x10d   : > { %963 = vtanh.f32 %v643_v34 }
 0x10f   : > { %v960_v35 = vpop.eup %959 }
 0x110   : > { %v647_v36 = vadd.f32 1.0, %v960_v35 }
 0x112   : > { %v650_v37 = vmul.f32 0.5, %v647_v36 }
 0x113   : > { %v962_v38 = vpop.eup %961 }
 0x114   : > { %v653_v39 = vmul.f32 %v650_v37, %v626_v5  ;;  %v648_v40 = vadd.f32 1.0, %v962_v38 }
 0x116   : > { %v660_v41 = vrot.slane %v653_v39, 6  ;;  %v651_v42 = vmul.f32 0.5, %v648_v40 }
 0x117   : > { %v964_v43 = vpop.eup %963 }
 0x118   : > { %v668_v44 = vadd.f32 %v660_v41, %v1068_v18  ;;  %v654_v45 = vmul.f32 %v651_v42, %v627_v14  ;;  %v649_v46 = vadd.f32 1.0, %v964_v43 }
 0x11a   : > { %v674_v47 = vsel %vm673_vm5, %v668_v44, 0.0  ;;  %v661_v48 = vrot.slane %v654_v45, 6  ;;  %v652_v49 = vmul.f32 0.5, %v649_v46 }
 0x11b   : > { %675 = vadd.xlane.f32.xlu0 %v674_v47 }
 0x11c   : > { %v662_v50 = vsel %vm659_vm6, %v660_v41, %v661_v48  ;;  %v655_v51 = vmul.f32 %v652_v49, %v628_v24 }
 0x11d   : > { %v669_v52 = vadd.f32 %v662_v50, %v1070_v19 }
 0x11e   : > { %v663_v53 = vrot.slane %v655_v51, 6 }
 0x11f   : > { %v677_v54 = vsel %vm246_vm2, %v669_v52, 0.0 }
 0x120   : > { %678 = vadd.xlane.f32.xlu0 %v677_v54  ;;  %v664_v55 = vsel %vm659_vm6, %v661_v48, %v663_v53 }
 0x121   : > { %v670_v18 = vadd.f32 %v664_v55, %v1072_v21 }
 0x123   : > { %v681_v56 = vsel %vm680_vm7, %v670_v18, 0.0 }
 0x124   : > { %682 = vadd.xlane.f32.xlu1 %v681_v56 }
 0x1a8   : > { %v676_v57 = vpop.xlane.xlu0 %675 }
 0x1a9   : > { %v685_v58 = vmul.f32 0.03125, %v676_v57 }
 0x1ab   : > { %v688_v59 = vsub.f32 %v668_v44, %v685_v58 }
 0x1ad   : > { %v679_v60 = vpop.xlane.xlu0 %678  ;;  %v691_v61 = vmul.f32 %v688_v59, %v688_v59 }
 0x1ae   : > { %v686_v62 = vmul.f32 0.03125, %v679_v60 }
 0x1af   : > { %v694_v63 = vsel %vm673_vm5, %v691_v61, 0.0 }
 0x1b0   : > { %v689_v19 = vsub.f32 %v669_v52, %v686_v62  ;;  %695 = vadd.xlane.f32.xlu1 %v694_v63 }
 0x1b1   : > { %v683_v0 = vpop.xlane.xlu1 %682 }
 0x1b2   : > { %v687_v1 = vmul.f32 0.03125, %v683_v0  ;;  %v692_v2 = vmul.f32 %v689_v19, %v689_v19 }
 0x1b4   : > { %v690_v3 = vsub.f32 %v670_v18, %v687_v1  ;;  %v697_v4 = vsel %vm246_vm2, %v692_v2, 0.0 }
 0x1b5   : > { %698 = vadd.xlane.f32.xlu0 %v697_v4 }
 0x1b6   : > { %v693_v21 = vmul.f32 %v690_v3, %v690_v3 }
 0x1b8   : > { %v700_v5 = vsel %vm680_vm7, %v693_v21, 0.0 }
 0x1b9   : > { %701 = vadd.xlane.f32.xlu1 %v700_v5 }
 0x23d   : > { %v696_v6 = vpop.xlane.xlu1 %695 }
 0x23e   : > { %v703_v7 = vmul.f32 0.03125, %v696_v6 }
 0x240   : > { %v706_v8 = vadd.f32 1e-05, %v703_v7 }
 0x242   : > { %965 = vrsqrt.f32 %v706_v8  ;;  %v699_v9 = vpop.xlane.xlu0 %698 }
 0x243   : > { %v704_v10 = vmul.f32 0.03125, %v699_v9 }
 0x245   : > { %v707_v11 = vadd.f32 1e-05, %v704_v10 }
 0x246   : > { %v702_v12 = vpop.xlane.xlu1 %701 }
 0x247   : > { %967 = vrsqrt.f32 %v707_v11  ;;  %v705_v13 = vmul.f32 0.03125, %v702_v12 }
 0x249   : > { %v708_v14 = vadd.f32 1e-05, %v705_v13 }
 0x24b   : > { %969 = vrsqrt.f32 %v708_v14 }
 0x24c   : > { %v966_v15 = vpop.eup %965 }
 0x24d   : > { %v712_v17 = vmul.f32 %v966_v15, %v688_v59 }
 0x24f   : > { %v721_v22 = vmul.f32 %v823_v16, %v712_v17 }
 0x251   : > { %v968_v23 = vpop.eup %967  ;;  %v730_v24 = vadd.f32 %v824_v20, %v721_v22 }
 0x252   : > { %v713_v25 = vmul.f32 %v968_v23, %v689_v19 }
 0x253   : > { %733 = vst.msk [vmem:[%s224_s17 - $0x2] sm:$0xfc] %vm673_vm5, %v730_v24 }
 0x254   : > { %v722_v26 = vmul.f32 %v823_v16, %v713_v25 }
 0x255   : > { %v970_v27 = vpop.eup %969 }
 0x256   : > { %v731_v28 = vadd.f32 %v824_v20, %v722_v26  ;;  %v714_v29 = vmul.f32 %v970_v27, %v690_v3 }
 0x258   : > { %734 = vst.msk [vmem:[%s224_s17 + $0x6] sm:$0xff] %vm246_vm2, %v731_v28  ;;  %v723_v30 = vmul.f32 %v823_v16, %v714_v29 }
 0x25a   : > { %v732_v31 = vadd.f32 %v824_v20, %v723_v30 }
 0x25c   : > { %735 = vst.msk [vmem:[%s224_s17 + $0xe] sm:$0x1f] %vm680_vm7, %v732_v31 }
 0x25d PF: > { %s15_s18 = sadd.s32 1, %s977_s18  }
 0x25e   : > { %p12_p4 = scmp.ge.s32.totalorder %s15_s18, 4  }
 0x260   :  { %14 = sbr.rel (!%p12_p4) target bundleno = 1 (0x1), region = 73 }

// kernel: hubert_forward.8
= control target key start
LH: loop header
LB: loop body
LE: loop exit
PB: predicated region body
PF: predicated region fallthrough
CT: control target
= control target key end

     0   :  { %s734_s21 = smov 0   ;;  %s811_s0 = inlined_call_operand.vmem [shape: f32[2,19,32], index: 0, kind: input, shape index: {}]   ;;  %s812_s1 = inlined_call_operand.vmem [shape: f32[1,32,16], index: 1, kind: input, shape index: {}]   ;;  %s813_s2 = inlined_call_operand.vmem [shape: f32[1,16], index: 2, kind: input, shape index: {}]   ;;  %s814_s3 = inlined_call_operand.vmem [shape: f32[1,16], index: 3, kind: input, shape index: {}]   ;;  %s815_s4 = inlined_call_operand.vmem [shape: f32[16,32], index: 4, kind: input, shape index: {}]   ;;  %s816_s5 = inlined_call_operand.vmem [shape: f32[1,32], index: 5, kind: input, shape index: {}]   ;;  %s817_s6 = inlined_call_operand.vmem [shape: f32[2,19,32], index: 6, kind: output, shape index: {}]  }
   0x1 LB: > { %s595_s22 = sadd.s32 4294967295, %s694_s21   ;;  %p599_p0 = scmp.ge.s32.totalorder %s694_s21, 1  ;;  %s694_s21 = sphi %s734_s21, %s16_s21  }
   0x2   : > { %p212_p1 = scmp.lt.s32.totalorder %s694_s21, 3 }
   0x4   : > { %p213_p2 = pnand %p599_p0, %p212_p1 }
   0x5   : > { %v255_v0 = vld [vmem:[%s812_s1] sm:$0xff] (!%p213_p2)  ;;  %v256_v1 = vld [vmem:[%s812_s1 + $0x8] sm:$0xff] (!%p213_p2)  ;;  %v257_v2 = vld [vmem:[%s812_s1 + $0x10] sm:$0xff] (!%p213_p2)  ;;  %v696_v3 = vmov (!%p213_p2), 0.0|0.0   ;;  %vm697_vm0 = vmmov (!%p213_p2), 0   ;;  %v698_v6 = vmov (!%p213_p2), 0.0  }
   0x6   : > { %216 = sbr.rel (%p213_p2) target bundleno = 793 (0x319), region = 44  ;;  %655 = vmatprep.subr.bf16.mxu0 (!%p213_p2), %v696_v3  ;;  %v656_v4 = vpack.c.bf16 (!%p213_p2), %v256_v1, %v255_v0  ;;  %v258_v5 = vld [vmem:[%s812_s1 + $0x18] sm:$0xff] (!%p213_p2)  ;;  %633 = vmatprep.mubr.msk.f32.mxu0 (!%p213_p2), %vm697_vm0, %v698_v6  ;;  %p242_p3 = scmp.lt.s32.totalorder (!%p213_p2), %s595_s22, 1  ;;  %vm259_vm1 = vcmask (!%p213_p2), 261120   ;;  %vm378_vm2 = vcmask (!%p213_p2), 130048   ;;  %vm385_vm3 = vcmask (!%p213_p2), 124928  }
   0x7   : > { %661 = vmatprep.subr.bf16.mxu1 (!%p213_p2), %v696_v3  ;;  %646 = vmatprep.mubr.msk.f32.mxu1 (!%p213_p2), %vm697_vm0, %v698_v6  ;;  %v659_v7 = vpack.c.bf16 (!%p213_p2), %v258_v5, %v257_v2  ;;  %v438_v62 = vld [vmem:[%s815_s4] sm:$0xff] (!%p213_p2)  ;;  %v439_v63 = vld [vmem:[%s815_s4 + $0x8] sm:$0xff] (!%p213_p2)  ;;  %vm538_vm4 = vcmask (!%p213_p2), 256000  }
   0x8   : > { %657 = vmatpush3.bf16.msra.mxu0 (!%p213_p2), %v656_v4  ;;  %v662_v0 = vpack.c.bf16 (!%p213_p2), %v439_v63, %v438_v62 }
   0x9   : > { %658 = vmatprep.subr.bf16.mxu0 (!%p213_p2), %v696_v3 }
   0xa   : > { %663 = vmatpush3.bf16.msra.mxu1 (!%p213_p2), %v662_v0 }
   0xc   : > { %660 = vmatpush3.bf16.msra.mxu0 (!%p213_p2), %v659_v7 }
   0xd   : > { %s819_s22 = smov (!%p242_p3, %s595_s22), 1 }
   0xe   : > { %s664_s7 = smul.u32 24, %s819_s22 }
  0x10   : > { %s246_s10 = scalar_lea.vmem %s811_s0, %s664_s7  ;;  %s251_s25 = scalar_lea.vmem %s817_s6, %s664_s7 }
  0x11   : > { %v252_v8 = vld [vmem:[%s246_s10] sm:$0xff]  ;;  %v253_v9 = vld [vmem:[%s246_s10 + $0x8] sm:$0xff]  ;;  %v254_v10 = vld [vmem:[%s246_s10 + $0x10] sm:$0x7] }
  0x12   : > { %634 = vmatmul.mubr.msk.f32.vlgmr.msra.gmra.mrb[0].mxu0 %vm259_vm1, %v252_v8 }
  0x13   : > { %636 = vmatprep.mubr.msk.f32.mxu0 %vm697_vm0, %v698_v6 }
  0x16   : > { %637 = vmatmul.mubr.msk.f32.gmra.mrb[2].mxu0 %vm259_vm1, %v253_v9 }
  0x17   : > { %639 = vmatprep.mubr.msk.f32.mxu0 %vm697_vm0, %v698_v6 }
  0x1a   : > { %640 = vmatmul.mubr.msk.f32.gmra.mrb[4].mxu0 %vm259_vm1, %v254_v10 }
  0xe5   : > { %v335_v11 = vpop.f32.mrb[0].mxu0 }
  0xe6   : > { %v349_v12 = vmul.f32 %v335_v11, %v335_v11  ;;  %v635_v13 = vpop.f32.mrb[1].mxu0 }
  0xe8   : > { %v352_v14 = vmul.f32 %v349_v12, %v335_v11  ;;  %v605_v12 = vld [vmem:[%s813_s2] ss:$0 sm:$0xff] }
  0xe9   : > { %v340_v15 = vpop.f32.mrb[2].mxu0 }
  0xea   : > { %v355_v16 = vmul.f32 0.044715, %v352_v14  ;;  %v350_v17 = vmul.f32 %v340_v15, %v340_v15  ;;  %v638_v18 = vpop.f32.mrb[3].mxu0  ;;  %v606_v14 = vld [vmem:[%s814_s3] ss:$0 sm:$0xff] }
  0xec   : > { %v358_v19 = vadd.f32 %v355_v16, %v335_v11  ;;  %v353_v20 = vmul.f32 %v350_v17, %v340_v15 }
  0xed   : > { %v345_v21 = vpop.f32.mrb[4].mxu0 }
  0xee   : > { %v361_v22 = vmul.f32 0.7978846, %v358_v19  ;;  %v356_v23 = vmul.f32 0.044715, %v353_v20  ;;  %v351_v24 = vmul.f32 %v345_v21, %v345_v21  ;;  %v641_v25 = vpop.f32.mrb[5].mxu0 }
  0xef   : > { %v607_v25 = vld [vmem:[%s816_s5] ss:$0 sm:$0xff] }
  0xf0   : > { %676 = vtanh.f32 %v361_v22  ;;  %v359_v26 = vadd.f32 %v356_v23, %v340_v15  ;;  %v354_v27 = vmul.f32 %v351_v24, %v345_v21 }
  0xf2   : > { %v362_v28 = vmul.f32 0.7978846, %v359_v26  ;;  %v357_v29 = vmul.f32 0.044715, %v354_v27 }
  0xf4   : > { %678 = vtanh.f32 %v362_v28  ;;  %v360_v30 = vadd.f32 %v357_v29, %v345_v21 }
  0xf6   : > { %v363_v31 = vmul.f32 0.7978846, %v360_v30 }
  0xf8   : > { %680 = vtanh.f32 %v363_v31 }
  0xfa   : > { %v677_v32 = vpop.eup %676 }
  0xfb   : > { %v367_v33 = vadd.f32 1.0, %v677_v32 }
  0xfd   : > { %v370_v34 = vmul.f32 0.5, %v367_v33 }
  0xfe   : > { %v679_v35 = vpop.eup %678 }
  0xff   : > { %v373_v36 = vmul.f32 %v370_v34, %v335_v11  ;;  %v368_v37 = vadd.f32 1.0, %v679_v35 }
 0x101   : > { %v379_v38 = vsel %vm378_vm2, %v373_v36, 0.0  ;;  %v371_v39 = vmul.f32 0.5, %v368_v37 }
 0x102   : > { %v681_v40 = vpop.eup %680  ;;  %380 = vadd.xlane.f32.xlu0 %v379_v38 }
 0x103   : > { %v374_v41 = vmul.f32 %v371_v39, %v340_v15  ;;  %v369_v42 = vadd.f32 1.0, %v681_v40 }
 0x105   : > { %v382_v43 = vsel %vm378_vm2, %v374_v41, 0.0  ;;  %v372_v44 = vmul.f32 0.5, %v369_v42 }
 0x106   : > { %383 = vadd.xlane.f32.xlu0 %v382_v43 }
 0x107   : > { %v375_v45 = vmul.f32 %v372_v44, %v345_v21 }
 0x109   : > { %v386_v46 = vsel %vm385_vm3, %v375_v45, 0.0 }
 0x10a   : > { %387 = vadd.xlane.f32.xlu1 %v386_v46 }
 0x18f   : > { %v381_v47 = vpop.xlane.xlu0 %380 }
 0x190   : > { %v390_v48 = vmul.f32 0.0625, %v381_v47 }
 0x192   : > { %v393_v49 = vsub.f32 %v373_v36, %v390_v48 }
 0x193   : > { %v384_v50 = vpop.xlane.xlu0 %383 }
 0x194   : > { %v391_v51 = vmul.f32 0.0625, %v384_v50  ;;  %v396_v52 = vmul.f32 %v393_v49, %v393_v49 }
 0x196   : > { %v394_v53 = vsub.f32 %v374_v41, %v391_v51  ;;  %v399_v54 = vsel %vm378_vm2, %v396_v52, 0.0 }
 0x197   : > { %400 = vadd.xlane.f32.xlu1 %v399_v54  ;;  %v388_v55 = vpop.xlane.xlu1 %387 }
 0x198   : > { %v392_v56 = vmul.f32 0.0625, %v388_v55  ;;  %v397_v57 = vmul.f32 %v394_v53, %v394_v53 }
 0x19a   : > { %v395_v58 = vsub.f32 %v375_v45, %v392_v56  ;;  %v402_v59 = vsel %vm378_vm2, %v397_v57, 0.0 }
 0x19b   : > { %403 = vadd.xlane.f32.xlu0 %v402_v59 }
 0x19c   : > { %v398_v60 = vmul.f32 %v395_v58, %v395_v58 }
 0x19e   : > { %v405_v61 = vsel %vm385_vm3, %v398_v60, 0.0 }
 0x19f   : > { %406 = vadd.xlane.f32.xlu1 %v405_v61 }
 0x224   : > { %v401_v1 = vpop.xlane.xlu1 %400 }
 0x225   : > { %v408_v2 = vmul.f32 0.0625, %v401_v1 }
 0x227   : > { %v411_v3 = vadd.f32 1e-05, %v408_v2 }
 0x228   : > { %v404_v4 = vpop.xlane.xlu0 %403 }
 0x229   : > { %682 = vrsqrt.f32 %v411_v3  ;;  %v409_v5 = vmul.f32 0.0625, %v404_v4 }
 0x22b   : > { %v412_v7 = vadd.f32 1e-05, %v409_v5 }
 0x22c   : > { %v407_v8 = vpop.xlane.xlu1 %406 }
 0x22d   : > { %684 = vrsqrt.f32 %v412_v7  ;;  %v410_v9 = vmul.f32 0.0625, %v407_v8 }
 0x22f   : > { %v413_v10 = vadd.f32 1e-05, %v410_v9 }
 0x231   : > { %686 = vrsqrt.f32 %v413_v10 }
 0x233   : > { %v683_v11 = vpop.eup %682 }
 0x234   : > { %v417_v13 = vmul.f32 %v683_v11, %v393_v49 }
 0x236   : > { %v426_v15 = vmul.f32 %v605_v12, %v417_v13 }
 0x237   : > { %v685_v16 = vpop.eup %684 }
 0x238   : > { %v435_v17 = vadd.f32 %v606_v14, %v426_v15  ;;  %v418_v18 = vmul.f32 %v685_v16, %v394_v53 }
 0x23a   : > { %647 = vmatmul.mubr.msk.f32.vlgmr.msra.gmra.mrb[0].mxu1 %vm378_vm2, %v435_v17  ;;  %v427_v19 = vmul.f32 %v605_v12, %v418_v18 }
 0x23b   : > { %v687_v20 = vpop.eup %686  ;;  %649 = vmatprep.mubr.msk.f32.mxu1 %vm697_vm0, %v698_v6 }
 0x23c   : > { %v436_v21 = vadd.f32 %v606_v14, %v427_v19  ;;  %v419_v22 = vmul.f32 %v687_v20, %v395_v58 }
 0x23e   : > { %650 = vmatmul.mubr.msk.f32.gmra.mrb[2].mxu1 %vm378_vm2, %v436_v21  ;;  %v428_v23 = vmul.f32 %v605_v12, %v419_v22 }
 0x23f   : > { %652 = vmatprep.mubr.msk.f32.mxu1 %vm697_vm0, %v698_v6 }
 0x240   : > { %v437_v24 = vadd.f32 %v606_v14, %v428_v23 }
 0x242   : > { %653 = vmatmul.mubr.msk.f32.gmra.mrb[4].mxu1 %vm378_vm2, %v437_v24 }
 0x30d   : > { %v522_v26 = vpop.f32.mrb[0].mxu1 }
 0x30e   : > { %v523_v27 = vadd.f32 %v607_v25, %v522_v26  ;;  %v648_v28 = vpop.f32.mrb[1].mxu1 }
 0x310   : > { %536 = vst.msk [vmem:[%s251_s25] sm:$0xff] %vm259_vm1, %v523_v27 }
 0x311   : > { %v527_v29 = vpop.f32.mrb[2].mxu1 }
 0x312   : > { %v528_v30 = vadd.f32 %v607_v25, %v527_v29  ;;  %v651_v6 = vpop.f32.mrb[3].mxu1 }
 0x314   : > { %537 = vst.msk [vmem:[%s251_s25 + $0x8] sm:$0xff] %vm259_vm1, %v528_v30 }
 0x315   : > { %v532_v31 = vpop.f32.mrb[4].mxu1 }
 0x316   : > { %v533_v32 = vadd.f32 %v607_v25, %v532_v31  ;;  %v654_v33 = vpop.f32.mrb[5].mxu1 }
 0x318   : > { %539 = vst.msk [vmem:[%s251_s25 + $0x10] sm:$0x7] %vm538_vm4, %v533_v32 }
 0x319 PF: > { %s16_s21 = sadd.s32 1, %s694_s21  }
 0x31a   : > { %p13_p4 = scmp.ge.s32.totalorder %s16_s21, 4  }
 0x31c   :  { %15 = sbr.rel (!%p13_p4) target bundleno = 1 (0x1), region = 74 }

// kernel: hubert_forward.10
= control target key start
LH: loop header
LB: loop body
LE: loop exit
PB: predicated region body
PF: predicated region fallthrough
CT: control target
= control target key end

     0   :  { %s2955_s25 = smov 0   ;;  %s3375_s0 = inlined_call_operand.vmem [shape: f32[2,19,32], index: 0, kind: input, shape index: {}]   ;;  %s3376_s1 = inlined_call_operand.vmem [shape: f32[32,96], index: 1, kind: input, shape index: {}]   ;;  %s3377_s2 = inlined_call_operand.vmem [shape: f32[1,96], index: 2, kind: input, shape index: {}]   ;;  %s3378_s3 = inlined_call_operand.vmem [shape: f32[32,32], index: 3, kind: input, shape index: {}]   ;;  %s3379_s4 = inlined_call_operand.vmem [shape: f32[1,32], index: 4, kind: input, shape index: {}]   ;;  %s3380_s5 = inlined_call_operand.vmem [shape: f32[1,32], index: 5, kind: input, shape index: {}]   ;;  %s3381_s6 = inlined_call_operand.vmem [shape: f32[1,32], index: 6, kind: input, shape index: {}]   ;;  %s3382_s7 = inlined_call_operand.vmem [shape: f32[32,64], index: 7, kind: input, shape index: {}]   ;;  %s3383_s8 = inlined_call_operand.vmem [shape: f32[1,64], index: 8, kind: input, shape index: {}]   ;;  %s3384_s9 = inlined_call_operand.vmem [shape: f32[64,32], index: 9, kind: input, shape index: {}]   ;;  %s3385_s10 = inlined_call_operand.vmem [shape: f32[1,32], index: 10, kind: input, shape index: {}]   ;;  %s3386_s11 = inlined_call_operand.vmem [shape: f32[1,32], index: 11, kind: input, shape index: {}]   ;;  %s3387_s12 = inlined_call_operand.vmem [shape: f32[1,32], index: 12, kind: input, shape index: {}]   ;;  %s3388_s13 = inlined_call_operand.vmem [shape: f32[2,19,32], index: 13, kind: output, shape index: {}]  }
   0x1 LB: > { %s2288_s26 = sadd.s32 4294967295, %s2869_s25   ;;  %p2292_p0 = scmp.ge.s32.totalorder %s2869_s25, 1  ;;  %s2869_s25 = sphi %s2955_s25, %s23_s25  }
   0x2   : > { %p387_p1 = scmp.lt.s32.totalorder %s2869_s25, 3 }
   0x4   : > { %p388_p2 = pnand %p2292_p0, %p387_p1 }
   0x5   : > { %v444_v0 = vld [vmem:[%s3376_s1] sm:$0xff] (!%p388_p2)  ;;  %v445_v1 = vld [vmem:[%s3376_s1 + $0x8] sm:$0xff] (!%p388_p2)  ;;  %v446_v2 = vld [vmem:[%s3376_s1 + $0x10] sm:$0xff] (!%p388_p2)  ;;  %v2871_v3 = vmov (!%p388_p2), 0.0|0.0   ;;  %vm2872_vm0 = vmmov (!%p388_p2), 0   ;;  %v2873_v6 = vmov (!%p388_p2), 0.0  }
   0x6   : > { %391 = sbr.rel (%p388_p2) target bundleno = 3777 (0xec1), region = 72  ;;  %2678 = vmatprep.subr.bf16.mxu1 (!%p388_p2), %v2871_v3  ;;  %v2679_v4 = vpack.c.bf16 (!%p388_p2), %v445_v1, %v444_v0  ;;  %v447_v5 = vld [vmem:[%s3376_s1 + $0x18] sm:$0xff] (!%p388_p2)  ;;  %2463 = vmatprep.mubr.msk.f32.mxu1 (!%p388_p2), %vm2872_vm0, %v2873_v6  ;;  %p431_p3 = scmp.lt.s32.totalorder (!%p388_p2), %s2288_s26, 1  ;;  %vm455_vm1 = vcmask (!%p388_p2), 261120   ;;  %v2295_v13 = vld [vmem:[%s3377_s2] ss:$0 sm:$0xff] (!%p388_p2) }
   0x7   : > { %2688 = vmatprep.subr.bf16.mxu0 (!%p388_p2), %v2871_v3  ;;  %2493 = vmatprep.mubr.msk.f32.mxu0 (!%p388_p2), %vm2872_vm0, %v2873_v6  ;;  %v2682_v7 = vpack.c.bf16 (!%p388_p2), %v447_v5, %v446_v2  ;;  %s2874_s24 = smov (!%p388_p2), 88   ;;  %s2875_s27 = smov (!%p388_p2), 96   ;;  %vm557_vm2 = vcmask (!%p388_p2), 64512   ;;  %vm653_vm4 = vcmask (!%p388_p2), 154624   ;;  %vm660_vm5 = vcmask (!%p388_p2), 149504  }
   0x8   : > { %2680 = vmatpush3.bf16.msra.mxu1 (!%p388_p2), %v2679_v4  ;;  %s2876_s28 = smov (!%p388_p2), 120   ;;  %vm3032_vm3 = vmpackc.low (!%p388_p2), %vm557_vm2, %vm557_vm2  ;;  %s2877_s29 = smov (!%p388_p2), 64   ;;  %vm705_vm6 = vcmask (!%p388_p2), 1042432   ;;  %vm1883_vm7 = vcmask (!%p388_p2), 256000   ;;  %vm2078_vm8 = vcmask (!%p388_p2), 523264  }
   0x9   : > { %2681 = vmatprep.subr.bf16.mxu1 (!%p388_p2), %v2871_v3  ;;  %s2878_s30 = smov (!%p388_p2), 56   ;;  %s2879_s14 = smov (!%p388_p2), 80  }
   0xa   : > { %s2880_s15 = smov (!%p388_p2), 112   ;;  %s2882_s22 = smov (!%p388_p2), 72  }
   0xb   : > { %s2883_s23 = smov (!%p388_p2), 104  }
   0xc   : > { %2683 = vmatpush3.bf16.msra.mxu1 (!%p388_p2), %v2682_v7 }
   0xd   : > { %s3392_s26 = smov (!%p431_p3, %s2288_s26), 1  ;;  %2684 = vmatprep.subr.bf16.mxu1 %v2871_v3 }
   0xe   : > { %s2734_s18 = smul.u32 24, %s3392_s26 }
  0x10   : > { %s435_s21 = scalar_lea.vmem %s3375_s0, %s2734_s18 }
  0x11   : > { %v2990_v8 = vld [vmem:[%s435_s21] sm:$0xff]  ;;  %v2997_v9 = vld [vmem:[%s435_s21 + $0x8] sm:$0xff]  ;;  %v3003_v10 = vld [vmem:[%s435_s21 + $0x10] sm:$0x7]  ;;  %s2881_s21 = smov 48  }
  0x12   : > { %2464 = vmatmul.mubr.msk.f32.vlgmr.msra.gmra.mrb[0].mxu1 %vm455_vm1, %v2990_v8 }
  0x13   : > { %2466 = vmatprep.mubr.msk.f32.mxu1 %vm2872_vm0, %v2873_v6 }
  0x16   : > { %2467 = vmatmul.mubr.msk.f32.gmra.mrb[2].mxu1 %vm455_vm1, %v2997_v9 }
  0x17   : > { %2469 = vmatprep.mubr.msk.f32.mxu1 %vm2872_vm0, %v2873_v6 }
  0x1a   : > { %2470 = vmatmul.mubr.msk.f32.gmra.mrb[4].mxu1 %vm455_vm1, %v3003_v10 }
  0x1b   : > { %2478 = vmatprep.mubr.msk.f32.mxu1 %vm2872_vm0, %v2873_v6 }
  0xe5   : > { %v531_v11 = vpop.f32.mrb[0].mxu1 }
  0xe6   : > { %v2465_v12 = vpop.f32.mrb[1].mxu1  ;;  %v532_v15 = vadd.f32 %v2295_v13, %v531_v11 }
  0xe8   : > { %v3022_v23 = vmul.f32 0.35355338, %v532_v15 }
  0xe9   : > { %v536_v14 = vpop.f32.mrb[2].mxu1 }
  0xea   : > { %v537_v16 = vadd.f32 %v2295_v13, %v536_v14  ;;  %v2468_v17 = vpop.f32.mrb[3].mxu1 }
  0xec   : > { %v3012_v18 = vpack.i.bf16 %v537_v16, %v532_v15  ;;  %v3020_v22 = vmul.f32 0.35355338, %v537_v16 }
  0xed   : > { %v541_v19 = vpop.f32.mrb[4].mxu1 }
  0xee   : > { %2763 = vrot.lane.b32.xlu1 %v3012_v18, %s2874_s24  ;;  %2758 = vrot.lane.b32.xlu0 %v3012_v18, %s2875_s27  ;;  %v3016_v20 = vadd.f32 %v2295_v13, %v541_v19  ;;  %v2471_v21 = vpop.f32.mrb[5].mxu1 }
  0xf0   : > { %v3027_v24 = vmul.f32 0.35355338, %v3016_v20 }
  0xf2   : > { %799 = vrot.lane.b32.xlu1 %v3016_v20, %s2874_s24  ;;  %555 = vrot.lane.b32.xlu0 %v3016_v20, %s2875_s27 }
  0xf6   : > { %791 = vrot.lane.b32.xlu1 %v3020_v22, %s2876_s28  ;;  %789 = vrot.lane.b32.xlu0 %v3022_v23, %s2876_s28 }
  0xfa   : > { %793 = vrot.lane.b32.xlu0 %v3027_v24, %s2876_s28  ;;  %s2884_s28 = smov 40  }
 0x160   : > { %v2759_v25 = vpop.permute.xlu0 %2758  ;;  %v2764_v30 = vpop.permute.xlu1 %2763 }
 0x161   : > { %v2761_v26 = vunpack.i.h.bf16 %v2759_v25  ;;  %v2760_v27 = vunpack.i.l.bf16 %v2759_v25  ;;  %v2766_v31 = vunpack.i.h.bf16 %v2764_v30  ;;  %v2765_v32 = vunpack.i.l.bf16 %v2764_v30 }
 0x163   : > { %v2685_v29 = vpack.c.bf16 %v2761_v26, %v2760_v27  ;;  %v2692_v34 = vpack.c.bf16 %v2766_v31, %v2765_v32 }
 0x164   : > { %v556_v33 = vpop.permute.xlu0 %555  ;;  %v800_v35 = vpop.permute.xlu1 %799 }
 0x165   : > { %2687 = vmatpush3.bf16.xpose.msk.msra.mxu1 %vm3032_vm3, %v2685_v29 }
 0x166   : > { %2476 = vmatprep.subr.mxu1 %v2873_v6 }
 0x168   : > { %v790_v36 = vpop.permute.xlu0 %789  ;;  %v792_v37 = vpop.permute.xlu1 %791 }
 0x16c   : > { %v794_v38 = vpop.permute.xlu0 %793 }
 0x16d   : > { %2477 = vmatpush3.xpose.msk.msra.mxu1 %vm557_vm2, %v556_v33 }
 0x16e   : > { %2691 = vmatprep.subr.bf16.mxu1 %v2871_v3 }
 0x170   : > { %2479 = vmatmul.mubr.msk.f32.vlgmr.msra.gmra.mrb[6].mxu1 %vm557_vm2, %v3022_v23 }
 0x171   : > { %2694 = vmatpush3.bf16.xpose.msk.msra.mxu1 %vm3032_vm3, %v2692_v34  ;;  %2481 = vmatprep.mubr.msk.f32.mxu1 %vm2872_vm0, %v2873_v6 }
 0x172   : > { %2506 = vmatprep.subr.mxu1 %v2873_v6 }
 0x174   : > { %2482 = vmatmul.mubr.msk.f32.gmra.mrb[8].mxu1 %vm557_vm2, %v3020_v22 }
 0x175   : > { %2484 = vmatprep.mubr.msk.f32.mxu1 %vm2872_vm0, %v2873_v6 }
 0x178   : > { %2485 = vmatmul.mubr.msk.f32.gmra.mrb[10].mxu1 %vm557_vm2, %v3027_v24 }
 0x179   : > { %2507 = vmatpush3.xpose.msk.msra.mxu1 %vm557_vm2, %v800_v35  ;;  %2508 = vmatprep.mubr.msk.f32.mxu1 %vm2872_vm0, %v2873_v6 }
 0x17a   : > { %2532 = vmatprep.subr.mxu1 %v2873_v6 }
 0x17c   : > { %2509 = vmatmul.mubr.msk.f32.vlgmr.msra.gmra.mrb[12].mxu1 %vm557_vm2, %v790_v36 }
 0x17d   : > { %2511 = vmatprep.mubr.msk.f32.mxu1 %vm2872_vm0, %v2873_v6 }
 0x180   : > { %2512 = vmatmul.mubr.msk.f32.gmra.mrb[14].mxu1 %vm557_vm2, %v792_v37 }
 0x181   : > { %2514 = vmatprep.mubr.msk.f32.mxu1 %vm2872_vm0, %v2873_v6 }
 0x184   : > { %2515 = vmatmul.mubr.msk.f32.gmra.mrb[16].mxu1 %vm557_vm2, %v794_v38 }
 0x185   : > { %2534 = vmatprep.mubr.msk.f32.mxu1 %vm2872_vm0, %v2873_v6 }
 0x243   : > { %v639_v39 = vpop.f32.mrb[6].mxu1 }
 0x244   : > { %v2480_v40 = vpop.f32.mrb[7].mxu1  ;;  %v654_v41 = vsel %vm653_vm4, %v639_v39, -inf }
 0x245   : > { %655 = vmax.xlane.f32.xlu1 %v654_v41 }
 0x247   : > { %v644_v42 = vpop.f32.mrb[8].mxu1 }
 0x248   : > { %v2483_v43 = vpop.f32.mrb[9].mxu1  ;;  %v657_v44 = vsel %vm653_vm4, %v644_v42, -inf }
 0x249   : > { %658 = vmax.xlane.f32.xlu0 %v657_v44 }
 0x24b   : > { %v649_v45 = vpop.f32.mrb[10].mxu1 }
 0x24c   : > { %v2486_v46 = vpop.f32.mrb[11].mxu1  ;;  %v661_v47 = vsel %vm660_vm5, %v649_v45, -inf }
 0x24d   : > { %662 = vmax.xlane.f32.xlu0 %v661_v47 }
 0x24f   : > { %v879_v48 = vpop.f32.mrb[12].mxu1 }
 0x250   : > { %v2510_v49 = vpop.f32.mrb[13].mxu1  ;;  %v893_v50 = vsel %vm653_vm4, %v879_v48, -inf }
 0x251   : > { %894 = vmax.xlane.f32.xlu1 %v893_v50 }
 0x253   : > { %v884_v51 = vpop.f32.mrb[14].mxu1 }
 0x254   : > { %v2513_v52 = vpop.f32.mrb[15].mxu1  ;;  %v896_v53 = vsel %vm653_vm4, %v884_v51, -inf }
 0x255   : > { %897 = vmax.xlane.f32.xlu0 %v896_v53 }
 0x257   : > { %v889_v54 = vpop.f32.mrb[16].mxu1 }
 0x258   : > { %v2516_v55 = vpop.f32.mrb[17].mxu1  ;;  %v899_v56 = vsel %vm660_vm5, %v889_v54, -inf }
 0x259   : > { %900 = vmax.xlane.f32.xlu1 %v899_v56 }
 0x26a   : > { %2768 = vrot.lane.b32.xlu1 %v3012_v18, %s2877_s29 }
 0x2d2   : > { %v656_v57 = vpop.xlane.xlu1 %655 }
 0x2d3   : > { %v664_v58 = vsub.f32 %v639_v39, %v656_v57 }
 0x2d5   : > { %v667_v59 = vmul.f32 1.442695, %v664_v58 }
 0x2d6   : > { %v659_v60 = vpop.xlane.xlu0 %658 }
 0x2d7   : > { %2797 = vpow2.f32 %v667_v59  ;;  %v665_v61 = vsub.f32 %v644_v42, %v659_v60 }
 0x2d9   : > { %v669_v62 = vmul.f32 1.442695, %v665_v61 }
 0x2da   : > { %v663_v63 = vpop.xlane.xlu0 %662 }
 0x2db   : > { %2799 = vpow2.f32 %v669_v62  ;;  %v666_v0 = vsub.f32 %v649_v45, %v663_v63  ;;  %v788_v62 = vld [vmem:[%s3378_s3] sm:$0xff]  ;;  %v1025_v63 = vld [vmem:[%s3378_s3 + $0x8] sm:$0xff] }
 0x2dc   : > { %2533 = vmatpush3.msra.mxu1 %v1025_v63 }
 0x2dd   : > { %v671_v1 = vmul.f32 1.442695, %v666_v0  ;;  %2698 = vmatprep.subr.bf16.mxu1 %v2871_v3 }
 0x2de   : > { %v895_v2 = vpop.xlane.xlu1 %894 }
 0x2df   : > { %2801 = vpow2.f32 %v671_v1  ;;  %v902_v4 = vsub.f32 %v879_v48, %v895_v2 }
 0x2e1   : > { %v2798_v5 = vpop.eup %2797  ;;  %v905_v7 = vmul.f32 1.442695, %v902_v4 }
 0x2e2   : > { %v898_v11 = vpop.xlane.xlu0 %897  ;;  %v673_v12 = vsel %vm653_vm4, %v2798_v5, 0.0 }
 0x2e3   : > { %2803 = vpow2.f32 %v905_v7  ;;  %v903_v13 = vsub.f32 %v884_v51, %v898_v11  ;;  %674 = vadd.xlane.f32.xlu0 %v673_v12 }
 0x2e5   : > { %v3076_v14 = vpop.eup %2799  ;;  %v907_v15 = vmul.f32 1.442695, %v903_v13 }
 0x2e6   : > { %v901_v16 = vpop.xlane.xlu1 %900  ;;  %v676_v17 = vsel %vm653_vm4, %v3076_v14, 0.0 }
 0x2e7   : > { %2805 = vpow2.f32 %v907_v15  ;;  %v904_v19 = vsub.f32 %v889_v54, %v901_v16  ;;  %677 = vadd.xlane.f32.xlu1 %v676_v17 }
 0x2e9   : > { %v3080_v21 = vpop.eup %2801  ;;  %v909_v25 = vmul.f32 1.442695, %v904_v19 }
 0x2ea   : > { %v2769_v26 = vpop.permute.xlu1 %2768  ;;  %v679_v27 = vsel %vm660_vm5, %v3080_v21, 0.0 }
 0x2eb   : > { %2807 = vpow2.f32 %v909_v25  ;;  %v2771_v29 = vunpack.i.h.bf16 %v2769_v26  ;;  %v2770_v30 = vunpack.i.l.bf16 %v2769_v26  ;;  %680 = vadd.xlane.f32.xlu0 %v679_v27 }
 0x2ed   : > { %v2804_v31 = vpop.eup %2803  ;;  %v2689_v32 = vpack.c.bf16 %v2771_v29, %v2770_v30 }
 0x2ee   : > { %v911_v33 = vsel %vm653_vm4, %v2804_v31, 0.0 }
 0x2ef   : > { %912 = vadd.xlane.f32.xlu1 %v911_v33  ;;  %2690 = vmatpush3.bf16.msra.mxu0 %v2689_v32 }
 0x2f0   : > { %2491 = vmatprep.subr.mxu0 %v2873_v6 }
 0x2f1   : > { %v2806_v34 = vpop.eup %2805 }
 0x2f2   : > { %v914_v35 = vsel %vm653_vm4, %v2806_v34, 0.0 }
 0x2f3   : > { %915 = vadd.xlane.f32.xlu0 %v914_v35 }
 0x2f5   : > { %v2808_v36 = vpop.eup %2807 }
 0x2f6   : > { %v917_v37 = vsel %vm660_vm5, %v2808_v36, 0.0 }
 0x2f7   : > { %918 = vadd.xlane.f32.xlu0 %v917_v37 }
 0x300   : > { %2773 = vrot.lane.b32.xlu1 %v3012_v18, %s2878_s30 }
 0x304   : > { %930 = vrot.lane.b32.xlu1 %v3016_v20, %s2878_s30 }
 0x308   : > { %2778 = vrot.lane.b32.xlu1 %v3012_v18, %s2879_s14 }
 0x30c   : > { %1204 = vrot.lane.b32.xlu1 %v3022_v23, %s2880_s15 }
 0x30d   : > { %692 = vrot.lane.b32.xlu0 %v3016_v20, %s2877_s29  ;;  %s440_s29 = scalar_lea.vmem %s3388_s13, %s2734_s18 }
 0x310   : > { %1208 = vrot.lane.b32.xlu1 %v3027_v24, %s2880_s15 }
 0x311   : > { %1214 = vrot.lane.b32.xlu0 %v3016_v20, %s2879_s14 }
 0x315   : > { %1206 = vrot.lane.b32.xlu0 %v3020_v22, %s2880_s15 }
 0x370   : > { %v675_v38 = vpop.xlane.xlu0 %674 }
 0x371   : > { %2809 = vrcp.f32 %v675_v38 }
 0x374   : > { %v678_v39 = vpop.xlane.xlu1 %677 }
 0x375   : > { %2811 = vrcp.f32 %v678_v39 }
 0x378   : > { %v681_v40 = vpop.xlane.xlu0 %680 }
 0x379   : > { %2813 = vrcp.f32 %v681_v40 }
 0x37b   : > { %v2810_v45 = vpop.eup %2809 }
 0x37c   : > { %v913_v41 = vpop.xlane.xlu1 %912  ;;  %v685_v49 = vmul.f32 %v2810_v45, %v2798_v5 }
 0x37d   : > { %2815 = vrcp.f32 %v913_v41 }
 0x37f   : > { %v2812_v50 = vpop.eup %2811 }
 0x380   : > { %v916_v42 = vpop.xlane.xlu0 %915  ;;  %v2774_v43 = vpop.permute.xlu1 %2773  ;;  %v686_v52 = vmul.f32 %v2812_v50, %v3076_v14 }
 0x381   : > { %v2776_v46 = vunpack.i.h.bf16 %v2774_v43  ;;  %v2775_v47 = vunpack.i.l.bf16 %v2774_v43  ;;  %2817 = vrcp.f32 %v916_v42 }
 0x383   : > { %v2696_v51 = vpack.c.bf16 %v2776_v46, %v2775_v47  ;;  %v2814_v53 = vpop.eup %2813 }
 0x384   : > { %v919_v44 = vpop.xlane.xlu0 %918  ;;  %v931_v54 = vpop.permute.xlu1 %930  ;;  %v687_v55 = vmul.f32 %v2814_v53, %v3080_v21 }
 0x385   : > { %2819 = vrcp.f32 %v919_v44 }
 0x387   : > { %v2816_v56 = vpop.eup %2815 }
 0x388   : > { %v693_v48 = vpop.permute.xlu0 %692  ;;  %v923_v57 = vmul.f32 %v2816_v56, %v2804_v31  ;;  %v2779_v4 = vpop.permute.xlu1 %2778 }
 0x389   : > { %2492 = vmatpush3.msk.msra.mxu0 %vm705_vm6, %v693_v48  ;;  %v2781_v7 = vunpack.i.h.bf16 %v2779_v4  ;;  %v2780_v11 = vunpack.i.l.bf16 %v2779_v4 }
 0x38a   : > { %2494 = vmatmul.mubr.msk.f32.vlgmr.msra.gmra.mrb[0].mxu0 %vm653_vm4, %v685_v49  ;;  %2695 = vmatprep.subr.bf16.mxu0 %v2871_v3 }
 0x38b   : > { %2697 = vmatpush3.bf16.msra.mxu0 %v2696_v51  ;;  %2496 = vmatprep.mubr.msk.f32.mxu0 %vm2872_vm0, %v2873_v6  ;;  %v2818_v58 = vpop.eup %2817  ;;  %v2699_v14 = vpack.c.bf16 %v2781_v7, %v2780_v11 }
 0x38c   : > { %2521 = vmatprep.subr.mxu0 %v2873_v6  ;;  %v924_v59 = vmul.f32 %v2818_v58, %v2806_v34  ;;  %v1215_v25 = vpop.permute.xlu0 %1214  ;;  %v1205_v27 = vpop.permute.xlu1 %1204 }
 0x38e   : > { %2497 = vmatmul.mubr.msk.f32.gmra.mrb[2].mxu0 %vm653_vm4, %v686_v52 }
 0x38f   : > { %2522 = vmatpush3.msk.msra.mxu0 %vm705_vm6, %v931_v54  ;;  %2499 = vmatprep.mubr.msk.f32.mxu0 %vm2872_vm0, %v2873_v6  ;;  %v2820_v60 = vpop.eup %2819 }
 0x390   : > { %2543 = vmatprep.subr.mxu0 %v2873_v6  ;;  %v925_v61 = vmul.f32 %v2820_v60, %v2808_v36  ;;  %v1207_v29 = vpop.permute.xlu0 %1206  ;;  %v1209_v30 = vpop.permute.xlu1 %1208 }
 0x392   : > { %2500 = vmatmul.mubr.msk.f32.gmra.mrb[4].mxu0 %vm653_vm4, %v687_v55 }
 0x393   : > { %2523 = vmatprep.mubr.msk.f32.mxu0 %vm2872_vm0, %v2873_v6 }
 0x396   : > { %2524 = vmatmul.mubr.msk.f32.vlgmr.msra.gmra.mrb[6].mxu0 %vm653_vm4, %v923_v57 }
 0x397   : > { %2526 = vmatprep.mubr.msk.f32.mxu0 %vm2872_vm0, %v2873_v6  ;;  %2544 = vmatpush3.msra.mxu0 %v788_v62 }
 0x398   : > { %2702 = vmatprep.subr.bf16.mxu0 %v2871_v3 }
 0x39a   : > { %2527 = vmatmul.mubr.msk.f32.gmra.mrb[8].mxu0 %vm653_vm4, %v924_v59 }
 0x39b   : > { %2529 = vmatprep.mubr.msk.f32.mxu0 %vm2872_vm0, %v2873_v6 }
 0x39e   : > { %2530 = vmatmul.mubr.msk.f32.gmra.mrb[10].mxu0 %vm653_vm4, %v925_v61 }
 0x39f   : > { %2545 = vmatprep.mubr.msk.f32.mxu0 %vm2872_vm0, %v2873_v6 }
 0x45d   : > { %v774_v0 = vpop.f32.mrb[0].mxu0 }
 0x45e   : > { %v2495_v1 = vpop.f32.mrb[1].mxu0  ;;  %2546 = vmatmul.mubr.msk.f32.vlgmr.msra.gmra.mrb[12].mxu0 %vm557_vm2, %v774_v0 }
 0x45f   : > { %2548 = vmatprep.mubr.msk.f32.mxu0 %vm2872_vm0, %v2873_v6 }
 0x461   : > { %v779_v2 = vpop.f32.mrb[2].mxu0 }
 0x462   : > { %v2498_v5 = vpop.f32.mrb[3].mxu0  ;;  %2549 = vmatmul.mubr.msk.f32.gmra.mrb[14].mxu0 %vm557_vm2, %v779_v2 }
 0x463   : > { %2551 = vmatprep.mubr.msk.f32.mxu0 %vm2872_vm0, %v2873_v6 }
 0x465   : > { %v784_v12 = vpop.f32.mrb[4].mxu0 }
 0x466   : > { %v2501_v13 = vpop.f32.mrb[5].mxu0  ;;  %2552 = vmatmul.mubr.msk.f32.gmra.mrb[16].mxu0 %vm557_vm2, %v784_v12 }
 0x467   : > { %2575 = vmatprep.mubr.msk.f32.mxu0 %vm2872_vm0, %v2873_v6 }
 0x469   : > { %v1011_v15 = vpop.f32.mrb[6].mxu0 }
 0x46a   : > { %v2525_v16 = vpop.f32.mrb[7].mxu0  ;;  %2535 = vmatmul.mubr.msk.f32.vlgmr.msra.gmra.mrb[18].mxu1 %vm557_vm2, %v1011_v15 }
 0x46b   : > { %2701 = vmatpush3.bf16.xpose.msk.msra.mxu1 %vm3032_vm3, %v2699_v14  ;;  %2537 = vmatprep.mubr.msk.f32.mxu1 %vm2872_vm0, %v2873_v6 }
 0x46c   : > { %2558 = vmatprep.subr.mxu1 %v2873_v6 }
 0x46d   : > { %v1016_v17 = vpop.f32.mrb[8].mxu0 }
 0x46e   : > { %v2528_v19 = vpop.f32.mrb[9].mxu0  ;;  %2538 = vmatmul.mubr.msk.f32.gmra.mrb[20].mxu1 %vm557_vm2, %v1016_v17 }
 0x46f   : > { %2540 = vmatprep.mubr.msk.f32.mxu1 %vm2872_vm0, %v2873_v6 }
 0x471   : > { %v1021_v21 = vpop.f32.mrb[10].mxu0 }
 0x472   : > { %v2531_v26 = vpop.f32.mrb[11].mxu0  ;;  %2541 = vmatmul.mubr.msk.f32.gmra.mrb[22].mxu1 %vm557_vm2, %v1021_v21 }
 0x473   : > { %2559 = vmatpush3.xpose.msk.msra.mxu1 %vm557_vm2, %v1215_v25  ;;  %2560 = vmatprep.mubr.msk.f32.mxu1 %vm2872_vm0, %v2873_v6 }
 0x474   : > { %2584 = vmatprep.subr.mxu1 %v2873_v6 }
 0x476   : > { %2561 = vmatmul.mubr.msk.f32.vlgmr.msra.gmra.mrb[24].mxu1 %vm557_vm2, %v1205_v27 }
 0x477   : > { %2563 = vmatprep.mubr.msk.f32.mxu1 %vm2872_vm0, %v2873_v6 }
 0x47a   : > { %2564 = vmatmul.mubr.msk.f32.gmra.mrb[26].mxu1 %vm557_vm2, %v1207_v29 }
 0x47b   : > { %2566 = vmatprep.mubr.msk.f32.mxu1 %vm2872_vm0, %v2873_v6 }
 0x47e   : > { %2567 = vmatmul.mubr.msk.f32.gmra.mrb[28].mxu1 %vm557_vm2, %v1209_v30 }
 0x47f   : > { %2586 = vmatprep.mubr.msk.f32.mxu1 %vm2872_vm0, %v2873_v6 }
 0x531   : > { %v1190_v31 = vpop.f32.mrb[12].mxu0 }
 0x532   : > { %v2547_v32 = vpop.f32.mrb[13].mxu0 }
 0x535   : > { %v1195_v33 = vpop.f32.mrb[14].mxu0 }
 0x536   : > { %v2550_v34 = vpop.f32.mrb[15].mxu0 }
 0x539   : > { %v1200_v35 = vpop.f32.mrb[16].mxu0 }
 0x53a   : > { %v2553_v36 = vpop.f32.mrb[17].mxu0 }
 0x53d   : > { %v1101_v37 = vpop.f32.mrb[18].mxu1 }
 0x53e   : > { %v3162_v38 = vadd.f32 %v1190_v31, %v1101_v37  ;;  %v2536_v39 = vpop.f32.mrb[19].mxu1 }
 0x541   : > { %v1106_v40 = vpop.f32.mrb[20].mxu1 }
 0x542   : > { %v3164_v41 = vadd.f32 %v1195_v33, %v1106_v40  ;;  %v2539_v42 = vpop.f32.mrb[21].mxu1 }
 0x545   : > { %v1111_v43 = vpop.f32.mrb[22].mxu1 }
 0x546   : > { %v3166_v44 = vadd.f32 %v1200_v35, %v1111_v43  ;;  %v2542_v45 = vpop.f32.mrb[23].mxu1  ;;  %v1440_v35 = vld [vmem:[%s3378_s3 + $0x10] sm:$0xff] }
 0x547   : > { %2585 = vmatpush3.msra.mxu1 %v1440_v35 }
 0x548   : > { %2730 = vmatprep.subr.bf16.mxu1 %v2871_v3 }
 0x549   : > { %v1294_v46 = vpop.f32.mrb[24].mxu1 }
 0x54a   : > { %v2562_v47 = vpop.f32.mrb[25].mxu1  ;;  %v1308_v48 = vsel %vm653_vm4, %v1294_v46, -inf }
 0x54b   : > { %1309 = vmax.xlane.f32.xlu0 %v1308_v48 }
 0x54d   : > { %v1299_v49 = vpop.f32.mrb[26].mxu1 }
 0x54e   : > { %v2565_v50 = vpop.f32.mrb[27].mxu1  ;;  %v1311_v51 = vsel %vm653_vm4, %v1299_v49, -inf }
 0x54f   : > { %1312 = vmax.xlane.f32.xlu1 %v1311_v51 }
 0x551   : > { %v1304_v52 = vpop.f32.mrb[28].mxu1 }
 0x552   : > { %v2568_v53 = vpop.f32.mrb[29].mxu1  ;;  %v1314_v54 = vsel %vm660_vm5, %v1304_v52, -inf }
 0x553   : > { %1315 = vmax.xlane.f32.xlu0 %v1314_v54 }
 0x560   : > { %2783 = vrot.lane.b32.xlu1 %v3012_v18, %s2881_s21 }
 0x564   : > { %2788 = vrot.lane.b32.xlu1 %v3012_v18, %s2882_s22 }
 0x5d8   : > { %v1310_v55 = vpop.xlane.xlu0 %1309 }
 0x5d9   : > { %v1317_v56 = vsub.f32 %v1294_v46, %v1310_v55 }
 0x5db   : > { %v1320_v57 = vmul.f32 1.442695, %v1317_v56 }
 0x5dc   : > { %v1313_v58 = vpop.xlane.xlu1 %1312 }
 0x5dd   : > { %2821 = vpow2.f32 %v1320_v57  ;;  %v1318_v59 = vsub.f32 %v1299_v49, %v1313_v58 }
 0x5df   : > { %v1322_v60 = vmul.f32 1.442695, %v1318_v59 }
 0x5e0   : > { %v2784_v61 = vpop.permute.xlu1 %2783  ;;  %v1316_v7 = vpop.xlane.xlu0 %1315 }
 0x5e1   : > { %2823 = vpow2.f32 %v1322_v60  ;;  %v2786_v62 = vunpack.i.h.bf16 %v2784_v61  ;;  %v2785_v63 = vunpack.i.l.bf16 %v2784_v61  ;;  %v1319_v11 = vsub.f32 %v1304_v52, %v1316_v7 }
 0x5e3   : > { %v2703_v0 = vpack.c.bf16 %v2786_v62, %v2785_v63  ;;  %v1324_v12 = vmul.f32 1.442695, %v1319_v11 }
 0x5e4   : > { %v2789_v15 = vpop.permute.xlu1 %2788 }
 0x5e5   : > { %2704 = vmatpush3.bf16.msra.mxu0 %v2703_v0  ;;  %2825 = vpow2.f32 %v1324_v12  ;;  %v2790_v21 = vunpack.i.l.bf16 %v2789_v15 }
 0x5e6   : > { %2573 = vmatprep.subr.mxu0 %v2873_v6 }
 0x5e7   : > { %v2822_v1 = vpop.eup %2821 }
 0x5e8   : > { %v1326_v2 = vsel %vm653_vm4, %v2822_v1, 0.0 }
 0x5e9   : > { %1327 = vadd.xlane.f32.xlu0 %v1326_v2 }
 0x5eb   : > { %v2824_v4 = vpop.eup %2823 }
 0x5ec   : > { %v1329_v5 = vsel %vm653_vm4, %v2824_v4, 0.0 }
 0x5ed   : > { %1330 = vadd.xlane.f32.xlu1 %v1329_v5 }
 0x5ef   : > { %v2826_v13 = vpop.eup %2825 }
 0x5f0   : > { %v1332_v14 = vsel %vm660_vm5, %v2826_v13, 0.0 }
 0x5fe   : > { %1543 = vrot.lane.b32.xlu1 %v3016_v20, %s2882_s22 }
 0x5ff   : > { %1345 = vrot.lane.b32.xlu0 %v3016_v20, %s2881_s21 }
 0x602   : > { %1535 = vrot.lane.b32.xlu1 %v3020_v22, %s2883_s23  ;;  %v2791_v22 = vunpack.i.h.bf16 %v2789_v15 }
 0x604   : > { %v2706_v27 = vpack.c.bf16 %v2791_v22, %v2790_v21 }
 0x61e   : > { %1333 = vadd.xlane.f32.xlu0 %v1332_v14 }
 0x634   : > { %1533 = vrot.lane.b32.xlu0 %v3022_v23, %s2883_s23 }
 0x638   : > { %1537 = vrot.lane.b32.xlu0 %v3027_v24, %s2883_s23 }
 0x676   : > { %v1328_v16 = vpop.xlane.xlu0 %1327 }
 0x677   : > { %2827 = vrcp.f32 %v1328_v16 }
 0x67a   : > { %v1331_v17 = vpop.xlane.xlu1 %1330  ;;  %v1346_v19 = vpop.permute.xlu0 %1345 }
 0x67b   : > { %2829 = vrcp.f32 %v1331_v17  ;;  %2574 = vmatpush3.msk.msra.mxu0 %vm705_vm6, %v1346_v19 }
 0x67c   : > { %2705 = vmatprep.subr.bf16.mxu0 %v2871_v3 }
 0x67e   : > { %v1544_v29 = vpop.permute.xlu1 %1543 }
 0x681   : > { %v2828_v25 = vpop.eup %2827 }
 0x682   : > { %v1338_v26 = vmul.f32 %v2828_v25, %v2822_v1  ;;  %v1536_v33 = vpop.permute.xlu1 %1535 }
 0x684   : > { %2576 = vmatmul.mubr.msk.f32.vlgmr.msra.gmra.mrb[18].mxu0 %vm653_vm4, %v1338_v26 }
 0x685   : > { %v2830_v23 = vpop.eup %2829  ;;  %2708 = vmatpush3.bf16.xpose.msk.msra.mxu0 %vm3032_vm3, %v2706_v27  ;;  %2578 = vmatprep.mubr.msk.f32.mxu0 %vm2872_vm0, %v2873_v6 }
 0x686   : > { %v1339_v24 = vmul.f32 %v2830_v23, %v2824_v4  ;;  %2599 = vmatprep.subr.mxu0 %v2873_v6 }
 0x688   : > { %2579 = vmatmul.mubr.msk.f32.gmra.mrb[20].mxu0 %vm653_vm4, %v1339_v24 }
 0x689   : > { %2581 = vmatprep.mubr.msk.f32.mxu0 %vm2872_vm0, %v2873_v6 }
 0x68d   : > { %2600 = vmatpush3.xpose.msk.msra.mxu0 %vm557_vm2, %v1544_v29 }
 0x68e   : > { %2709 = vmatprep.subr.bf16.mxu0 %v2871_v3 }
 0x6ab   : > { %v1334_v30 = vpop.xlane.xlu0 %1333 }
 0x6ac   : > { %2831 = vrcp.f32 %v1334_v30 }
 0x6af   : > { %v1534_v32 = vpop.permute.xlu0 %1533 }
 0x6b3   : > { %v1538_v34 = vpop.permute.xlu0 %1537 }
 0x6b6   : > { %v2832_v28 = vpop.eup %2831 }
 0x6b7   : > { %v1340_v31 = vmul.f32 %v2832_v28, %v2826_v13  ;;  %v1769_v28 = vld [vmem:[%s3378_s3 + $0x18] sm:$0xff] }
 0x6b9   : > { %2582 = vmatmul.mubr.msk.f32.gmra.mrb[22].mxu0 %vm653_vm4, %v1340_v31 }
 0x6ba   : > { %2601 = vmatprep.mubr.msk.f32.mxu0 %vm2872_vm0, %v2873_v6 }
 0x6bd   : > { %2602 = vmatmul.mubr.msk.f32.vlgmr.msra.gmra.mrb[24].mxu0 %vm557_vm2, %v1534_v32 }
 0x6be   : > { %2604 = vmatprep.mubr.msk.f32.mxu0 %vm2872_vm0, %v2873_v6 }
 0x6c1   : > { %2605 = vmatmul.mubr.msk.f32.gmra.mrb[26].mxu0 %vm557_vm2, %v1536_v33 }
 0x6c2   : > { %2607 = vmatprep.mubr.msk.f32.mxu0 %vm2872_vm0, %v2873_v6 }
 0x6c5   : > { %2608 = vmatmul.mubr.msk.f32.gmra.mrb[28].mxu0 %vm557_vm2, %v1538_v34 }
 0x6c6   : > { %2616 = vmatprep.mubr.msk.f32.mxu0 %vm2872_vm0, %v2873_v6 }
 0x757   : > { %v1426_v36 = vpop.f32.mrb[18].mxu0 }
 0x758   : > { %v2577_v37 = vpop.f32.mrb[19].mxu0  ;;  %2587 = vmatmul.mubr.msk.f32.vlgmr.msra.gmra.mrb[30].mxu1 %vm557_vm2, %v1426_v36 }
 0x759   : > { %2589 = vmatprep.mubr.msk.f32.mxu1 %vm2872_vm0, %v2873_v6 }
 0x75b   : > { %v1431_v39 = vpop.f32.mrb[20].mxu0 }
 0x75c   : > { %v2580_v40 = vpop.f32.mrb[21].mxu0  ;;  %2590 = vmatmul.mubr.msk.f32.gmra.mrb[32].mxu1 %vm557_vm2, %v1431_v39  ;;  %v2351_v39 = vld [vmem:[%s3379_s4] ss:$0 sm:$0xff] }
 0x75d   : > { %2592 = vmatprep.mubr.msk.f32.mxu1 %vm2872_vm0, %v2873_v6 }
 0x78c   : > { %v1436_v42 = vpop.f32.mrb[22].mxu0 }
 0x78d   : > { %v2583_v43 = vpop.f32.mrb[23].mxu0  ;;  %2593 = vmatmul.mubr.msk.f32.gmra.mrb[34].mxu1 %vm557_vm2, %v1436_v42 }
 0x78e   : > { %2619 = vmatprep.mubr.msk.f32.mxu1 %vm2872_vm0, %v2873_v6 }
 0x790   : > { %v1623_v45 = vpop.f32.mrb[24].mxu0 }
 0x791   : > { %v2603_v46 = vpop.f32.mrb[25].mxu0  ;;  %v1637_v47 = vsel %vm653_vm4, %v1623_v45, -inf }
 0x792   : > { %1638 = vmax.xlane.f32.xlu1 %v1637_v47 }
 0x794   : > { %v1628_v48 = vpop.f32.mrb[26].mxu0 }
 0x795   : > { %v2606_v49 = vpop.f32.mrb[27].mxu0  ;;  %v1640_v50 = vsel %vm653_vm4, %v1628_v48, -inf }
 0x796   : > { %1641 = vmax.xlane.f32.xlu0 %v1640_v50 }
 0x798   : > { %v1633_v51 = vpop.f32.mrb[28].mxu0 }
 0x799   : > { %v2609_v52 = vpop.f32.mrb[29].mxu0  ;;  %v1643_v53 = vsel %vm660_vm5, %v1633_v51, -inf }
 0x79a   : > { %1644 = vmax.xlane.f32.xlu0 %v1643_v53 }
 0x81f   : > { %v1639_v54 = vpop.xlane.xlu1 %1638 }
 0x820   : > { %v1646_v55 = vsub.f32 %v1623_v45, %v1639_v54 }
 0x822   : > { %v1649_v56 = vmul.f32 1.442695, %v1646_v55 }
 0x823   : > { %v1642_v57 = vpop.xlane.xlu0 %1641 }
 0x824   : > { %2833 = vpow2.f32 %v1649_v56  ;;  %v1647_v58 = vsub.f32 %v1628_v48, %v1642_v57 }
 0x826   : > { %v1651_v59 = vmul.f32 1.442695, %v1647_v58 }
 0x827   : > { %v1645_v60 = vpop.xlane.xlu0 %1644 }
 0x828   : > { %2835 = vpow2.f32 %v1651_v59  ;;  %v1648_v61 = vsub.f32 %v1633_v51, %v1645_v60 }
 0x82a   : > { %v1653_v62 = vmul.f32 1.442695, %v1648_v61 }
 0x82b   : > { %v1516_v63 = vpop.f32.mrb[30].mxu1 }
 0x82c   : > { %2837 = vpow2.f32 %v1653_v62  ;;  %v3224_v0 = vadd.f32 %v1516_v63, %v3162_v38  ;;  %v2588_v1 = vpop.f32.mrb[31].mxu1 }
 0x82e   : > { %v2834_v2 = vpop.eup %2833 }
 0x82f   : > { %v1521_v4 = vpop.f32.mrb[32].mxu1  ;;  %v1655_v5 = vsel %vm653_vm4, %v2834_v2, 0.0 }
 0x830   : > { %v3228_v7 = vadd.f32 %v1521_v4, %v3164_v41  ;;  %1656 = vadd.xlane.f32.xlu1 %v1655_v5  ;;  %v2591_v11 = vpop.f32.mrb[33].mxu1 }
 0x832   : > { %v2836_v12 = vpop.eup %2835 }
 0x833   : > { %v1658_v13 = vsel %vm653_vm4, %v2836_v12, 0.0 }
 0x834   : > { %1659 = vadd.xlane.f32.xlu0 %v1658_v13  ;;  %v1937_v13 = vld [vmem:[%s3382_s7 + $0x8] sm:$0xff] }
 0x836   : > { %v2838_v14 = vpop.eup %2837 }
 0x837   : > { %v1661_v15 = vsel %vm660_vm5, %v2838_v14, 0.0 }
 0x838   : > { %1662 = vadd.xlane.f32.xlu1 %v1661_v15  ;;  %v1938_v15 = vld [vmem:[%s3382_s7 + $0x10] sm:$0xff] }
 0x849   : > { %1674 = vrot.lane.b32.xlu1 %v3016_v20, %s2884_s28 }
 0x84a   : > { %2793 = vrot.lane.b32.xlu0 %v3012_v18, %s2884_s28 }
 0x860   : > { %v1526_v38 = vpop.f32.mrb[34].mxu1 }
 0x861   : > { %v1532_v16 = vadd.f32 %v1526_v38, %v3166_v44  ;;  %v2594_v41 = vpop.f32.mrb[35].mxu1  ;;  %v1939_v38 = vld [vmem:[%s3382_s7 + $0x18] sm:$0xff] }
 0x8bd   : > { %v1657_v17 = vpop.xlane.xlu1 %1656 }
 0x8be   : > { %2839 = vrcp.f32 %v1657_v17 }
 0x8c1   : > { %v1660_v19 = vpop.xlane.xlu0 %1659 }
 0x8c2   : > { %2841 = vrcp.f32 %v1660_v19 }
 0x8c5   : > { %v1663_v22 = vpop.xlane.xlu1 %1662  ;;  %v2794_v21 = vpop.permute.xlu0 %2793 }
 0x8c6   : > { %2843 = vrcp.f32 %v1663_v22  ;;  %v2796_v25 = vunpack.i.h.bf16 %v2794_v21  ;;  %v2795_v26 = vunpack.i.l.bf16 %v2794_v21 }
 0x8c8   : > { %v2710_v27 = vpack.c.bf16 %v2796_v25, %v2795_v26  ;;  %v2840_v23 = vpop.eup %2839 }
 0x8c9   : > { %v1667_v20 = vmul.f32 %v2840_v23, %v2834_v2  ;;  %v1675_v24 = vpop.permute.xlu1 %1674 }
 0x8ca   : > { %2711 = vmatpush3.bf16.msra.mxu0 %v2710_v27  ;;  %2732 = vmatpush3.bf16.msra.mxu1 %v2710_v27 }
 0x8cb   : > { %2614 = vmatprep.subr.mxu0 %v2873_v6  ;;  %2731 = vmatprep.subr.mxu1 %v2873_v6 }
 0x8cc   : > { %v2842_v18 = vpop.eup %2841 }
 0x8cd   : > { %v1668_v44 = vmul.f32 %v2842_v18, %v2836_v12  ;;  %v1936_v12 = vld [vmem:[%s3382_s7] sm:$0xff] }
 0x8ce   : > { %2615 = vmatpush3.msk.msra.mxu0 %vm705_vm6, %v1675_v24  ;;  %2733 = vmatpush3.msk.msra.mxu1 %vm705_vm6, %v1675_v24  ;;  %v2353_v24 = vld [vmem:[%s3381_s6] ss:$0 sm:$0xff] }
 0x8cf   : > { %2617 = vmatmul.mubr.msk.f32.vlgmr.msra.gmra.mrb[30].mxu0 %vm653_vm4, %v1667_v20  ;;  %2620 = vmatmul.mubr.msk.f32.vlgmr.msra.gmra.mrb[36].mxu1 %vm653_vm4, %v1668_v44  ;;  %v2352_v20 = vld [vmem:[%s3380_s5] ss:$0 sm:$0xff] }
 0x8d0   : > { %v2844_v29 = vpop.eup %2843  ;;  %2622 = vmatprep.mubr.msk.f32.mxu1 %vm2872_vm0, %v2873_v6  ;;  %2625 = vmatprep.subr.mxu0 %v2873_v6 }
 0x8d1   : > { %v1669_v30 = vmul.f32 %v2844_v29, %v2838_v14  ;;  %2627 = vmatprep.mubr.msk.f32.mxu0 %vm2872_vm0, %v2873_v6  ;;  %2712 = vmatprep.subr.bf16.mxu1 %v2871_v3  ;;  %v2713_v14 = vpack.c.bf16 %v1937_v13, %v1936_v12 }
 0x8d2   : > { %2626 = vmatpush3.msra.mxu0 %v1769_v28 }
 0x8d3   : > { %2623 = vmatmul.mubr.msk.f32.gmra.mrb[38].mxu1 %vm653_vm4, %v1669_v30  ;;  %2718 = vmatprep.subr.bf16.mxu0 %v2871_v3 }
 0x8d4   : > { %2644 = vmatprep.mubr.msk.f32.mxu1 %vm2872_vm0, %v2873_v6  ;;  %2714 = vmatpush3.bf16.msra.mxu1 %v2713_v14 }
 0x8d5   : > { %2715 = vmatprep.subr.bf16.mxu1 %v2871_v3 }
 0x9a2   : > { %v1755_v31 = vpop.f32.mrb[30].mxu0  ;;  %v1760_v32 = vpop.f32.mrb[36].mxu1 }
 0x9a3   : > { %v2618_v33 = vpop.f32.mrb[31].mxu0  ;;  %v2621_v34 = vpop.f32.mrb[37].mxu1  ;;  %2628 = vmatmul.mubr.msk.f32.vlgmr.msra.gmra.mrb[32].mxu0 %vm557_vm2, %v1755_v31 }
 0x9a4   : > { %2630 = vmatprep.mubr.msk.f32.mxu0 %vm2872_vm0, %v2873_v6 }
 0x9a6   : > { %v1765_v35 = vpop.f32.mrb[38].mxu1 }
 0x9a7   : > { %v2624_v36 = vpop.f32.mrb[39].mxu1  ;;  %2631 = vmatmul.mubr.msk.f32.gmra.mrb[34].mxu0 %vm557_vm2, %v1760_v32 }
 0x9a8   : > { %2633 = vmatprep.mubr.msk.f32.mxu0 %vm2872_vm0, %v2873_v6 }
 0x9ab   : > { %2634 = vmatmul.mubr.msk.f32.gmra.mrb[36].mxu0 %vm557_vm2, %v1765_v35 }
 0x9ac   : > { %2669 = vmatprep.mubr.msk.f32.mxu0 %vm2872_vm0, %v2873_v6 }
 0xa76   : > { %v1845_v37 = vpop.f32.mrb[32].mxu0 }
 0xa77   : > { %v1859_v40 = vadd.f32 %v1845_v37, %v3224_v0  ;;  %v2629_v42 = vpop.f32.mrb[33].mxu0 }
 0xa79   : > { %v1869_v43 = vadd.f32 %v2351_v39, %v1859_v40  ;;  %v2064_v40 = vld [vmem:[%s3384_s9 + $0x8] sm:$0xff] }
 0xa7a   : > { %v1850_v45 = vpop.f32.mrb[34].mxu0 }
 0xa7b   : > { %v1860_v46 = vadd.f32 %v1850_v45, %v3228_v7  ;;  %v2632_v47 = vpop.f32.mrb[35].mxu0  ;;  %v1872_v48 = vadd.f32 %v1869_v43, %v2990_v8  ;;  %v2065_v43 = vld [vmem:[%s3384_s9 + $0x10] sm:$0xff]  ;;  %v2066_v45 = vld [vmem:[%s3384_s9 + $0x18] sm:$0xff] }
 0xa7c   : > { %v2067_v47 = vld [vmem:[%s3384_s9 + $0x20] sm:$0xff] }
 0xa7d   : > { %v1870_v49 = vadd.f32 %v2351_v39, %v1860_v46  ;;  %v1877_v50 = vsel %vm455_vm1, %v1872_v48, 0.0  ;;  %v2722_v46 = vpack.c.bf16 %v2066_v45, %v2065_v43 }
 0xa7e   : > { %1878 = vadd.xlane.f32.xlu1 %v1877_v50  ;;  %v1855_v51 = vpop.f32.mrb[36].mxu0  ;;  %v2069_v50 = vld [vmem:[%s3384_s9 + $0x30] sm:$0xff] }
 0xa7f   : > { %v1861_v52 = vadd.f32 %v1855_v51, %v1532_v16  ;;  %v2635_v53 = vpop.f32.mrb[37].mxu0  ;;  %v1873_v54 = vadd.f32 %v1870_v49, %v2997_v9  ;;  %v2716_v16 = vpack.c.bf16 %v1939_v38, %v1938_v15  ;;  %v2070_v51 = vld [vmem:[%s3384_s9 + $0x38] sm:$0xff] }
 0xa80   : > { %v2354_v53 = vld [vmem:[%s3383_s8] ss:$0 sm:$0xff] }
 0xa81   : > { %v1871_v55 = vadd.f32 %v2351_v39, %v1861_v52  ;;  %v1880_v56 = vsel %vm455_vm1, %v1873_v54, 0.0  ;;  %2717 = vmatpush3.bf16.msra.mxu1 %v2716_v16  ;;  %v2063_v39 = vld [vmem:[%s3384_s9] sm:$0xff]  ;;  %v2728_v52 = vpack.c.bf16 %v2070_v51, %v2069_v50 }
 0xa82   : > { %1881 = vadd.xlane.f32.xlu0 %v1880_v56  ;;  %v2719_v42 = vpack.c.bf16 %v2064_v40, %v2063_v39 }
 0xa83   : > { %v1874_v57 = vadd.f32 %v1871_v55, %v3003_v10 }
 0xa84   : > { %2720 = vmatpush3.bf16.msra.mxu0 %v2719_v42 }
 0xa85   : > { %v1884_v58 = vsel %vm1883_vm7, %v1874_v57, 0.0  ;;  %2721 = vmatprep.subr.bf16.mxu0 %v2871_v3 }
 0xa86   : > { %1885 = vadd.xlane.f32.xlu0 %v1884_v58 }
 0xa88   : > { %2723 = vmatpush3.bf16.msra.mxu0 %v2722_v46 }
 0xa89   : > { %2724 = vmatprep.subr.bf16.mxu0 %v2871_v3 }
 0xb0b   : > { %v1879_v8 = vpop.xlane.xlu1 %1878 }
 0xb0c   : > { %v1888_v59 = vmul.f32 0.03125, %v1879_v8 }
 0xb0e   : > { %v1891_v60 = vsub.f32 %v1872_v48, %v1888_v59  ;;  %v2068_v48 = vld [vmem:[%s3384_s9 + $0x28] sm:$0xff] }
 0xb0f   : > { %v1882_v61 = vpop.xlane.xlu0 %1881  ;;  %v2725_v49 = vpack.c.bf16 %v2068_v48, %v2067_v47 }
 0xb10   : > { %v1889_v62 = vmul.f32 0.03125, %v1882_v61  ;;  %v1894_v63 = vmul.f32 %v1891_v60, %v1891_v60 }
 0xb11   : > { %2726 = vmatpush3.bf16.msra.mxu0 %v2725_v49 }
 0xb12   : > { %v1892_v0 = vsub.f32 %v1873_v54, %v1889_v62  ;;  %v1897_v1 = vsel %vm455_vm1, %v1894_v63, 0.0  ;;  %2727 = vmatprep.subr.bf16.mxu0 %v2871_v3 }
 0xb13   : > { %1898 = vadd.xlane.f32.xlu1 %v1897_v1  ;;  %v1886_v9 = vpop.xlane.xlu0 %1885 }
 0xb14   : > { %v1890_v2 = vmul.f32 0.03125, %v1886_v9  ;;  %v1895_v4 = vmul.f32 %v1892_v0, %v1892_v0 }
 0xb15   : > { %2729 = vmatpush3.bf16.msra.mxu0 %v2728_v52 }
 0xb16   : > { %v1893_v5 = vsub.f32 %v1874_v57, %v1890_v2  ;;  %v1900_v7 = vsel %vm455_vm1, %v1895_v4, 0.0 }
 0xb17   : > { %1901 = vadd.xlane.f32.xlu0 %v1900_v7 }
 0xb18   : > { %v1896_v10 = vmul.f32 %v1893_v5, %v1893_v5 }
 0xb1a   : > { %v1903_v11 = vsel %vm1883_vm7, %v1896_v10, 0.0 }
 0xb1b   : > { %1904 = vadd.xlane.f32.xlu1 %v1903_v11 }
 0xba0   : > { %v1899_v41 = vpop.xlane.xlu1 %1898 }
 0xba1   : > { %v1906_v17 = vmul.f32 0.03125, %v1899_v41 }
 0xba3   : > { %v1909_v19 = vadd.f32 1e-05, %v1906_v17 }
 0xba4   : > { %v1902_v22 = vpop.xlane.xlu0 %1901 }
 0xba5   : > { %2845 = vrsqrt.f32 %v1909_v19  ;;  %v1907_v21 = vmul.f32 0.03125, %v1902_v22 }
 0xba7   : > { %v1910_v25 = vadd.f32 1e-05, %v1907_v21 }
 0xba8   : > { %v1905_v26 = vpop.xlane.xlu1 %1904 }
 0xba9   : > { %2847 = vrsqrt.f32 %v1910_v25  ;;  %v1908_v27 = vmul.f32 0.03125, %v1905_v26 }
 0xbab   : > { %v1911_v23 = vadd.f32 1e-05, %v1908_v27 }
 0xbad   : > { %2849 = vrsqrt.f32 %v1911_v23 }
 0xbaf   : > { %v2846_v18 = vpop.eup %2845 }
 0xbb0   : > { %v1915_v44 = vmul.f32 %v2846_v18, %v1891_v60  ;;  %v2358_v18 = vld [vmem:[%s3385_s10] ss:$0 sm:$0xff] }
 0xbb2   : > { %v1924_v29 = vmul.f32 %v2352_v20, %v1915_v44 }
 0xbb3   : > { %v2848_v30 = vpop.eup %2847 }
 0xbb4   : > { %v3296_v28 = vadd.f32 %v2353_v24, %v1924_v29  ;;  %v1916_v31 = vmul.f32 %v2848_v30, %v1892_v0 }
 0xbb6   : > { %2645 = vmatmul.mubr.msk.f32.vlgmr.msra.gmra.mrb[40].mxu1 %vm455_vm1, %v3296_v28  ;;  %v1925_v32 = vmul.f32 %v2352_v20, %v1916_v31 }
 0xbb7   : > { %v2850_v33 = vpop.eup %2849  ;;  %2647 = vmatprep.mubr.msk.f32.mxu1 %vm2872_vm0, %v2873_v6 }
 0xbb8   : > { %v3302_v34 = vadd.f32 %v2353_v24, %v1925_v32  ;;  %v1917_v35 = vmul.f32 %v2850_v33, %v1893_v5 }
 0xbba   : > { %2648 = vmatmul.mubr.msk.f32.gmra.mrb[42].mxu1 %vm455_vm1, %v3302_v34  ;;  %v1926_v36 = vmul.f32 %v2352_v20, %v1917_v35 }
 0xbbb   : > { %2650 = vmatprep.mubr.msk.f32.mxu1 %vm2872_vm0, %v2873_v6 }
 0xbbc   : > { %v3308_v37 = vadd.f32 %v2353_v24, %v1926_v36 }
 0xbbe   : > { %2651 = vmatmul.mubr.msk.f32.gmra.mrb[44].mxu1 %vm455_vm1, %v3308_v37 }
 0xc89   : > { %v2022_v54 = vpop.f32.mrb[40].mxu1 }
 0xc8a   : > { %v2023_v55 = vadd.f32 %v2354_v53, %v2022_v54  ;;  %v2646_v56 = vpop.f32.mrb[41].mxu1 }
 0xc8c   : > { %v2036_v57 = vmul.f32 %v2023_v55, %v2023_v55 }
 0xc8d   : > { %v2027_v58 = vpop.f32.mrb[42].mxu1 }
 0xc8e   : > { %v2039_v3 = vmul.f32 %v2036_v57, %v2023_v55  ;;  %v2028_v8 = vadd.f32 %v2354_v53, %v2027_v58  ;;  %v2649_v59 = vpop.f32.mrb[43].mxu1 }
 0xc90   : > { %v2042_v60 = vmul.f32 0.044715, %v2039_v3  ;;  %v2037_v61 = vmul.f32 %v2028_v8, %v2028_v8 }
 0xc91   : > { %v2032_v62 = vpop.f32.mrb[44].mxu1 }
 0xc92   : > { %v2045_v63 = vadd.f32 %v2042_v60, %v2023_v55  ;;  %v2040_v0 = vmul.f32 %v2037_v61, %v2028_v8  ;;  %v2033_v1 = vadd.f32 %v2354_v53, %v2032_v62  ;;  %v2652_v9 = vpop.f32.mrb[45].mxu1 }
 0xc94   : > { %v2048_v2 = vmul.f32 0.7978846, %v2045_v63  ;;  %v2043_v4 = vmul.f32 0.044715, %v2040_v0  ;;  %v2038_v5 = vmul.f32 %v2033_v1, %v2033_v1 }
 0xc96   : > { %2851 = vtanh.f32 %v2048_v2  ;;  %v2046_v7 = vadd.f32 %v2043_v4, %v2028_v8  ;;  %v2041_v10 = vmul.f32 %v2038_v5, %v2033_v1  ;;  %v2363_v2 = vld [vmem:[%s3387_s12] ss:$0 sm:$0xff] }
 0xc98   : > { %v2049_v11 = vmul.f32 0.7978846, %v2046_v7  ;;  %v2044_v12 = vmul.f32 0.044715, %v2041_v10 }
 0xc9a   : > { %2853 = vtanh.f32 %v2049_v11  ;;  %v2047_v13 = vadd.f32 %v2044_v12, %v2033_v1 }
 0xc9c   : > { %v2050_v14 = vmul.f32 0.7978846, %v2047_v13 }
 0xc9e   : > { %2855 = vtanh.f32 %v2050_v14 }
 0xca0   : > { %v2852_v15 = vpop.eup %2851 }
 0xca1   : > { %v2054_v38 = vadd.f32 1.0, %v2852_v15 }
 0xca3   : > { %v2057_v16 = vmul.f32 0.5, %v2054_v38 }
 0xca4   : > { %v2854_v41 = vpop.eup %2853 }
 0xca5   : > { %v2060_v17 = vmul.f32 %v2057_v16, %v2023_v55  ;;  %v2055_v19 = vadd.f32 1.0, %v2854_v41 }
 0xca7   : > { %2670 = vmatmul.mubr.msk.f32.vlgmr.msra.gmra.mrb[38].mxu0 %vm2078_vm8, %v2060_v17  ;;  %v2058_v22 = vmul.f32 0.5, %v2055_v19 }
 0xca8   : > { %v2856_v21 = vpop.eup %2855  ;;  %2672 = vmatprep.mubr.msk.f32.mxu0 %vm2872_vm0, %v2873_v6 }
 0xca9   : > { %v2061_v25 = vmul.f32 %v2058_v22, %v2028_v8  ;;  %v2056_v26 = vadd.f32 1.0, %v2856_v21 }
 0xcab   : > { %2673 = vmatmul.mubr.msk.f32.gmra.mrb[40].mxu0 %vm2078_vm8, %v2061_v25  ;;  %v2059_v27 = vmul.f32 0.5, %v2056_v26 }
 0xcac   : > { %2675 = vmatprep.mubr.msk.f32.mxu0 %vm2872_vm0, %v2873_v6 }
 0xcad   : > { %v2062_v23 = vmul.f32 %v2059_v27, %v2033_v1  ;;  %v2362_v1 = vld [vmem:[%s3386_s11] ss:$0 sm:$0xff] }
 0xcaf   : > { %2676 = vmatmul.mubr.msk.f32.gmra.mrb[42].mxu0 %vm2078_vm8, %v2062_v23 }
 0xd7a   : > { %v2154_v20 = vpop.f32.mrb[38].mxu0 }
 0xd7b   : > { %v2155_v44 = vadd.f32 %v2358_v18, %v2154_v20  ;;  %v2671_v24 = vpop.f32.mrb[39].mxu0 }
 0xd7d   : > { %v2168_v29 = vadd.f32 %v2155_v44, %v3296_v28 }
 0xd7e   : > { %v2159_v30 = vpop.f32.mrb[40].mxu0 }
 0xd7f   : > { %v2160_v31 = vadd.f32 %v2358_v18, %v2159_v30  ;;  %v2674_v32 = vpop.f32.mrb[41].mxu0  ;;  %v2173_v33 = vsel %vm455_vm1, %v2168_v29, 0.0 }
 0xd80   : > { %2174 = vadd.xlane.f32.xlu0 %v2173_v33 }
 0xd81   : > { %v2169_v35 = vadd.f32 %v2160_v31, %v3302_v34 }
 0xd82   : > { %v2164_v6 = vpop.f32.mrb[42].mxu0 }
 0xd83   : > { %v2165_v36 = vadd.f32 %v2358_v18, %v2164_v6  ;;  %v2677_v39 = vpop.f32.mrb[43].mxu0  ;;  %v2176_v40 = vsel %vm455_vm1, %v2169_v35, 0.0 }
 0xd84   : > { %2177 = vadd.xlane.f32.xlu1 %v2176_v40 }
 0xd85   : > { %v2170_v42 = vadd.f32 %v2165_v36, %v3308_v37 }
 0xd87   : > { %v2179_v43 = vsel %vm1883_vm7, %v2170_v42, 0.0 }
 0xd88   : > { %2180 = vadd.xlane.f32.xlu0 %v2179_v43 }
 0xe0d   : > { %v2175_v28 = vpop.xlane.xlu0 %2174 }
 0xe0e   : > { %v2182_v45 = vmul.f32 0.03125, %v2175_v28 }
 0xe10   : > { %v2185_v46 = vsub.f32 %v2168_v29, %v2182_v45 }
 0xe11   : > { %v2178_v47 = vpop.xlane.xlu1 %2177 }
 0xe12   : > { %v2183_v48 = vmul.f32 0.03125, %v2178_v47  ;;  %v2188_v49 = vmul.f32 %v2185_v46, %v2185_v46 }
 0xe14   : > { %v2186_v50 = vsub.f32 %v2169_v35, %v2183_v48  ;;  %v2191_v34 = vsel %vm455_vm1, %v2188_v49, 0.0 }
 0xe15   : > { %2192 = vadd.xlane.f32.xlu1 %v2191_v34  ;;  %v2181_v51 = vpop.xlane.xlu0 %2180 }
 0xe16   : > { %v2184_v52 = vmul.f32 0.03125, %v2181_v51  ;;  %v2189_v53 = vmul.f32 %v2186_v50, %v2186_v50 }
 0xe18   : > { %v2187_v54 = vsub.f32 %v2170_v42, %v2184_v52  ;;  %v2194_v55 = vsel %vm455_vm1, %v2189_v53, 0.0 }
 0xe19   : > { %2195 = vadd.xlane.f32.xlu0 %v2194_v55 }
 0xe1a   : > { %v2190_v37 = vmul.f32 %v2187_v54, %v2187_v54 }
 0xe1c   : > { %v2197_v56 = vsel %vm1883_vm7, %v2190_v37, 0.0 }
 0xe1d   : > { %2198 = vadd.xlane.f32.xlu1 %v2197_v56 }
 0xea2   : > { %v2193_v57 = vpop.xlane.xlu1 %2192 }
 0xea3   : > { %v2200_v58 = vmul.f32 0.03125, %v2193_v57 }
 0xea5   : > { %v2203_v3 = vadd.f32 1e-05, %v2200_v58 }
 0xea6   : > { %v2196_v8 = vpop.xlane.xlu0 %2195 }
 0xea7   : > { %2857 = vrsqrt.f32 %v2203_v3  ;;  %v2201_v59 = vmul.f32 0.03125, %v2196_v8 }
 0xea9   : > { %v2204_v60 = vadd.f32 1e-05, %v2201_v59 }
 0xeaa   : > { %v2199_v61 = vpop.xlane.xlu1 %2198 }
 0xeab   : > { %2859 = vrsqrt.f32 %v2204_v60  ;;  %v2202_v62 = vmul.f32 0.03125, %v2199_v61 }
 0xead   : > { %v2205_v63 = vadd.f32 1e-05, %v2202_v62 }
 0xeaf   : > { %2861 = vrsqrt.f32 %v2205_v63 }
 0xeb1   : > { %v2858_v0 = vpop.eup %2857 }
 0xeb2   : > { %v2209_v9 = vmul.f32 %v2858_v0, %v2185_v46 }
 0xeb4   : > { %v2218_v4 = vmul.f32 %v2362_v1, %v2209_v9 }
 0xeb5   : > { %v2860_v5 = vpop.eup %2859 }
 0xeb6   : > { %v2227_v7 = vadd.f32 %v2363_v2, %v2218_v4  ;;  %v2210_v10 = vmul.f32 %v2860_v5, %v2186_v50 }
 0xeb8   : > { %2230 = vst.msk [vmem:[%s440_s29] sm:$0xff] %vm455_vm1, %v2227_v7  ;;  %v2219_v11 = vmul.f32 %v2362_v1, %v2210_v10 }
 0xeb9   : > { %v2862_v12 = vpop.eup %2861 }
 0xeba   : > { %v2228_v13 = vadd.f32 %v2363_v2, %v2219_v11  ;;  %v2211_v14 = vmul.f32 %v2862_v12, %v2187_v54 }
 0xebc   : > { %2231 = vst.msk [vmem:[%s440_s29 + $0x8] sm:$0xff] %vm455_vm1, %v2228_v13  ;;  %v2220_v15 = vmul.f32 %v2362_v1, %v2211_v14 }
 0xebe   : > { %v2229_v38 = vadd.f32 %v2363_v2, %v2220_v15 }
 0xec0   : > { %2232 = vst.msk [vmem:[%s440_s29 + $0x10] sm:$0x7] %vm1883_vm7, %v2229_v38 }
 0xec1 PF: > { %s23_s25 = sadd.s32 1, %s2869_s25  }
 0xec2   : > { %p20_p4 = scmp.ge.s32.totalorder %s23_s25, 4  }
 0xec4   :  { %22 = sbr.rel (!%p20_p4) target bundleno = 1 (0x1), region = 102 }

</bundles_post_ra>
